<compile_context>
chip_gen: v7x
topology: tpu7x:2x2x1
jax: 0.10.0
libtpu: 0.0.40
codegen_flags: <defaults>
</compile_context>

<pallas_src>
import functools
import math

import jax
import jax.numpy as jnp
import numpy as np
from jax.experimental import pallas as pl
from jax.experimental.pallas import tpu as pltpu

BN_EPS = 1e-5
BN_SCALE = 1.0 / math.sqrt(1.0 + BN_EPS)

# Static spatial geometry of TFAencoder13 (input is 1 x 21 x 40).
H0, W0 = 21, 40
H1, W1 = 19, 19      # conv1: k=(3,4), s=(1,2)
H2, W2 = 9, 9        # conv2: k=3,     s=2
H3, W3 = 4, 4        # conv3: k=3,     s=2


def _dot(a, b):
    return jnp.dot(a, b, preferred_element_type=jnp.float32)


# -----------------------------------------------------------------------------
# In-kernel building blocks
# -----------------------------------------------------------------------------
def _attention(m, w1_ref, b1_ref, w2t_ref, b2_ref):
    """TFattention tail on the channel-mean `m` of one sample, layout (H, W).

    Linear over H -> BN(eval) -> Dropout(id) -> Sigmoid,
    then Linear over W -> BN(eval) -> Dropout(id) -> Sigmoid.
    """
    t = jax.nn.sigmoid((_dot(w1_ref[...], m) + b1_ref[...]) * BN_SCALE)
    e = jax.nn.sigmoid((_dot(t, w2t_ref[...]) + b2_ref[...]) * BN_SCALE)
    return e


def _conv_step(act, r_ref, c_ref, we_ref, be_ref, relu):
    """One conv layer, (Cin*H, W) layout -> (Cout*Ho, Wo) layout.

    r_ref : (Cin*kh*Ho, Cin*H)           one-hot row selector (None == identity)
    c_ref : (kw, W, Wo)                  one-hot column selectors (one per j)
    we_ref: (kw, Cout*Ho, Cin*kh*Ho)     kron(W[:, :, :, j].reshape(Cout,Cin*kh), I_Ho)
    be_ref: (Cout*Ho, 1)                 per-row bias
    """
    kw = we_ref.shape[0]
    rows = act if r_ref is None else _dot(r_ref[...], act)
    acc = None
    for j in range(kw):                     # kw <= 4, fully unrolled
        term = _dot(we_ref[j], _dot(rows, c_ref[j]))
        acc = term if acc is None else acc + term
    acc = acc + be_ref[...]
    if relu:
        acc = jnp.maximum(acc, 0.0)
    return acc


def _fused_kernel(x_ref,
                  a1w1_ref, a1b1_ref, a1w2t_ref, a1b2_ref,
                  r1_ref, c1_ref, w1e_ref, b1e_ref,
                  r2_ref, c2_ref, w2e_ref, b2e_ref,
                  mavg_ref, a2w1_ref, a2b1_ref, a2w2t_ref, a2b2_ref, mrep_ref,
                  r3_ref, c3_ref, w3e_ref, b3e_ref,
                  c4_ref, w4e_ref, b4e_ref,
                  exc1_ref, z1_ref, exc2_ref, z2_ref):
    # ---- TFattention 1 (input has a single channel -> channel mean == plane)
    m = x_ref[0]                                             # (21, 40)
    e1 = _attention(m, a1w1_ref, a1b1_ref, a1w2t_ref, a1b2_ref)
    exc1_ref[0] = e1
    act = m * e1                                             # (21, 40)

    # ---- conv1 + ReLU, conv2 + ReLU ----------------------------------------
    act = _conv_step(act, r1_ref, c1_ref, w1e_ref, b1e_ref, relu=True)   # (C1*19, 19)
    act = _conv_step(act, r2_ref, c2_ref, w2e_ref, b2e_ref, relu=True)   # (C2*9, 9)

    # ---- TFattention 2 + channel-broadcast excitation multiply -------------
    m2 = _dot(mavg_ref[...], act)                            # (9, 9) channel mean
    e2 = _attention(m2, a2w1_ref, a2b1_ref, a2w2t_ref, a2b2_ref)
    e2_rep = _dot(mrep_ref[...], e2)                         # (C2*9, 9) repeat over C
    act = act * e2_rep                                       # z1 after excitation
    z1_ref[0] = act
    exc2_ref[0] = e2_rep                                     # == excitate2 (.repeat)

    # ---- conv3 + ReLU, conv4 (no activation) -------------------------------
    act = _conv_step(act, r3_ref, c3_ref, w3e_ref, b3e_ref, relu=True)   # (C3*4, 4)
    out4 = _conv_step(act, None, c4_ref, w4e_ref, b4e_ref, relu=False)   # (2L, 1)
    z2_ref[0] = out4


# -----------------------------------------------------------------------------
# Host-side constant builders / weight "glue" (tiny, weights only)
# -----------------------------------------------------------------------------
def _row_select(h_in, kh, stride, h_out):
    r = np.zeros((kh * h_out, h_in), np.float32)
    for i in range(kh):
        for ho in range(h_out):
            r[i * h_out + ho, ho * stride + i] = 1.0
    return r


def _col_select(w_in, kw, stride, w_out):
    c = np.zeros((kw, w_in, w_out), np.float32)
    for j in range(kw):
        for wo in range(w_out):
            c[j, wo * stride + j, wo] = 1.0
    return c


def _block_row_select(cin, h_in, kh, stride, h_out):
    return np.kron(np.eye(cin, dtype=np.float32),
                   _row_select(h_in, kh, stride, h_out))


def _expand_conv_w(w, h_out):
    cout, cin, kh, kw = w.shape
    eye = jnp.eye(h_out, dtype=jnp.float32)
    return jnp.stack(
        [jnp.kron(w[:, :, :, j].reshape(cout, cin * kh), eye) for j in range(kw)],
        axis=0)                                              # (kw, cout*Ho, cin*kh*Ho)


def _expand_conv_b(b, h_out):
    return jnp.repeat(b, h_out).reshape(-1, 1)               # (cout*Ho, 1)


def _full_spec(arr):
    zeros = (0,) * arr.ndim
    return pl.BlockSpec(arr.shape, lambda n, _z=zeros: _z)


# -----------------------------------------------------------------------------
# TFAencoder13 forward (single fused pallas_call)
# -----------------------------------------------------------------------------
@functools.partial(jax.jit, static_argnames=("filter_num", "latent_size", "detach"))
def tfa_encoder13_forward(x, params, filter_num, latent_size, detach=True):
    N = x.shape[0]
    assert x.shape[1:] == (1, H0, W0), "TFAencoder13 expects (N, 1, 21, 40) input"
    f, lat = filter_num, latent_size
    C1, C2, C3, C4 = f, 2 * f, 4 * f, 2 * lat

    weight_inputs = [
        # --- TFattention 1 (insize [21, 40]) ---
        params["att1_w1"],
        params["att1_b1"].reshape(H0, 1),
        params["att1_w2"].T,
        params["att1_b2"].reshape(1, W0),
        # --- conv1: 1 -> C1, k=(3,4), s=(1,2) ---
        jnp.asarray(_block_row_select(1, H0, 3, 1, H1)),     # (57, 21)
        jnp.asarray(_col_select(W0, 4, 2, W1)),              # (4, 40, 19)
        _expand_conv_w(params["conv1_w"], H1),               # (4, C1*19, 57)
        _expand_conv_b(params["conv1_b"], H1),               # (C1*19, 1)
        # --- conv2: C1 -> C2, k=3, s=2 ---
        jnp.asarray(_block_row_select(C1, H1, 3, 2, H2)),    # (C1*27, C1*19)
        jnp.asarray(_col_select(W1, 3, 2, W2)),              # (3, 19, 9)
        _expand_conv_w(params["conv2_w"], H2),               # (3, C2*9, C1*27)
        _expand_conv_b(params["conv2_b"], H2),               # (C2*9, 1)
        # --- TFattention 2 (insize [9, 9]) ---
        jnp.asarray(np.kron(np.full((1, C2), 1.0 / C2, np.float32),
                            np.eye(H2, dtype=np.float32))),  # (9, C2*9)  channel mean
        params["att2_w1"],
        params["att2_b1"].reshape(H2, 1),
        params["att2_w2"].T,
        params["att2_b2"].reshape(1, W2),
        jnp.asarray(np.kron(np.ones((C2, 1), np.float32),
                            np.eye(H2, dtype=np.float32))),  # (C2*9, 9) channel repeat
        # --- conv3: C2 -> C3, k=3, s=2 ---
        jnp.asarray(_block_row_select(C2, H2, 3, 2, H3)),    # (C2*12, C2*9)
        jnp.asarray(_col_select(W2, 3, 2, W3)),              # (3, 9, 4)
        _expand_conv_w(params["conv3_w"], H3),               # (3, C3*4, C2*12)
        _expand_conv_b(params["conv3_b"], H3),               # (C3*4, 1)
        # --- conv4: C3 -> C4(=2*latent), k=4, s=1 (row selector == identity) ---
        jnp.asarray(_col_select(W3, 4, 1, 1)),               # (4, 4, 1)
        _expand_conv_w(params["conv4_w"], 1),                # (4, C4, C3*4)
        _expand_conv_b(params["conv4_b"], 1),                # (C4, 1)
    ]

    x3 = x.reshape(N, H0, W0)
    in_specs = ([pl.BlockSpec((1, H0, W0), lambda n: (n, 0, 0))]
                + [_full_spec(a) for a in weight_inputs])
    out_specs = (
        pl.BlockSpec((1, H0, W0), lambda n: (n, 0, 0)),        # excitate1
        pl.BlockSpec((1, C2 * H2, W2), lambda n: (n, 0, 0)),   # z1 (after excitation)
        pl.BlockSpec((1, C2 * H2, W2), lambda n: (n, 0, 0)),   # excitate2 (repeated)
        pl.BlockSpec((1, C4, 1), lambda n: (n, 0, 0)),         # z2 (flat)
    )
    out_shape = (
        jax.ShapeDtypeStruct((N, H0, W0), jnp.float32),
        jax.ShapeDtypeStruct((N, C2 * H2, W2), jnp.float32),
        jax.ShapeDtypeStruct((N, C2 * H2, W2), jnp.float32),
        jax.ShapeDtypeStruct((N, C4, 1), jnp.float32),
    )

    exc1, z1_2d, exc2_2d, z2_col = pl.pallas_call(
        _fused_kernel,
        grid=(N,),
        in_specs=in_specs,
        out_specs=out_specs,
        out_shape=out_shape,
        compiler_params=pltpu.CompilerParams(
            dimension_semantics=("parallel",)),
    )(x3, *weight_inputs)

    # Free, metadata-only relayouts back to the PyTorch output shapes.
    excitate1 = exc1.reshape(N, 1, H0, W0)
    z1 = z1_2d.reshape(N, C2, H2, W2)
    excitate2 = exc2_2d.reshape(N, C2, H2, W2)
    z2 = z2_col.reshape(N, 2, lat)

    if detach:
        excitate = [jax.lax.stop_gradient(excitate1),
                    jax.lax.stop_gradient(excitate2)]
    else:
        excitate = [excitate1, excitate2]
    return z1, z2, excitate


# -----------------------------------------------------------------------------
# Parameter init (deterministic, PyTorch-like uniform fan-in bounds)
# -----------------------------------------------------------------------------
def _init_linear(key, n):
    k1, k2 = jax.random.split(key)
    bound = 1.0 / math.sqrt(n)
    w = jax.random.uniform(k1, (n, n), jnp.float32, -bound, bound)
    b = jax.random.uniform(k2, (n,), jnp.float32, -bound, bound)
    return w, b


def _init_conv(key, cout, cin, kh, kw):
    k1, k2 = jax.random.split(key)
    bound = 1.0 / math.sqrt(cin * kh * kw)
    w = jax.random.uniform(k1, (cout, cin, kh, kw), jnp.float32, -bound, bound)
    b = jax.random.uniform(k2, (cout,), jnp.float32, -bound, bound)
    return w, b


def init_params(key, filter_num, latent_size):
    keys = jax.random.split(key, 8)
    p = {}
    p["att1_w1"], p["att1_b1"] = _init_linear(keys[0], H0)
    p["att1_w2"], p["att1_b2"] = _init_linear(keys[1], W0)
    p["att2_w1"], p["att2_b1"] = _init_linear(keys[2], H2)
    p["att2_w2"], p["att2_b2"] = _init_linear(keys[3], W2)
    p["conv1_w"], p["conv1_b"] = _init_conv(keys[4], filter_num, 1, 3, 4)
    p["conv2_w"], p["conv2_b"] = _init_conv(keys[5], filter_num * 2, filter_num, 3, 3)
    p["conv3_w"], p["conv3_b"] = _init_conv(keys[6], filter_num * 4, filter_num * 2, 3, 3)
    p["conv4_w"], p["conv4_b"] = _init_conv(keys[7], latent_size * 2, filter_num * 4, 4, 4)
    return p


# -----------------------------------------------------------------------------
# Plain-JAX reference (for a numerical self-check only)
# -----------------------------------------------------------------------------
def _ref_attention(x, w1, b1, w2, b2):
    m = jnp.mean(x, axis=1, keepdims=True)                               # (N,1,H,W)
    t = jax.nn.sigmoid(
        (jnp.einsum('gh,nchw->ncgw', w1, m) + b1[None, None, :, None]) * BN_SCALE)
    e = jax.nn.sigmoid(
        (jnp.einsum('vw,nchw->nchv', w2, t) + b2[None, None, None, :]) * BN_SCALE)
    return e


def _ref_conv(x, w, b, stride):
    y = jax.lax.conv_general_dilated(
        x, w, window_strides=stride, padding='VALID',
        dimension_numbers=('NCHW', 'OIHW', 'NCHW'))
    return y + b[None, :, None, None]


def reference_forward(x, params, filter_num, latent_size):
    e1 = _ref_attention(x, params["att1_w1"], params["att1_b1"],
                        params["att1_w2"], params["att1_b2"])
    z = jax.nn.relu(_ref_conv(x * e1, params["conv1_w"], params["conv1_b"], (1, 2)))
    z = jax.nn.relu(_ref_conv(z, params["conv2_w"], params["conv2_b"], (2, 2)))
    e2 = _ref_attention(z, params["att2_w1"], params["att2_b1"],
                        params["att2_w2"], params["att2_b2"])
    e2 = jnp.tile(e2, (1, filter_num * 2, 1, 1))
    z1 = z * e2
    z2 = jax.nn.relu(_ref_conv(z1, params["conv3_w"], params["conv3_b"], (2, 2)))
    z2 = _ref_conv(z2, params["conv4_w"], params["conv4_b"], (1, 1))
    z2 = z2.reshape(x.shape[0], 2, latent_size)
    return z1, z2, e1, e2


# -----------------------------------------------------------------------------
if __name__ == "__main__":
    filter_num, latent_size, batch = 4, 8, 2
    key = jax.random.PRNGKey(0)
    kx, kp = jax.random.split(key)
    x = jax.random.normal(kx, (batch, 1, H0, W0), dtype=jnp.float32)
    params = init_params(kp, filter_num, latent_size)

    z1, z2, excitate = tfa_encoder13_forward(
        x, params, filter_num=filter_num, latent_size=latent_size, detach=True)
    jax.block_until_ready((z1, z2, excitate))

    assert z1.shape == (batch, filter_num * 2, H2, W2)
    assert z2.shape == (batch, 2, latent_size)
    assert excitate[0].shape == (batch, 1, H0, W0)
    assert excitate[1].shape == (batch, filter_num * 2, H2, W2)

    # Numerical self-check vs. plain-JAX reference.  Tolerance is loose enough
    # to absorb MXU low-precision-pass rounding differences between the Pallas
    # matmul chain and XLA's conv lowering; real indexing bugs give O(1) errors.
    rz1, rz2, re1, re2 = reference_forward(x, params, filter_num, latent_size)
    np.testing.assert_allclose(np.asarray(z1), np.asarray(rz1), rtol=5e-2, atol=5e-2)
    np.testing.assert_allclose(np.asarray(z2), np.asarray(rz2), rtol=5e-2, atol=5e-2)
    np.testing.assert_allclose(np.asarray(excitate[0]), np.asarray(re1), rtol=5e-2, atol=5e-2)
    np.testing.assert_allclose(np.asarray(excitate[1]), np.asarray(re2), rtol=5e-2, atol=5e-2)

    print("KERNEL_OK")
</pallas_src>

<mosaic_0001>
module attributes {stable_mosaic.version = 11 : i64} {
  func.func @_fused_kernel(%arg0: i32, %arg1: memref<1x21x40xf32, #tpu.memory_space<vmem>>, %arg2: memref<21x21xf32, #tpu.memory_space<vmem>>, %arg3: memref<21x1xf32, #tpu.memory_space<vmem>>, %arg4: memref<40x40xf32, #tpu.memory_space<vmem>>, %arg5: memref<1x40xf32, #tpu.memory_space<vmem>>, %arg6: memref<57x21xf32, #tpu.memory_space<vmem>>, %arg7: memref<4x40x19xf32, #tpu.memory_space<vmem>>, %arg8: memref<4x76x57xf32, #tpu.memory_space<vmem>>, %arg9: memref<76x1xf32, #tpu.memory_space<vmem>>, %arg10: memref<108x76xf32, #tpu.memory_space<vmem>>, %arg11: memref<3x19x9xf32, #tpu.memory_space<vmem>>, %arg12: memref<3x72x108xf32, #tpu.memory_space<vmem>>, %arg13: memref<72x1xf32, #tpu.memory_space<vmem>>, %arg14: memref<9x72xf32, #tpu.memory_space<vmem>>, %arg15: memref<9x9xf32, #tpu.memory_space<vmem>>, %arg16: memref<9x1xf32, #tpu.memory_space<vmem>>, %arg17: memref<9x9xf32, #tpu.memory_space<vmem>>, %arg18: memref<1x9xf32, #tpu.memory_space<vmem>>, %arg19: memref<72x9xf32, #tpu.memory_space<vmem>>, %arg20: memref<96x72xf32, #tpu.memory_space<vmem>>, %arg21: memref<3x9x4xf32, #tpu.memory_space<vmem>>, %arg22: memref<3x64x96xf32, #tpu.memory_space<vmem>>, %arg23: memref<64x1xf32, #tpu.memory_space<vmem>>, %arg24: memref<4x4x1xf32, #tpu.memory_space<vmem>>, %arg25: memref<4x16x64xf32, #tpu.memory_space<vmem>>, %arg26: memref<16x1xf32, #tpu.memory_space<vmem>>, %arg27: memref<1x21x40xf32, #tpu.memory_space<vmem>>, %arg28: memref<1x72x9xf32, #tpu.memory_space<vmem>>, %arg29: memref<1x72x9xf32, #tpu.memory_space<vmem>>, %arg30: memref<1x16x1xf32, #tpu.memory_space<vmem>>) attributes {dimension_semantics = [#tpu.dimension_semantics<parallel>], iteration_bounds = array<i64: 2>, scalar_prefetch = 0 : i64, scratch_operands = 0 : i64, tpu.core_type = #tpu.core_type<tc>, window_params = [{transform_indices = @transform_0, window_bounds = array<i64: 1, 21, 40>}, {pipeline_mode = #tpu.pipeline_mode<synchronous>, transform_indices = @transform_1, window_bounds = array<i64: 21, 21>}, {pipeline_mode = #tpu.pipeline_mode<synchronous>, transform_indices = @transform_2, window_bounds = array<i64: 21, 1>}, {pipeline_mode = #tpu.pipeline_mode<synchronous>, transform_indices = @transform_3, window_bounds = array<i64: 40, 40>}, {pipeline_mode = #tpu.pipeline_mode<synchronous>, transform_indices = @transform_4, window_bounds = array<i64: 1, 40>}, {pipeline_mode = #tpu.pipeline_mode<synchronous>, transform_indices = @transform_5, window_bounds = array<i64: 57, 21>}, {pipeline_mode = #tpu.pipeline_mode<synchronous>, transform_indices = @transform_6, window_bounds = array<i64: 4, 40, 19>}, {pipeline_mode = #tpu.pipeline_mode<synchronous>, transform_indices = @transform_7, window_bounds = array<i64: 4, 76, 57>}, {pipeline_mode = #tpu.pipeline_mode<synchronous>, transform_indices = @transform_8, window_bounds = array<i64: 76, 1>}, {pipeline_mode = #tpu.pipeline_mode<synchronous>, transform_indices = @transform_9, window_bounds = array<i64: 108, 76>}, {pipeline_mode = #tpu.pipeline_mode<synchronous>, transform_indices = @transform_10, window_bounds = array<i64: 3, 19, 9>}, {pipeline_mode = #tpu.pipeline_mode<synchronous>, transform_indices = @transform_11, window_bounds = array<i64: 3, 72, 108>}, {pipeline_mode = #tpu.pipeline_mode<synchronous>, transform_indices = @transform_12, window_bounds = array<i64: 72, 1>}, {pipeline_mode = #tpu.pipeline_mode<synchronous>, transform_indices = @transform_13, window_bounds = array<i64: 9, 72>}, {pipeline_mode = #tpu.pipeline_mode<synchronous>, transform_indices = @transform_14, window_bounds = array<i64: 9, 9>}, {pipeline_mode = #tpu.pipeline_mode<synchronous>, transform_indices = @transform_15, window_bounds = array<i64: 9, 1>}, {pipeline_mode = #tpu.pipeline_mode<synchronous>, transform_indices = @transform_16, window_bounds = array<i64: 9, 9>}, {pipeline_mode = #tpu.pipeline_mode<synchronous>, transform_indices = @transform_17, window_bounds = array<i64: 1, 9>}, {pipeline_mode = #tpu.pipeline_mode<synchronous>, transform_indices = @transform_18, window_bounds = array<i64: 72, 9>}, {pipeline_mode = #tpu.pipeline_mode<synchronous>, transform_indices = @transform_19, window_bounds = array<i64: 96, 72>}, {pipeline_mode = #tpu.pipeline_mode<synchronous>, transform_indices = @transform_20, window_bounds = array<i64: 3, 9, 4>}, {pipeline_mode = #tpu.pipeline_mode<synchronous>, transform_indices = @transform_21, window_bounds = array<i64: 3, 64, 96>}, {pipeline_mode = #tpu.pipeline_mode<synchronous>, transform_indices = @transform_22, window_bounds = array<i64: 64, 1>}, {pipeline_mode = #tpu.pipeline_mode<synchronous>, transform_indices = @transform_23, window_bounds = array<i64: 4, 4, 1>}, {pipeline_mode = #tpu.pipeline_mode<synchronous>, transform_indices = @transform_24, window_bounds = array<i64: 4, 16, 64>}, {pipeline_mode = #tpu.pipeline_mode<synchronous>, transform_indices = @transform_25, window_bounds = array<i64: 16, 1>}, {transform_indices = @transform_26, window_bounds = array<i64: 1, 21, 40>}, {transform_indices = @transform_27, window_bounds = array<i64: 1, 72, 9>}, {transform_indices = @transform_28, window_bounds = array<i64: 1, 72, 9>}, {transform_indices = @transform_29, window_bounds = array<i64: 1, 16, 1>}]} {
    %c0 = arith.constant 0 : index
    %c0_0 = arith.constant 0 : index
    %c0_1 = arith.constant 0 : index
    %0 = vector.load %arg1[%c0, %c0_0, %c0_1] : memref<1x21x40xf32, #tpu.memory_space<vmem>>, vector<1x21x40xf32>
    %1 = vector.shape_cast %0 : vector<1x21x40xf32> to vector<21x40xf32>
    %c0_2 = arith.constant 0 : index
    %c0_3 = arith.constant 0 : index
    %2 = vector.load %arg2[%c0_2, %c0_3] : memref<21x21xf32, #tpu.memory_space<vmem>>, vector<21x21xf32>
    %cst = arith.constant dense<0.000000e+00> : vector<21x40xf32>
    %3 = tpu.matmul %2, %1, %cst {dimension_numbers = #tpu.dot_dimension_numbers<[1], [0], [0], [1], [0, 0, 1, 1], [], []>} : vector<21x21xf32>, vector<21x40xf32>, vector<21x40xf32> -> vector<21x40xf32>
    %c0_4 = arith.constant 0 : index
    %c0_5 = arith.constant 0 : index
    %4 = vector.load %arg3[%c0_4, %c0_5] : memref<21x1xf32, #tpu.memory_space<vmem>>, vector<21x1xf32>
    %5 = vector.broadcast %4 : vector<21x1xf32> to vector<21x40xf32>
    %6 = arith.addf %3, %5 : vector<21x40xf32>
    %cst_6 = arith.constant 0.999994993 : f32
    %7 = vector.broadcast %cst_6 : f32 to vector<21x40xf32>
    %8 = arith.mulf %6, %7 : vector<21x40xf32>
    %9 = arith.negf %8 : vector<21x40xf32>
    %10 = math.exp %9 : vector<21x40xf32>
    %cst_7 = arith.constant 1.000000e+00 : f32
    %11 = vector.broadcast %cst_7 : f32 to vector<21x40xf32>
    %12 = arith.addf %11, %10 : vector<21x40xf32>
    %13 = arith.divf %11, %12 : vector<21x40xf32>
    %c0_8 = arith.constant 0 : index
    %c0_9 = arith.constant 0 : index
    %14 = vector.load %arg4[%c0_8, %c0_9] : memref<40x40xf32, #tpu.memory_space<vmem>>, vector<40x40xf32>
    %cst_10 = arith.constant dense<0.000000e+00> : vector<21x40xf32>
    %15 = tpu.matmul %13, %14, %cst_10 {dimension_numbers = #tpu.dot_dimension_numbers<[1], [0], [0], [1], [0, 0, 1, 1], [], []>} : vector<21x40xf32>, vector<40x40xf32>, vector<21x40xf32> -> vector<21x40xf32>
    %c0_11 = arith.constant 0 : index
    %c0_12 = arith.constant 0 : index
    %16 = vector.load %arg5[%c0_11, %c0_12] : memref<1x40xf32, #tpu.memory_space<vmem>>, vector<1x40xf32>
    %17 = vector.broadcast %16 : vector<1x40xf32> to vector<21x40xf32>
    %18 = arith.addf %15, %17 : vector<21x40xf32>
    %cst_13 = arith.constant 0.999994993 : f32
    %19 = vector.broadcast %cst_13 : f32 to vector<21x40xf32>
    %20 = arith.mulf %18, %19 : vector<21x40xf32>
    %21 = arith.negf %20 : vector<21x40xf32>
    %22 = math.exp %21 : vector<21x40xf32>
    %cst_14 = arith.constant 1.000000e+00 : f32
    %23 = vector.broadcast %cst_14 : f32 to vector<21x40xf32>
    %24 = arith.addf %23, %22 : vector<21x40xf32>
    %25 = arith.divf %23, %24 : vector<21x40xf32>
    %c0_15 = arith.constant 0 : index
    %c0_16 = arith.constant 0 : index
    %c0_17 = arith.constant 0 : index
    %26 = vector.load %arg27[%c0_15, %c0_16, %c0_17] : memref<1x21x40xf32, #tpu.memory_space<vmem>>, vector<1x21x40xf32>
    %27 = vector.shape_cast %26 : vector<1x21x40xf32> to vector<21x40xf32>
    %28 = vector.shape_cast %25 : vector<21x40xf32> to vector<1x21x40xf32>
    tpu.vector_store %arg27[%c0_15, %c0_16, %c0_17], %28 {strides = array<i32>} : memref<1x21x40xf32, #tpu.memory_space<vmem>>, vector<1x21x40xf32>,
    %29 = arith.mulf %1, %25 : vector<21x40xf32>
    %c0_18 = arith.constant 0 : index
    %c0_19 = arith.constant 0 : index
    %30 = vector.load %arg6[%c0_18, %c0_19] : memref<57x21xf32, #tpu.memory_space<vmem>>, vector<57x21xf32>
    %cst_20 = arith.constant dense<0.000000e+00> : vector<57x40xf32>
    %31 = tpu.matmul %30, %29, %cst_20 {dimension_numbers = #tpu.dot_dimension_numbers<[1], [0], [0], [1], [0, 0, 1, 1], [], []>} : vector<57x21xf32>, vector<21x40xf32>, vector<57x40xf32> -> vector<57x40xf32>
    %c0_21 = arith.constant 0 : index
    %c0_22 = arith.constant 0 : index
    %c0_23 = arith.constant 0 : index
    %32 = vector.load %arg8[%c0_21, %c0_22, %c0_23] : memref<4x76x57xf32, #tpu.memory_space<vmem>>, vector<1x76x57xf32>
    %33 = vector.shape_cast %32 : vector<1x76x57xf32> to vector<76x57xf32>
    %c0_24 = arith.constant 0 : index
    %c0_25 = arith.constant 0 : index
    %c0_26 = arith.constant 0 : index
    %34 = vector.load %arg7[%c0_24, %c0_25, %c0_26] : memref<4x40x19xf32, #tpu.memory_space<vmem>>, vector<1x40x19xf32>
    %35 = vector.shape_cast %34 : vector<1x40x19xf32> to vector<40x19xf32>
    %cst_27 = arith.constant dense<0.000000e+00> : vector<57x19xf32>
    %36 = tpu.matmul %31, %35, %cst_27 {dimension_numbers = #tpu.dot_dimension_numbers<[1], [0], [0], [1], [0, 0, 1, 1], [], []>} : vector<57x40xf32>, vector<40x19xf32>, vector<57x19xf32> -> vector<57x19xf32>
    %cst_28 = arith.constant dense<0.000000e+00> : vector<76x19xf32>
    %37 = tpu.matmul %33, %36, %cst_28 {dimension_numbers = #tpu.dot_dimension_numbers<[1], [0], [0], [1], [0, 0, 1, 1], [], []>} : vector<76x57xf32>, vector<57x19xf32>, vector<76x19xf32> -> vector<76x19xf32>
    %c1 = arith.constant 1 : index
    %c0_29 = arith.constant 0 : index
    %c0_30 = arith.constant 0 : index
    %38 = vector.load %arg8[%c1, %c0_29, %c0_30] : memref<4x76x57xf32, #tpu.memory_space<vmem>>, vector<1x76x57xf32>
    %39 = vector.shape_cast %38 : vector<1x76x57xf32> to vector<76x57xf32>
    %c1_31 = arith.constant 1 : index
    %c0_32 = arith.constant 0 : index
    %c0_33 = arith.constant 0 : index
    %40 = vector.load %arg7[%c1_31, %c0_32, %c0_33] : memref<4x40x19xf32, #tpu.memory_space<vmem>>, vector<1x40x19xf32>
    %41 = vector.shape_cast %40 : vector<1x40x19xf32> to vector<40x19xf32>
    %cst_34 = arith.constant dense<0.000000e+00> : vector<57x19xf32>
    %42 = tpu.matmul %31, %41, %cst_34 {dimension_numbers = #tpu.dot_dimension_numbers<[1], [0], [0], [1], [0, 0, 1, 1], [], []>} : vector<57x40xf32>, vector<40x19xf32>, vector<57x19xf32> -> vector<57x19xf32>
    %cst_35 = arith.constant dense<0.000000e+00> : vector<76x19xf32>
    %43 = tpu.matmul %39, %42, %cst_35 {dimension_numbers = #tpu.dot_dimension_numbers<[1], [0], [0], [1], [0, 0, 1, 1], [], []>} : vector<76x57xf32>, vector<57x19xf32>, vector<76x19xf32> -> vector<76x19xf32>
    %44 = arith.addf %37, %43 : vector<76x19xf32>
    %c2 = arith.constant 2 : index
    %c0_36 = arith.constant 0 : index
    %c0_37 = arith.constant 0 : index
    %45 = vector.load %arg8[%c2, %c0_36, %c0_37] : memref<4x76x57xf32, #tpu.memory_space<vmem>>, vector<1x76x57xf32>
    %46 = vector.shape_cast %45 : vector<1x76x57xf32> to vector<76x57xf32>
    %c2_38 = arith.constant 2 : index
    %c0_39 = arith.constant 0 : index
    %c0_40 = arith.constant 0 : index
    %47 = vector.load %arg7[%c2_38, %c0_39, %c0_40] : memref<4x40x19xf32, #tpu.memory_space<vmem>>, vector<1x40x19xf32>
    %48 = vector.shape_cast %47 : vector<1x40x19xf32> to vector<40x19xf32>
    %cst_41 = arith.constant dense<0.000000e+00> : vector<57x19xf32>
    %49 = tpu.matmul %31, %48, %cst_41 {dimension_numbers = #tpu.dot_dimension_numbers<[1], [0], [0], [1], [0, 0, 1, 1], [], []>} : vector<57x40xf32>, vector<40x19xf32>, vector<57x19xf32> -> vector<57x19xf32>
    %cst_42 = arith.constant dense<0.000000e+00> : vector<76x19xf32>
    %50 = tpu.matmul %46, %49, %cst_42 {dimension_numbers = #tpu.dot_dimension_numbers<[1], [0], [0], [1], [0, 0, 1, 1], [], []>} : vector<76x57xf32>, vector<57x19xf32>, vector<76x19xf32> -> vector<76x19xf32>
    %51 = arith.addf %44, %50 : vector<76x19xf32>
    %c3 = arith.constant 3 : index
    %c0_43 = arith.constant 0 : index
    %c0_44 = arith.constant 0 : index
    %52 = vector.load %arg8[%c3, %c0_43, %c0_44] : memref<4x76x57xf32, #tpu.memory_space<vmem>>, vector<1x76x57xf32>
    %53 = vector.shape_cast %52 : vector<1x76x57xf32> to vector<76x57xf32>
    %c3_45 = arith.constant 3 : index
    %c0_46 = arith.constant 0 : index
    %c0_47 = arith.constant 0 : index
    %54 = vector.load %arg7[%c3_45, %c0_46, %c0_47] : memref<4x40x19xf32, #tpu.memory_space<vmem>>, vector<1x40x19xf32>
    %55 = vector.shape_cast %54 : vector<1x40x19xf32> to vector<40x19xf32>
    %cst_48 = arith.constant dense<0.000000e+00> : vector<57x19xf32>
    %56 = tpu.matmul %31, %55, %cst_48 {dimension_numbers = #tpu.dot_dimension_numbers<[1], [0], [0], [1], [0, 0, 1, 1], [], []>} : vector<57x40xf32>, vector<40x19xf32>, vector<57x19xf32> -> vector<57x19xf32>
    %cst_49 = arith.constant dense<0.000000e+00> : vector<76x19xf32>
    %57 = tpu.matmul %53, %56, %cst_49 {dimension_numbers = #tpu.dot_dimension_numbers<[1], [0], [0], [1], [0, 0, 1, 1], [], []>} : vector<76x57xf32>, vector<57x19xf32>, vector<76x19xf32> -> vector<76x19xf32>
    %58 = arith.addf %51, %57 : vector<76x19xf32>
    %c0_50 = arith.constant 0 : index
    %c0_51 = arith.constant 0 : index
    %59 = vector.load %arg9[%c0_50, %c0_51] : memref<76x1xf32, #tpu.memory_space<vmem>>, vector<76x1xf32>
    %60 = vector.broadcast %59 : vector<76x1xf32> to vector<76x19xf32>
    %61 = arith.addf %58, %60 : vector<76x19xf32>
    %cst_52 = arith.constant 0.000000e+00 : f32
    %62 = vector.broadcast %cst_52 : f32 to vector<76x19xf32>
    %63 = arith.maximumf %61, %62 : vector<76x19xf32>
    %c0_53 = arith.constant 0 : index
    %c0_54 = arith.constant 0 : index
    %64 = vector.load %arg10[%c0_53, %c0_54] : memref<108x76xf32, #tpu.memory_space<vmem>>, vector<108x76xf32>
    %cst_55 = arith.constant dense<0.000000e+00> : vector<108x19xf32>
    %65 = tpu.matmul %64, %63, %cst_55 {dimension_numbers = #tpu.dot_dimension_numbers<[1], [0], [0], [1], [0, 0, 1, 1], [], []>} : vector<108x76xf32>, vector<76x19xf32>, vector<108x19xf32> -> vector<108x19xf32>
    %c0_56 = arith.constant 0 : index
    %c0_57 = arith.constant 0 : index
    %c0_58 = arith.constant 0 : index
    %66 = vector.load %arg12[%c0_56, %c0_57, %c0_58] : memref<3x72x108xf32, #tpu.memory_space<vmem>>, vector<1x72x108xf32>
    %67 = vector.shape_cast %66 : vector<1x72x108xf32> to vector<72x108xf32>
    %c0_59 = arith.constant 0 : index
    %c0_60 = arith.constant 0 : index
    %c0_61 = arith.constant 0 : index
    %68 = vector.load %arg11[%c0_59, %c0_60, %c0_61] : memref<3x19x9xf32, #tpu.memory_space<vmem>>, vector<1x19x9xf32>
    %69 = vector.shape_cast %68 : vector<1x19x9xf32> to vector<19x9xf32>
    %cst_62 = arith.constant dense<0.000000e+00> : vector<108x9xf32>
    %70 = tpu.matmul %65, %69, %cst_62 {dimension_numbers = #tpu.dot_dimension_numbers<[1], [0], [0], [1], [0, 0, 1, 1], [], []>} : vector<108x19xf32>, vector<19x9xf32>, vector<108x9xf32> -> vector<108x9xf32>
    %cst_63 = arith.constant dense<0.000000e+00> : vector<72x9xf32>
    %71 = tpu.matmul %67, %70, %cst_63 {dimension_numbers = #tpu.dot_dimension_numbers<[1], [0], [0], [1], [0, 0, 1, 1], [], []>} : vector<72x108xf32>, vector<108x9xf32>, vector<72x9xf32> -> vector<72x9xf32>
    %c1_64 = arith.constant 1 : index
    %c0_65 = arith.constant 0 : index
    %c0_66 = arith.constant 0 : index
    %72 = vector.load %arg12[%c1_64, %c0_65, %c0_66] : memref<3x72x108xf32, #tpu.memory_space<vmem>>, vector<1x72x108xf32>
    %73 = vector.shape_cast %72 : vector<1x72x108xf32> to vector<72x108xf32>
    %c1_67 = arith.constant 1 : index
    %c0_68 = arith.constant 0 : index
    %c0_69 = arith.constant 0 : index
    %74 = vector.load %arg11[%c1_67, %c0_68, %c0_69] : memref<3x19x9xf32, #tpu.memory_space<vmem>>, vector<1x19x9xf32>
    %75 = vector.shape_cast %74 : vector<1x19x9xf32> to vector<19x9xf32>
    %cst_70 = arith.constant dense<0.000000e+00> : vector<108x9xf32>
    %76 = tpu.matmul %65, %75, %cst_70 {dimension_numbers = #tpu.dot_dimension_numbers<[1], [0], [0], [1], [0, 0, 1, 1], [], []>} : vector<108x19xf32>, vector<19x9xf32>, vector<108x9xf32> -> vector<108x9xf32>
    %cst_71 = arith.constant dense<0.000000e+00> : vector<72x9xf32>
    %77 = tpu.matmul %73, %76, %cst_71 {dimension_numbers = #tpu.dot_dimension_numbers<[1], [0], [0], [1], [0, 0, 1, 1], [], []>} : vector<72x108xf32>, vector<108x9xf32>, vector<72x9xf32> -> vector<72x9xf32>
    %78 = arith.addf %71, %77 : vector<72x9xf32>
    %c2_72 = arith.constant 2 : index
    %c0_73 = arith.constant 0 : index
    %c0_74 = arith.constant 0 : index
    %79 = vector.load %arg12[%c2_72, %c0_73, %c0_74] : memref<3x72x108xf32, #tpu.memory_space<vmem>>, vector<1x72x108xf32>
    %80 = vector.shape_cast %79 : vector<1x72x108xf32> to vector<72x108xf32>
    %c2_75 = arith.constant 2 : index
    %c0_76 = arith.constant 0 : index
    %c0_77 = arith.constant 0 : index
    %81 = vector.load %arg11[%c2_75, %c0_76, %c0_77] : memref<3x19x9xf32, #tpu.memory_space<vmem>>, vector<1x19x9xf32>
    %82 = vector.shape_cast %81 : vector<1x19x9xf32> to vector<19x9xf32>
    %cst_78 = arith.constant dense<0.000000e+00> : vector<108x9xf32>
    %83 = tpu.matmul %65, %82, %cst_78 {dimension_numbers = #tpu.dot_dimension_numbers<[1], [0], [0], [1], [0, 0, 1, 1], [], []>} : vector<108x19xf32>, vector<19x9xf32>, vector<108x9xf32> -> vector<108x9xf32>
    %cst_79 = arith.constant dense<0.000000e+00> : vector<72x9xf32>
    %84 = tpu.matmul %80, %83, %cst_79 {dimension_numbers = #tpu.dot_dimension_numbers<[1], [0], [0], [1], [0, 0, 1, 1], [], []>} : vector<72x108xf32>, vector<108x9xf32>, vector<72x9xf32> -> vector<72x9xf32>
    %85 = arith.addf %78, %84 : vector<72x9xf32>
    %c0_80 = arith.constant 0 : index
    %c0_81 = arith.constant 0 : index
    %86 = vector.load %arg13[%c0_80, %c0_81] : memref<72x1xf32, #tpu.memory_space<vmem>>, vector<72x1xf32>
    %87 = vector.broadcast %86 : vector<72x1xf32> to vector<72x9xf32>
    %88 = arith.addf %85, %87 : vector<72x9xf32>
    %cst_82 = arith.constant 0.000000e+00 : f32
    %89 = vector.broadcast %cst_82 : f32 to vector<72x9xf32>
    %90 = arith.maximumf %88, %89 : vector<72x9xf32>
    %c0_83 = arith.constant 0 : index
    %c0_84 = arith.constant 0 : index
    %91 = vector.load %arg14[%c0_83, %c0_84] : memref<9x72xf32, #tpu.memory_space<vmem>>, vector<9x72xf32>
    %cst_85 = arith.constant dense<0.000000e+00> : vector<9x9xf32>
    %92 = tpu.matmul %91, %90, %cst_85 {dimension_numbers = #tpu.dot_dimension_numbers<[1], [0], [0], [1], [0, 0, 1, 1], [], []>} : vector<9x72xf32>, vector<72x9xf32>, vector<9x9xf32> -> vector<9x9xf32>
    %c0_86 = arith.constant 0 : index
    %c0_87 = arith.constant 0 : index
    %93 = vector.load %arg15[%c0_86, %c0_87] : memref<9x9xf32, #tpu.memory_space<vmem>>, vector<9x9xf32>
    %cst_88 = arith.constant dense<0.000000e+00> : vector<9x9xf32>
    %94 = tpu.matmul %93, %92, %cst_88 {dimension_numbers = #tpu.dot_dimension_numbers<[1], [0], [0], [1], [0, 0, 1, 1], [], []>} : vector<9x9xf32>, vector<9x9xf32>, vector<9x9xf32> -> vector<9x9xf32>
    %c0_89 = arith.constant 0 : index
    %c0_90 = arith.constant 0 : index
    %95 = vector.load %arg16[%c0_89, %c0_90] : memref<9x1xf32, #tpu.memory_space<vmem>>, vector<9x1xf32>
    %96 = vector.broadcast %95 : vector<9x1xf32> to vector<9x9xf32>
    %97 = arith.addf %94, %96 : vector<9x9xf32>
    %cst_91 = arith.constant 0.999994993 : f32
    %98 = vector.broadcast %cst_91 : f32 to vector<9x9xf32>
    %99 = arith.mulf %97, %98 : vector<9x9xf32>
    %100 = arith.negf %99 : vector<9x9xf32>
    %101 = math.exp %100 : vector<9x9xf32>
    %cst_92 = arith.constant 1.000000e+00 : f32
    %102 = vector.broadcast %cst_92 : f32 to vector<9x9xf32>
    %103 = arith.addf %102, %101 : vector<9x9xf32>
    %104 = arith.divf %102, %103 : vector<9x9xf32>
    %c0_93 = arith.constant 0 : index
    %c0_94 = arith.constant 0 : index
    %105 = vector.load %arg17[%c0_93, %c0_94] : memref<9x9xf32, #tpu.memory_space<vmem>>, vector<9x9xf32>
    %cst_95 = arith.constant dense<0.000000e+00> : vector<9x9xf32>
    %106 = tpu.matmul %104, %105, %cst_95 {dimension_numbers = #tpu.dot_dimension_numbers<[1], [0], [0], [1], [0, 0, 1, 1], [], []>} : vector<9x9xf32>, vector<9x9xf32>, vector<9x9xf32> -> vector<9x9xf32>
    %c0_96 = arith.constant 0 : index
    %c0_97 = arith.constant 0 : index
    %107 = vector.load %arg18[%c0_96, %c0_97] : memref<1x9xf32, #tpu.memory_space<vmem>>, vector<1x9xf32>
    %108 = vector.broadcast %107 : vector<1x9xf32> to vector<9x9xf32>
    %109 = arith.addf %106, %108 : vector<9x9xf32>
    %cst_98 = arith.constant 0.999994993 : f32
    %110 = vector.broadcast %cst_98 : f32 to vector<9x9xf32>
    %111 = arith.mulf %109, %110 : vector<9x9xf32>
    %112 = arith.negf %111 : vector<9x9xf32>
    %113 = math.exp %112 : vector<9x9xf32>
    %cst_99 = arith.constant 1.000000e+00 : f32
    %114 = vector.broadcast %cst_99 : f32 to vector<9x9xf32>
    %115 = arith.addf %114, %113 : vector<9x9xf32>
    %116 = arith.divf %114, %115 : vector<9x9xf32>
    %c0_100 = arith.constant 0 : index
    %c0_101 = arith.constant 0 : index
    %117 = vector.load %arg19[%c0_100, %c0_101] : memref<72x9xf32, #tpu.memory_space<vmem>>, vector<72x9xf32>
    %cst_102 = arith.constant dense<0.000000e+00> : vector<72x9xf32>
    %118 = tpu.matmul %117, %116, %cst_102 {dimension_numbers = #tpu.dot_dimension_numbers<[1], [0], [0], [1], [0, 0, 1, 1], [], []>} : vector<72x9xf32>, vector<9x9xf32>, vector<72x9xf32> -> vector<72x9xf32>
    %119 = arith.mulf %90, %118 : vector<72x9xf32>
    %c0_103 = arith.constant 0 : index
    %c0_104 = arith.constant 0 : index
    %c0_105 = arith.constant 0 : index
    %120 = vector.load %arg28[%c0_103, %c0_104, %c0_105] : memref<1x72x9xf32, #tpu.memory_space<vmem>>, vector<1x72x9xf32>
    %121 = vector.shape_cast %120 : vector<1x72x9xf32> to vector<72x9xf32>
    %122 = vector.shape_cast %119 : vector<72x9xf32> to vector<1x72x9xf32>
    tpu.vector_store %arg28[%c0_103, %c0_104, %c0_105], %122 {strides = array<i32>} : memref<1x72x9xf32, #tpu.memory_space<vmem>>, vector<1x72x9xf32>,
    %c0_106 = arith.constant 0 : index
    %c0_107 = arith.constant 0 : index
    %c0_108 = arith.constant 0 : index
    %123 = vector.load %arg29[%c0_106, %c0_107, %c0_108] : memref<1x72x9xf32, #tpu.memory_space<vmem>>, vector<1x72x9xf32>
    %124 = vector.shape_cast %123 : vector<1x72x9xf32> to vector<72x9xf32>
    %125 = vector.shape_cast %118 : vector<72x9xf32> to vector<1x72x9xf32>
    tpu.vector_store %arg29[%c0_106, %c0_107, %c0_108], %125 {strides = array<i32>} : memref<1x72x9xf32, #tpu.memory_space<vmem>>, vector<1x72x9xf32>,
    %c0_109 = arith.constant 0 : index
    %c0_110 = arith.constant 0 : index
    %126 = vector.load %arg20[%c0_109, %c0_110] : memref<96x72xf32, #tpu.memory_space<vmem>>, vector<96x72xf32>
    %cst_111 = arith.constant dense<0.000000e+00> : vector<96x9xf32>
    %127 = tpu.matmul %126, %119, %cst_111 {dimension_numbers = #tpu.dot_dimension_numbers<[1], [0], [0], [1], [0, 0, 1, 1], [], []>} : vector<96x72xf32>, vector<72x9xf32>, vector<96x9xf32> -> vector<96x9xf32>
    %c0_112 = arith.constant 0 : index
    %c0_113 = arith.constant 0 : index
    %c0_114 = arith.constant 0 : index
    %128 = vector.load %arg22[%c0_112, %c0_113, %c0_114] : memref<3x64x96xf32, #tpu.memory_space<vmem>>, vector<1x64x96xf32>
    %129 = vector.shape_cast %128 : vector<1x64x96xf32> to vector<64x96xf32>
    %c0_115 = arith.constant 0 : index
    %c0_116 = arith.constant 0 : index
    %c0_117 = arith.constant 0 : index
    %130 = vector.load %arg21[%c0_115, %c0_116, %c0_117] : memref<3x9x4xf32, #tpu.memory_space<vmem>>, vector<1x9x4xf32>
    %131 = vector.shape_cast %130 : vector<1x9x4xf32> to vector<9x4xf32>
    %cst_118 = arith.constant dense<0.000000e+00> : vector<96x4xf32>
    %132 = tpu.matmul %127, %131, %cst_118 {dimension_numbers = #tpu.dot_dimension_numbers<[1], [0], [0], [1], [0, 0, 1, 1], [], []>} : vector<96x9xf32>, vector<9x4xf32>, vector<96x4xf32> -> vector<96x4xf32>
    %cst_119 = arith.constant dense<0.000000e+00> : vector<64x4xf32>
    %133 = tpu.matmul %129, %132, %cst_119 {dimension_numbers = #tpu.dot_dimension_numbers<[1], [0], [0], [1], [0, 0, 1, 1], [], []>} : vector<64x96xf32>, vector<96x4xf32>, vector<64x4xf32> -> vector<64x4xf32>
    %c1_120 = arith.constant 1 : index
    %c0_121 = arith.constant 0 : index
    %c0_122 = arith.constant 0 : index
    %134 = vector.load %arg22[%c1_120, %c0_121, %c0_122] : memref<3x64x96xf32, #tpu.memory_space<vmem>>, vector<1x64x96xf32>
    %135 = vector.shape_cast %134 : vector<1x64x96xf32> to vector<64x96xf32>
    %c1_123 = arith.constant 1 : index
    %c0_124 = arith.constant 0 : index
    %c0_125 = arith.constant 0 : index
    %136 = vector.load %arg21[%c1_123, %c0_124, %c0_125] : memref<3x9x4xf32, #tpu.memory_space<vmem>>, vector<1x9x4xf32>
    %137 = vector.shape_cast %136 : vector<1x9x4xf32> to vector<9x4xf32>
    %cst_126 = arith.constant dense<0.000000e+00> : vector<96x4xf32>
    %138 = tpu.matmul %127, %137, %cst_126 {dimension_numbers = #tpu.dot_dimension_numbers<[1], [0], [0], [1], [0, 0, 1, 1], [], []>} : vector<96x9xf32>, vector<9x4xf32>, vector<96x4xf32> -> vector<96x4xf32>
    %cst_127 = arith.constant dense<0.000000e+00> : vector<64x4xf32>
    %139 = tpu.matmul %135, %138, %cst_127 {dimension_numbers = #tpu.dot_dimension_numbers<[1], [0], [0], [1], [0, 0, 1, 1], [], []>} : vector<64x96xf32>, vector<96x4xf32>, vector<64x4xf32> -> vector<64x4xf32>
    %140 = arith.addf %133, %139 : vector<64x4xf32>
    %c2_128 = arith.constant 2 : index
    %c0_129 = arith.constant 0 : index
    %c0_130 = arith.constant 0 : index
    %141 = vector.load %arg22[%c2_128, %c0_129, %c0_130] : memref<3x64x96xf32, #tpu.memory_space<vmem>>, vector<1x64x96xf32>
    %142 = vector.shape_cast %141 : vector<1x64x96xf32> to vector<64x96xf32>
    %c2_131 = arith.constant 2 : index
    %c0_132 = arith.constant 0 : index
    %c0_133 = arith.constant 0 : index
    %143 = vector.load %arg21[%c2_131, %c0_132, %c0_133] : memref<3x9x4xf32, #tpu.memory_space<vmem>>, vector<1x9x4xf32>
    %144 = vector.shape_cast %143 : vector<1x9x4xf32> to vector<9x4xf32>
    %cst_134 = arith.constant dense<0.000000e+00> : vector<96x4xf32>
    %145 = tpu.matmul %127, %144, %cst_134 {dimension_numbers = #tpu.dot_dimension_numbers<[1], [0], [0], [1], [0, 0, 1, 1], [], []>} : vector<96x9xf32>, vector<9x4xf32>, vector<96x4xf32> -> vector<96x4xf32>
    %cst_135 = arith.constant dense<0.000000e+00> : vector<64x4xf32>
    %146 = tpu.matmul %142, %145, %cst_135 {dimension_numbers = #tpu.dot_dimension_numbers<[1], [0], [0], [1], [0, 0, 1, 1], [], []>} : vector<64x96xf32>, vector<96x4xf32>, vector<64x4xf32> -> vector<64x4xf32>
    %147 = arith.addf %140, %146 : vector<64x4xf32>
    %c0_136 = arith.constant 0 : index
    %c0_137 = arith.constant 0 : index
    %148 = vector.load %arg23[%c0_136, %c0_137] : memref<64x1xf32, #tpu.memory_space<vmem>>, vector<64x1xf32>
    %149 = vector.broadcast %148 : vector<64x1xf32> to vector<64x4xf32>
    %150 = arith.addf %147, %149 : vector<64x4xf32>
    %cst_138 = arith.constant 0.000000e+00 : f32
    %151 = vector.broadcast %cst_138 : f32 to vector<64x4xf32>
    %152 = arith.maximumf %150, %151 : vector<64x4xf32>
    %c0_139 = arith.constant 0 : index
    %c0_140 = arith.constant 0 : index
    %c0_141 = arith.constant 0 : index
    %153 = vector.load %arg25[%c0_139, %c0_140, %c0_141] : memref<4x16x64xf32, #tpu.memory_space<vmem>>, vector<1x16x64xf32>
    %154 = vector.shape_cast %153 : vector<1x16x64xf32> to vector<16x64xf32>
    %c0_142 = arith.constant 0 : index
    %c0_143 = arith.constant 0 : index
    %c0_144 = arith.constant 0 : index
    %155 = vector.load %arg24[%c0_142, %c0_143, %c0_144] : memref<4x4x1xf32, #tpu.memory_space<vmem>>, vector<1x4x1xf32>
    %156 = vector.shape_cast %155 : vector<1x4x1xf32> to vector<4x1xf32>
    %cst_145 = arith.constant dense<0.000000e+00> : vector<64x1xf32>
    %157 = tpu.matmul %152, %156, %cst_145 {dimension_numbers = #tpu.dot_dimension_numbers<[1], [0], [0], [1], [0, 0, 1, 1], [], []>} : vector<64x4xf32>, vector<4x1xf32>, vector<64x1xf32> -> vector<64x1xf32>
    %cst_146 = arith.constant dense<0.000000e+00> : vector<16x1xf32>
    %158 = tpu.matmul %154, %157, %cst_146 {dimension_numbers = #tpu.dot_dimension_numbers<[1], [0], [0], [1], [0, 0, 1, 1], [], []>} : vector<16x64xf32>, vector<64x1xf32>, vector<16x1xf32> -> vector<16x1xf32>
    %c1_147 = arith.constant 1 : index
    %c0_148 = arith.constant 0 : index
    %c0_149 = arith.constant 0 : index
    %159 = vector.load %arg25[%c1_147, %c0_148, %c0_149] : memref<4x16x64xf32, #tpu.memory_space<vmem>>, vector<1x16x64xf32>
    %160 = vector.shape_cast %159 : vector<1x16x64xf32> to vector<16x64xf32>
    %c1_150 = arith.constant 1 : index
    %c0_151 = arith.constant 0 : index
    %c0_152 = arith.constant 0 : index
    %161 = vector.load %arg24[%c1_150, %c0_151, %c0_152] : memref<4x4x1xf32, #tpu.memory_space<vmem>>, vector<1x4x1xf32>
    %162 = vector.shape_cast %161 : vector<1x4x1xf32> to vector<4x1xf32>
    %cst_153 = arith.constant dense<0.000000e+00> : vector<64x1xf32>
    %163 = tpu.matmul %152, %162, %cst_153 {dimension_numbers = #tpu.dot_dimension_numbers<[1], [0], [0], [1], [0, 0, 1, 1], [], []>} : vector<64x4xf32>, vector<4x1xf32>, vector<64x1xf32> -> vector<64x1xf32>
    %cst_154 = arith.constant dense<0.000000e+00> : vector<16x1xf32>
    %164 = tpu.matmul %160, %163, %cst_154 {dimension_numbers = #tpu.dot_dimension_numbers<[1], [0], [0], [1], [0, 0, 1, 1], [], []>} : vector<16x64xf32>, vector<64x1xf32>, vector<16x1xf32> -> vector<16x1xf32>
    %165 = arith.addf %158, %164 : vector<16x1xf32>
    %c2_155 = arith.constant 2 : index
    %c0_156 = arith.constant 0 : index
    %c0_157 = arith.constant 0 : index
    %166 = vector.load %arg25[%c2_155, %c0_156, %c0_157] : memref<4x16x64xf32, #tpu.memory_space<vmem>>, vector<1x16x64xf32>
    %167 = vector.shape_cast %166 : vector<1x16x64xf32> to vector<16x64xf32>
    %c2_158 = arith.constant 2 : index
    %c0_159 = arith.constant 0 : index
    %c0_160 = arith.constant 0 : index
    %168 = vector.load %arg24[%c2_158, %c0_159, %c0_160] : memref<4x4x1xf32, #tpu.memory_space<vmem>>, vector<1x4x1xf32>
    %169 = vector.shape_cast %168 : vector<1x4x1xf32> to vector<4x1xf32>
    %cst_161 = arith.constant dense<0.000000e+00> : vector<64x1xf32>
    %170 = tpu.matmul %152, %169, %cst_161 {dimension_numbers = #tpu.dot_dimension_numbers<[1], [0], [0], [1], [0, 0, 1, 1], [], []>} : vector<64x4xf32>, vector<4x1xf32>, vector<64x1xf32> -> vector<64x1xf32>
    %cst_162 = arith.constant dense<0.000000e+00> : vector<16x1xf32>
    %171 = tpu.matmul %167, %170, %cst_162 {dimension_numbers = #tpu.dot_dimension_numbers<[1], [0], [0], [1], [0, 0, 1, 1], [], []>} : vector<16x64xf32>, vector<64x1xf32>, vector<16x1xf32> -> vector<16x1xf32>
    %172 = arith.addf %165, %171 : vector<16x1xf32>
    %c3_163 = arith.constant 3 : index
    %c0_164 = arith.constant 0 : index
    %c0_165 = arith.constant 0 : index
    %173 = vector.load %arg25[%c3_163, %c0_164, %c0_165] : memref<4x16x64xf32, #tpu.memory_space<vmem>>, vector<1x16x64xf32>
    %174 = vector.shape_cast %173 : vector<1x16x64xf32> to vector<16x64xf32>
    %c3_166 = arith.constant 3 : index
    %c0_167 = arith.constant 0 : index
    %c0_168 = arith.constant 0 : index
    %175 = vector.load %arg24[%c3_166, %c0_167, %c0_168] : memref<4x4x1xf32, #tpu.memory_space<vmem>>, vector<1x4x1xf32>
    %176 = vector.shape_cast %175 : vector<1x4x1xf32> to vector<4x1xf32>
    %cst_169 = arith.constant dense<0.000000e+00> : vector<64x1xf32>
    %177 = tpu.matmul %152, %176, %cst_169 {dimension_numbers = #tpu.dot_dimension_numbers<[1], [0], [0], [1], [0, 0, 1, 1], [], []>} : vector<64x4xf32>, vector<4x1xf32>, vector<64x1xf32> -> vector<64x1xf32>
    %cst_170 = arith.constant dense<0.000000e+00> : vector<16x1xf32>
    %178 = tpu.matmul %174, %177, %cst_170 {dimension_numbers = #tpu.dot_dimension_numbers<[1], [0], [0], [1], [0, 0, 1, 1], [], []>} : vector<16x64xf32>, vector<64x1xf32>, vector<16x1xf32> -> vector<16x1xf32>
    %179 = arith.addf %172, %178 : vector<16x1xf32>
    %c0_171 = arith.constant 0 : index
    %c0_172 = arith.constant 0 : index
    %180 = vector.load %arg26[%c0_171, %c0_172] : memref<16x1xf32, #tpu.memory_space<vmem>>, vector<16x1xf32>
    %181 = arith.addf %179, %180 : vector<16x1xf32>
    %c0_173 = arith.constant 0 : index
    %c0_174 = arith.constant 0 : index
    %c0_175 = arith.constant 0 : index
    %182 = vector.load %arg30[%c0_173, %c0_174, %c0_175] : memref<1x16x1xf32, #tpu.memory_space<vmem>>, vector<1x16x1xf32>
    %183 = vector.shape_cast %182 : vector<1x16x1xf32> to vector<16x1xf32>
    %184 = vector.shape_cast %181 : vector<16x1xf32> to vector<1x16x1xf32>
    tpu.vector_store %arg30[%c0_173, %c0_174, %c0_175], %184 {strides = array<i32>} : memref<1x16x1xf32, #tpu.memory_space<vmem>>, vector<1x16x1xf32>,
    return
  }
  func.func @transform_0(%arg0: i32) -> (i32, i32, i32) {
    %c0_i32 = arith.constant 0 : i32
    %c0_i32_0 = arith.constant 0 : i32
    %c0_i32_1 = arith.constant 0 : i32
    return %arg0, %c0_i32, %c0_i32_0 : i32, i32, i32
  }
  func.func @transform_1(%arg0: i32) -> (i32, i32) {
    %c0_i32 = arith.constant 0 : i32
    %c0_i32_0 = arith.constant 0 : i32
    %c0_i32_1 = arith.constant 0 : i32
    return %c0_i32, %c0_i32_0 : i32, i32
  }
  func.func @transform_2(%arg0: i32) -> (i32, i32) {
    %c0_i32 = arith.constant 0 : i32
    %c0_i32_0 = arith.constant 0 : i32
    %c0_i32_1 = arith.constant 0 : i32
    return %c0_i32, %c0_i32_0 : i32, i32
  }
  func.func @transform_3(%arg0: i32) -> (i32, i32) {
    %c0_i32 = arith.constant 0 : i32
    %c0_i32_0 = arith.constant 0 : i32
    %c0_i32_1 = arith.constant 0 : i32
    return %c0_i32, %c0_i32_0 : i32, i32
  }
  func.func @transform_4(%arg0: i32) -> (i32, i32) {
    %c0_i32 = arith.constant 0 : i32
    %c0_i32_0 = arith.constant 0 : i32
    %c0_i32_1 = arith.constant 0 : i32
    return %c0_i32, %c0_i32_0 : i32, i32
  }
  func.func @transform_5(%arg0: i32) -> (i32, i32) {
    %c0_i32 = arith.constant 0 : i32
    %c0_i32_0 = arith.constant 0 : i32
    %c0_i32_1 = arith.constant 0 : i32
    return %c0_i32, %c0_i32_0 : i32, i32
  }
  func.func @transform_6(%arg0: i32) -> (i32, i32, i32) {
    %c0_i32 = arith.constant 0 : i32
    %c0_i32_0 = arith.constant 0 : i32
    %c0_i32_1 = arith.constant 0 : i32
    %c0_i32_2 = arith.constant 0 : i32
    return %c0_i32, %c0_i32_0, %c0_i32_1 : i32, i32, i32
  }
  func.func @transform_7(%arg0: i32) -> (i32, i32, i32) {
    %c0_i32 = arith.constant 0 : i32
    %c0_i32_0 = arith.constant 0 : i32
    %c0_i32_1 = arith.constant 0 : i32
    %c0_i32_2 = arith.constant 0 : i32
    return %c0_i32, %c0_i32_0, %c0_i32_1 : i32, i32, i32
  }
  func.func @transform_8(%arg0: i32) -> (i32, i32) {
    %c0_i32 = arith.constant 0 : i32
    %c0_i32_0 = arith.constant 0 : i32
    %c0_i32_1 = arith.constant 0 : i32
    return %c0_i32, %c0_i32_0 : i32, i32
  }
  func.func @transform_9(%arg0: i32) -> (i32, i32) {
    %c0_i32 = arith.constant 0 : i32
    %c0_i32_0 = arith.constant 0 : i32
    %c0_i32_1 = arith.constant 0 : i32
    return %c0_i32, %c0_i32_0 : i32, i32
  }
  func.func @transform_10(%arg0: i32) -> (i32, i32, i32) {
    %c0_i32 = arith.constant 0 : i32
    %c0_i32_0 = arith.constant 0 : i32
    %c0_i32_1 = arith.constant 0 : i32
    %c0_i32_2 = arith.constant 0 : i32
    return %c0_i32, %c0_i32_0, %c0_i32_1 : i32, i32, i32
  }
  func.func @transform_11(%arg0: i32) -> (i32, i32, i32) {
    %c0_i32 = arith.constant 0 : i32
    %c0_i32_0 = arith.constant 0 : i32
    %c0_i32_1 = arith.constant 0 : i32
    %c0_i32_2 = arith.constant 0 : i32
    return %c0_i32, %c0_i32_0, %c0_i32_1 : i32, i32, i32
  }
  func.func @transform_12(%arg0: i32) -> (i32, i32) {
    %c0_i32 = arith.constant 0 : i32
    %c0_i32_0 = arith.constant 0 : i32
    %c0_i32_1 = arith.constant 0 : i32
    return %c0_i32, %c0_i32_0 : i32, i32
  }
  func.func @transform_13(%arg0: i32) -> (i32, i32) {
    %c0_i32 = arith.constant 0 : i32
    %c0_i32_0 = arith.constant 0 : i32
    %c0_i32_1 = arith.constant 0 : i32
    return %c0_i32, %c0_i32_0 : i32, i32
  }
  func.func @transform_14(%arg0: i32) -> (i32, i32) {
    %c0_i32 = arith.constant 0 : i32
    %c0_i32_0 = arith.constant 0 : i32
    %c0_i32_1 = arith.constant 0 : i32
    return %c0_i32, %c0_i32_0 : i32, i32
  }
  func.func @transform_15(%arg0: i32) -> (i32, i32) {
    %c0_i32 = arith.constant 0 : i32
    %c0_i32_0 = arith.constant 0 : i32
    %c0_i32_1 = arith.constant 0 : i32
    return %c0_i32, %c0_i32_0 : i32, i32
  }
  func.func @transform_16(%arg0: i32) -> (i32, i32) {
    %c0_i32 = arith.constant 0 : i32
    %c0_i32_0 = arith.constant 0 : i32
    %c0_i32_1 = arith.constant 0 : i32
    return %c0_i32, %c0_i32_0 : i32, i32
  }
  func.func @transform_17(%arg0: i32) -> (i32, i32) {
    %c0_i32 = arith.constant 0 : i32
    %c0_i32_0 = arith.constant 0 : i32
    %c0_i32_1 = arith.constant 0 : i32
    return %c0_i32, %c0_i32_0 : i32, i32
  }
  func.func @transform_18(%arg0: i32) -> (i32, i32) {
    %c0_i32 = arith.constant 0 : i32
    %c0_i32_0 = arith.constant 0 : i32
    %c0_i32_1 = arith.constant 0 : i32
    return %c0_i32, %c0_i32_0 : i32, i32
  }
  func.func @transform_19(%arg0: i32) -> (i32, i32) {
    %c0_i32 = arith.constant 0 : i32
    %c0_i32_0 = arith.constant 0 : i32
    %c0_i32_1 = arith.constant 0 : i32
    return %c0_i32, %c0_i32_0 : i32, i32
  }
  func.func @transform_20(%arg0: i32) -> (i32, i32, i32) {
    %c0_i32 = arith.constant 0 : i32
    %c0_i32_0 = arith.constant 0 : i32
    %c0_i32_1 = arith.constant 0 : i32
    %c0_i32_2 = arith.constant 0 : i32
    return %c0_i32, %c0_i32_0, %c0_i32_1 : i32, i32, i32
  }
  func.func @transform_21(%arg0: i32) -> (i32, i32, i32) {
    %c0_i32 = arith.constant 0 : i32
    %c0_i32_0 = arith.constant 0 : i32
    %c0_i32_1 = arith.constant 0 : i32
    %c0_i32_2 = arith.constant 0 : i32
    return %c0_i32, %c0_i32_0, %c0_i32_1 : i32, i32, i32
  }
  func.func @transform_22(%arg0: i32) -> (i32, i32) {
    %c0_i32 = arith.constant 0 : i32
    %c0_i32_0 = arith.constant 0 : i32
    %c0_i32_1 = arith.constant 0 : i32
    return %c0_i32, %c0_i32_0 : i32, i32
  }
  func.func @transform_23(%arg0: i32) -> (i32, i32, i32) {
    %c0_i32 = arith.constant 0 : i32
    %c0_i32_0 = arith.constant 0 : i32
    %c0_i32_1 = arith.constant 0 : i32
    %c0_i32_2 = arith.constant 0 : i32
    return %c0_i32, %c0_i32_0, %c0_i32_1 : i32, i32, i32
  }
  func.func @transform_24(%arg0: i32) -> (i32, i32, i32) {
    %c0_i32 = arith.constant 0 : i32
    %c0_i32_0 = arith.constant 0 : i32
    %c0_i32_1 = arith.constant 0 : i32
    %c0_i32_2 = arith.constant 0 : i32
    return %c0_i32, %c0_i32_0, %c0_i32_1 : i32, i32, i32
  }
  func.func @transform_25(%arg0: i32) -> (i32, i32) {
    %c0_i32 = arith.constant 0 : i32
    %c0_i32_0 = arith.constant 0 : i32
    %c0_i32_1 = arith.constant 0 : i32
    return %c0_i32, %c0_i32_0 : i32, i32
  }
  func.func @transform_26(%arg0: i32) -> (i32, i32, i32) {
    %c0_i32 = arith.constant 0 : i32
    %c0_i32_0 = arith.constant 0 : i32
    %c0_i32_1 = arith.constant 0 : i32
    return %arg0, %c0_i32, %c0_i32_0 : i32, i32, i32
  }
  func.func @transform_27(%arg0: i32) -> (i32, i32, i32) {
    %c0_i32 = arith.constant 0 : i32
    %c0_i32_0 = arith.constant 0 : i32
    %c0_i32_1 = arith.constant 0 : i32
    return %arg0, %c0_i32, %c0_i32_0 : i32, i32, i32
  }
  func.func @transform_28(%arg0: i32) -> (i32, i32, i32) {
    %c0_i32 = arith.constant 0 : i32
    %c0_i32_0 = arith.constant 0 : i32
    %c0_i32_1 = arith.constant 0 : i32
    return %arg0, %c0_i32, %c0_i32_0 : i32, i32, i32
  }
  func.func @transform_29(%arg0: i32) -> (i32, i32, i32) {
    %c0_i32 = arith.constant 0 : i32
    %c0_i32_0 = arith.constant 0 : i32
    %c0_i32_1 = arith.constant 0 : i32
    return %arg0, %c0_i32, %c0_i32_0 : i32, i32, i32
  }
}

</mosaic_0001>

<bundles_post_ra>
// kernel: mul.75
= control target key start
LH: loop header
LB: loop body
LE: loop exit
PB: predicated region body
PF: predicated region fallthrough
CT: control target
= control target key end

     0   :  { %vm41_vm0 = vcmask 130048   ;;  %s164_s0 = inlined_call_operand.vmem [shape: f32[16,8,3,1], index: 0, kind: input, shape index: {}]   ;;  %s165_s1 = inlined_call_operand.vmem [shape: f32[16,24], index: 1, kind: output, shape index: {}]  }
   0x1   :  { %v84_v0 = vld [vmem:[%s164_s0 + $0x1c] sm:$0xf]  ;;  %v85_v1 = vld [vmem:[%s164_s0 + $0x18] sm:$0xf]  ;;  %v86_v2 = vld [vmem:[%s164_s0 + $0x14] sm:$0xf] }
   0x2   :  { %8 = vst [vmem:[#allocation0 + $0x38] sm:$0xf] %v84_v0  ;;  %13 = vst [vmem:[#allocation0 + $0x30] sm:$0xf] %v85_v1  ;;  %v87_v3 = vld [vmem:[%s164_s0 + $0x10] sm:$0xf] }
   0x3   :  { %18 = vst [vmem:[#allocation0 + $0x28] sm:$0xf] %v86_v2  ;;  %v88_v4 = vld [vmem:[%s164_s0 + $0xc] sm:$0xf]  ;;  %v89_v5 = vld [vmem:[%s164_s0 + $0x8] sm:$0xf] }
   0x4   :  { %23 = vst [vmem:[#allocation0 + $0x20] sm:$0xf] %v87_v3  ;;  %28 = vst [vmem:[#allocation0 + $0x18] sm:$0xf] %v88_v4  ;;  %v90_v6 = vld [vmem:[%s164_s0 + $0x4] sm:$0xf] }
   0x5   :  { %33 = vst [vmem:[#allocation0 + $0x10] sm:$0xf] %v89_v5  ;;  %v38_v7 = vld [vmem:[%s164_s0] sm:$0xf]  ;;  %37 = vst [vmem:[#allocation0 + $0x8] sm:$0xf] %v90_v6 }
   0x6   :  { %39 = vst [vmem:[#allocation0] sm:$0xf] %v38_v7 }
   0x9   :  { %v69_v9 = vld [vmem:[#allocation0 + $0x30] sm:$0x7]   ;;  %v74_v10 = vld [vmem:[#allocation0 + $0x38] sm:$0x7]  }
   0xa   :  { %v64_v8 = vld [vmem:[#allocation0 + $0x28] sm:$0x7]   ;;  %96 = vst.msk [vmem:[%s165_s1 + $0x12] sm:$0x7] %vm41_vm0, %v69_v9   ;;  %97 = vst.msk [vmem:[%s165_s1 + $0x15] sm:$0x7] %vm41_vm0, %v74_v10  }
   0xb   :  { %v54_v12 = vld [vmem:[#allocation0 + $0x18] sm:$0x7]   ;;  %v59_v13 = vld [vmem:[#allocation0 + $0x20] sm:$0x7]   ;;  %95 = vst.msk [vmem:[%s165_s1 + $0xf] sm:$0x7] %vm41_vm0, %v64_v8  }
   0xc   :  { %v49_v11 = vld [vmem:[#allocation0 + $0x10] sm:$0x7]   ;;  %v44_v15 = vld [vmem:[#allocation0 + $0x8] sm:$0x7]   ;;  %93 = vst.msk [vmem:[%s165_s1 + $0x9] sm:$0x7] %vm41_vm0, %v54_v12  }
   0xd   :  { %v40_v14 = vld [vmem:[#allocation0] sm:$0x7]   ;;  %92 = vst.msk [vmem:[%s165_s1 + $0x6] sm:$0x7] %vm41_vm0, %v49_v11   ;;  %94 = vst.msk [vmem:[%s165_s1 + $0xc] sm:$0x7] %vm41_vm0, %v59_v13  }
   0xe   :  { %42 = vst.msk [vmem:[%s165_s1] sm:$0x7] %vm41_vm0, %v40_v14   ;;  %91 = vst.msk [vmem:[%s165_s1 + $0x3] sm:$0x7] %vm41_vm0, %v44_v15  }

// kernel: mul.54
= control target key start
LH: loop header
LB: loop body
LE: loop exit
PB: predicated region body
PF: predicated region fallthrough
CT: control target
= control target key end

     0   :  { %vm21_vm0 = vcmask 64512   ;;  %s80_s0 = inlined_call_operand.vmem [shape: f32[8,4,3,1], index: 0, kind: input, shape index: {}]   ;;  %s81_s1 = inlined_call_operand.vmem [shape: f32[8,12], index: 1, kind: output, shape index: {}]  }
   0x1   :  { %v40_v0 = vld [vmem:[%s80_s0 + $0xc] sm:$0xf]  ;;  %v41_v1 = vld [vmem:[%s80_s0 + $0x8] sm:$0xf]  ;;  %v42_v2 = vld [vmem:[%s80_s0 + $0x4] sm:$0xf] }
   0x2   :  { %8 = vst [vmem:[#allocation0 + $0x18] sm:$0xf] %v40_v0  ;;  %13 = vst [vmem:[#allocation0 + $0x10] sm:$0xf] %v41_v1  ;;  %v18_v3 = vld [vmem:[%s80_s0] sm:$0xf] }
   0x3   :  { %17 = vst [vmem:[#allocation0 + $0x8] sm:$0xf] %v42_v2  ;;  %19 = vst [vmem:[#allocation0] sm:$0xf] %v18_v3 }
   0x9   :  { %v29_v5 = vld [vmem:[#allocation0 + $0x10] sm:$0x7]   ;;  %v34_v6 = vld [vmem:[#allocation0 + $0x18] sm:$0x7]  }
   0xa   :  { %v24_v4 = vld [vmem:[#allocation0 + $0x8] sm:$0x7]   ;;  %v20_v7 = vld [vmem:[#allocation0] sm:$0x7]   ;;  %44 = vst.msk [vmem:[%s81_s1 + $0x6] sm:$0x7] %vm21_vm0, %v29_v5  }
   0xb   :  { %43 = vst.msk [vmem:[%s81_s1 + $0x3] sm:$0x7] %vm21_vm0, %v24_v4   ;;  %45 = vst.msk [vmem:[%s81_s1 + $0x9] sm:$0x7] %vm21_vm0, %v34_v6  }
   0xc   :  { %22 = vst.msk [vmem:[%s81_s1] sm:$0x7] %vm21_vm0, %v20_v7  }

// kernel: tfa_encoder13_forward.1
= control target key start
LH: loop header
LB: loop body
LE: loop exit
PB: predicated region body
PF: predicated region fallthrough
CT: control target
= control target key end

     0   :  { %s8799_s6 = smov 1   ;;  %s8800_s10 = smov 2   ;;  %s9987_s0 = inlined_call_operand.smem [shape: u32[30], index: -1, kind: input, shape index: {}] }
   0x1   :  { %s8841_s5 = sld [smem:[%s9987_s0]]   ;;  %s8801_s14 = smov 3  }
   0x2   :  { %s8846_s9 = sld [smem:[%s9987_s0 + %s8799_s6]]   ;;  %s8802_s18 = smov 4  }
   0x3   :  { %s8851_s13 = sld [smem:[%s9987_s0 + %s8800_s10]]   ;;  %s8803_s22 = smov 5  }
   0x4   :  { %s8856_s17 = sld [smem:[%s9987_s0 + %s8801_s14]]   ;;  %s8804_s26 = smov 6  }
   0x5   :  { %s8861_s21 = sld [smem:[%s9987_s0 + %s8802_s18]]   ;;  %s8805_s30 = smov 7  }
   0x6   :  { %s8866_s25 = sld [smem:[%s9987_s0 + %s8803_s22]]   ;;  %s8806_s4 = smov 8  }
   0x7   :  { %s8871_s29 = sld [smem:[%s9987_s0 + %s8804_s26]]   ;;  %s8807_s10 = smov 9  }
   0x8   :  { %s8876_s3 = sld [smem:[%s9987_s0 + %s8805_s30]]   ;;  %s8808_s15 = smov 10  }
   0x9   :  { %s8881_s8 = sld [smem:[%s9987_s0 + %s8806_s4]]   ;;  %s8809_s20 = smov 11  }
   0xa   :  { %s8886_s14 = sld [smem:[%s9987_s0 + %s8807_s10]]   ;;  %s8810_s26 = smov 12  }
   0xb   :  { %s8891_s19 = sld [smem:[%s9987_s0 + %s8808_s15]]   ;;  %s8811_s1 = smov 13  }
   0xc   :  { %s8896_s24 = sld [smem:[%s9987_s0 + %s8809_s20]]   ;;  %s8812_s7 = smov 14  }
   0xd   :  { %s8901_s30 = sld [smem:[%s9987_s0 + %s8810_s26]]   ;;  %s8813_s15 = smov 15  }
   0xe   :  { %s8906_s6 = sld [smem:[%s9987_s0 + %s8811_s1]]   ;;  %s8814_s22 = smov 16  }
   0xf   :  { %s8911_s12 = sld [smem:[%s9987_s0 + %s8812_s7]]   ;;  %s8815_s28 = smov 17  }
  0x10   :  { %s8916_s20 = sld [smem:[%s9987_s0 + %s8813_s15]]   ;;  %s8816_s7 = smov 18  }
  0x11   :  { %s8921_s27 = sld [smem:[%s9987_s0 + %s8814_s22]]   ;;  %s8817_s15 = smov 19  }
  0x12   :  { %10001 = sst [smem:[#allocation2_spill]] %s8896_s24  ;;  %s8818_s22 = smov 20  }
  0x13   :  { %s8926_s4 = sld [smem:[%s9987_s0 + %s8815_s28]]   ;;  %s8819_s28 = smov 21  }
  0x14   :  { %10002 = sst [smem:[#allocation3_spill]] %s8906_s6 }
  0x15   :  { %10003 = sst [smem:[#allocation4_spill]] %s8911_s12 }
  0x16   :  { %s8931_s12 = sld [smem:[%s9987_s0 + %s8816_s7]]   ;;  %s8820_s7 = smov 22  }
  0x17   :  { %10004 = sst [smem:[#allocation5_spill]] %s8921_s27 }
  0x18   :  { %s8936_s6 = sld [smem:[%s9987_s0 + %s8817_s15]]   ;;  %s8821_s15 = smov 23  }
  0x19   :  { %10005 = sst [smem:[#allocation6_spill]] %s8926_s4 }
  0x1a   :  { %s8941_s27 = sld [smem:[%s9987_s0 + %s8818_s22]]   ;;  %s8822_s22 = smov 24  }
  0x1b   :  { %s8946_s4 = sld [smem:[%s9987_s0 + %s8819_s28]]   ;;  %s8823_s28 = smov 25  }
  0x1c   :  { %10006 = sst [smem:[#allocation7_spill]] %s8931_s12 }
  0x1d   :  { %s8951_s12 = sld [smem:[%s9987_s0 + %s8820_s7]]   ;;  %s8824_s7 = smov 26  }
  0x1e   :  { %10007 = sst [smem:[#allocation8_spill]] %s8936_s6 }
  0x1f   :  { %s8956_s6 = sld [smem:[%s9987_s0 + %s8821_s15]]   ;;  %s8825_s15 = smov 27  }
  0x20   :  { %10008 = sst [smem:[#allocation9_spill]] %s8941_s27 }
  0x21   :  { %10009 = sst [smem:[#allocation10_spill]] %s8946_s4 }
  0x22   :  { %s8961_s27 = sld [smem:[%s9987_s0 + %s8822_s22]]   ;;  %s8826_s22 = smov 28  }
  0x23   :  { %s8966_s4 = sld [smem:[%s9987_s0 + %s8823_s28]]   ;;  %s8827_s28 = smov 29  }
  0x24   :  { %s8971_s24 = sld [smem:[%s9987_s0 + %s8824_s7]]   ;;  %s8988_s7 = smov 0  }
  0x25   :  { %10010 = sst [smem:[#allocation11_spill]] %s8956_s6 }
  0x26   :  { %s8976_s6 = sld [smem:[%s9987_s0 + %s8825_s15]]  }
  0x28   :  { %10011 = sst [smem:[#allocation12_spill]] %s8961_s27 }
  0x29   :  { %10012 = sst [smem:[#allocation13_spill]] %s8966_s4 }
  0x2a   :  { %s8981_s27 = sld [smem:[%s9987_s0 + %s8826_s22]]  }
  0x2b   :  { %s8986_s4 = sld [smem:[%s9987_s0 + %s8827_s28]]  }
  0x2c LB: > { %s6310_s10 = sadd.s32 4294967295, %s8797_s7   ;;  %p6314_p0 = scmp.ge.s32.totalorder %s8797_s7, 1  ;;  %s8797_s7 = sphi %s8988_s7, %s70_s7  }
  0x2d   : > { %p824_p1 = scmp.lt.s32.totalorder %s8797_s7, 3 }
  0x2f   : > { %p825_p2 = pnand %p6314_p0, %p824_p1 }
  0x30   : > { %p915_p3 = scmp.lt.s32.totalorder (!%p825_p2), %s6310_s10, 1  ;;  %v8828_v0 = vmov (!%p825_p2), 0.0|0.0   ;;  %vm8829_vm0 = vmmov (!%p825_p2), 0   ;;  %v8830_v1 = vmov (!%p825_p2), 0.0   ;;  %v946_v2 = vld [vmem:[%s8851_s13] sm:$0xff] (!%p825_p2)  ;;  %v8831_v3 = vmov (!%p825_p2), 0  }
  0x31   : > { %828 = sbr.rel (%p825_p2) target bundleno = 4694 (0x1256), region = 124  ;;  %8234 = vmatprep.subr.bf16.mxu0 (!%p825_p2), %v8828_v0  ;;  %7281 = vmatprep.mubr.msk.f32.mxu0 (!%p825_p2), %vm8829_vm0, %v8830_v1  ;;  %v948_v4 = vld [vmem:[%s8851_s13 + $0x10] sm:$0x1f] (!%p825_p2)  ;;  %v947_v5 = vld [vmem:[%s8851_s13 + $0x8] sm:$0xff] (!%p825_p2)  ;;  %v2473_v6 = vld [vmem:[%s8881_s8] sm:$0xff] (!%p825_p2)  ;;  %vm974_vm1 = vcmask (!%p825_p2), 1044480  }
  0x32   : > { %8749 = vset.pattern.permute.xlu0 (!%p825_p2), %v8831_v3  ;;  %8750 = vset.pattern.permute.xlu1 (!%p825_p2), %v8831_v3  ;;  %v2474_v10 = vld [vmem:[%s8881_s8 + $0x8] sm:$0xff] (!%p825_p2)  ;;  %v2475_v11 = vld [vmem:[%s8881_s8 + $0x10] sm:$0xff] (!%p825_p2)  ;;  %v943_v13 = vld [vmem:[%s8846_s9] sm:$0xff] (!%p825_p2)  ;;  %vm964_vm2 = vcmask (!%p825_p2), 171008   ;;  %vm1091_vm3 = vcmask (!%p825_p2), 326656   ;;  %vm1204_vm4 = vcmask (!%p825_p2), 323584  }
  0x33   : > { %951 = vperm.xlu0 (!%p825_p2), %8749, %v946_v2   ;;  %961 = vperm.xlu1 (!%p825_p2), %8750, %v948_v4   ;;  %v2476_v14 = vld [vmem:[%s8881_s8 + $0x18] sm:$0xff] (!%p825_p2)  ;;  %v2477_v15 = vld [vmem:[%s8881_s8 + $0x20] sm:$0xff] (!%p825_p2)  ;;  %v944_v16 = vld [vmem:[%s8846_s9 + $0x8] sm:$0xff] (!%p825_p2)  ;;  %vm1615_vm5 = vcmask (!%p825_p2), 465920   ;;  %vm1646_vm6 = vcmask (!%p825_p2), 1040384   ;;  %vm8832_vm7 = vmmov (!%p825_p2), 1  }
  0x34   : > { %8237 = vmatprep.subr.bf16.mxu1 (!%p825_p2), %v8828_v0  ;;  %7300 = vmatprep.mubr.msk.f32.mxu1 (!%p825_p2), %vm8829_vm0, %v8830_v1  ;;  %v2478_v17 = vld [vmem:[%s8881_s8 + $0x28] sm:$0xff] (!%p825_p2)  ;;  %v2479_v18 = vld [vmem:[%s8881_s8 + $0x30] sm:$0xff] (!%p825_p2)  ;;  %v2480_v20 = vld [vmem:[%s8881_s8 + $0x38] sm:$0xff] (!%p825_p2)  ;;  %vm2567_vm9 = vcmask (!%p825_p2), 621568   ;;  %vm2610_vm10 = vcmask (!%p825_p2), 1043456   ;;  %vm2804_vm12 = vcmask (!%p825_p2), 1042432  }
  0x35   : > { %v945_v19 = vld [vmem:[%s8846_s9 + $0x10] sm:$0x1f] (!%p825_p2)  ;;  %v2481_v21 = vld [vmem:[%s8881_s8 + $0x40] sm:$0xff] (!%p825_p2)  ;;  %v2482_v22 = vld [vmem:[%s8881_s8 + $0x48] sm:$0xf] (!%p825_p2)  ;;  %vm2761_vm13 = vcmask (!%p825_p2), 154624  }
  0x36   : > { %v3677_v23 = vld [vmem:[%s8901_s30] sm:$0xff] (!%p825_p2)  ;;  %v3678_v24 = vld [vmem:[%s8901_s30 + $0x8] sm:$0xff] (!%p825_p2)  ;;  %v3679_v25 = vld [vmem:[%s8901_s30 + $0x10] sm:$0xff] (!%p825_p2)  ;;  %s10017_s16 = sld [smem:[#allocation2_spill]] (!%p825_p2)  ;;  %vm3095_vm14 = vcmask (!%p825_p2), 883712   ;;  %s10018_s18 = sld [smem:[#allocation3_spill]] (!%p825_p2) }
  0x37   : > { %956 = vperm.xlu0 (!%p825_p2), %8749, %v947_v5   ;;  %2485 = vperm.xlu1 (!%p825_p2), %8750, %v2473_v6   ;;  %v3680_v26 = vld [vmem:[%s8901_s30 + $0x18] sm:$0xff] (!%p825_p2)  ;;  %v3681_v27 = vld [vmem:[%s8901_s30 + $0x20] sm:$0xff] (!%p825_p2)  ;;  %v3682_v28 = vld [vmem:[%s8901_s30 + $0x28] sm:$0xff] (!%p825_p2)  ;;  %vm3751_vm15 = vcmask (!%p825_p2), 588800   ;;  %s10019_s22 = sld [smem:[#allocation4_spill]] (!%p825_p2)  ;;  %s10020_s23 = sld [smem:[#allocation5_spill]] (!%p825_p2) }
  0x38   : > { %s10030_s10 = smov (!%p915_p3, %s6310_s10), 1  ;;  %v3683_v29 = vld [vmem:[%s8901_s30 + $0x30] sm:$0xff]  ;;  %v3684_v30 = vld [vmem:[%s8901_s30 + $0x38] sm:$0xff]  ;;  %v3685_v31 = vld [vmem:[%s8901_s30 + $0x40] sm:$0xff]  ;;  %s10021_s26 = sld [smem:[#allocation6_spill]] }
  0x39   : > { %s8705_s0 = smul.u32 24, %s10030_s10  ;;  %v3835_v32 = vld [vmem:[%s8916_s20] sm:$0xff]  ;;  %v3836_v33 = vld [vmem:[%s8916_s20 + $0x8] sm:$0x1]  ;;  %v5254_v36 = vld [vmem:[%s8951_s12 + $0x10] sm:$0xff]  ;;  %s10022_s28 = sld [smem:[#allocation7_spill]] }
  0x3a   : > { %v5252_v34 = vld [vmem:[%s8951_s12] sm:$0xff]  ;;  %v5253_v35 = vld [vmem:[%s8951_s12 + $0x8] sm:$0xff]  ;;  %v5255_v37 = vld [vmem:[%s8951_s12 + $0x18] sm:$0xff]  ;;  %s10023_s1 = sld [smem:[#allocation8_spill]]  ;;  %s10024_s2 = sld [smem:[#allocation9_spill]] }
  0x3b   : > { %s919_s11 = scalar_lea.vmem %s8841_s5, %s8705_s0  ;;  %2490 = vperm.xlu0 %8749, %v2474_v10   ;;  %2495 = vperm.xlu1 %8750, %v2475_v11   ;;  %v5256_v38 = vld [vmem:[%s8951_s12 + $0x20] sm:$0xff]  ;;  %v5257_v39 = vld [vmem:[%s8951_s12 + $0x28] sm:$0xff]  ;;  %v5258_v40 = vld [vmem:[%s8951_s12 + $0x30] sm:$0xff]  ;;  %s924_s15 = scalar_lea.vmem %s8971_s24, %s8705_s0 }
  0x3c   : > { %v9012_v7 = vld [vmem:[%s919_s11] sm:$0xff]  ;;  %v9014_v8 = vld [vmem:[%s919_s11 + $0x8] sm:$0xff]  ;;  %v9021_v12 = vld [vmem:[%s919_s11 + $0x10] sm:$0x1f]  ;;  %s8706_s0 = smul.u32 72, %s10030_s10 }
  0x3d   : > { %v8235_v9 = vpack.c.bf16 %v9014_v8, %v9012_v7  ;;  %v5259_v41 = vld [vmem:[%s8951_s12 + $0x38] sm:$0xff]  ;;  %v1079_v42 = vld [vmem:[%s8856_s17] sm:$0xff]  ;;  %v1080_v43 = vld [vmem:[%s8856_s17 + $0x8] sm:$0xff] }
  0x3e   : > { %v8238_v44 = vpack.c.bf16 %v1080_v43, %v1079_v42  ;;  %v1081_v45 = vld [vmem:[%s8856_s17 + $0x10] sm:$0xff]  ;;  %v1082_v46 = vld [vmem:[%s8856_s17 + $0x18] sm:$0xff]  ;;  %v1083_v48 = vld [vmem:[%s8856_s17 + $0x20] sm:$0xff]  ;;  %s9696_s11 = scalar_lea.vmem %s8981_s27, %s8706_s0 }
  0x3f   : > { %8236 = vmatpush3.bf16.msra.mxu0 %v8235_v9  ;;  %2500 = vperm.xlu0 %8749, %v2476_v14   ;;  %v8241_v47 = vpack.c.bf16 %v1082_v46, %v1081_v45  ;;  %vm9157_vm8 = vmpackc.low %vm1646_vm6, %vm8832_vm7 }
  0x40   : > { %7279 = vmatprep.subr.mxu0 %v8830_v1  ;;  %2505 = vperm.xlu1 %8750, %v2477_v15   ;;  %vm9263_vm11 = vmpackc.low %vm2610_vm10, %vm8832_vm7 }
  0x41   : > { %8239 = vmatpush3.bf16.msra.mxu1 %v8238_v44 }
  0x42   : > { %8240 = vmatprep.subr.bf16.mxu1 %v8828_v0 }
  0x43   : > { %7280 = vmatpush3.msk.msra.mxu0 %vm974_vm1, %v9021_v12  ;;  %2510 = vperm.xlu0 %8749, %v2478_v17   ;;  %v1209_v17 = vld [vmem:[%s8866_s25] sm:$0xff] }
  0x44   : > { %7282 = vmatmul.mubr.msk.f32.vlgmr.msra.gmra.mrb[0].mxu0 %vm964_vm2, %v943_v13  ;;  %2515 = vperm.xlu1 %8750, %v2479_v18   ;;  %v1359_v18 = vld [vmem:[%s8871_s29] sm:$0xff] }
  0x45   : > { %7284 = vmatprep.mubr.msk.f32.mxu0 %vm8829_vm0, %v8830_v1  ;;  %8242 = vmatpush3.bf16.msra.mxu1 %v8241_v47 }
  0x46   : > { %7298 = vmatprep.subr.mxu1 %v8830_v1 }
  0x47   : > { %2520 = vperm.xlu0 %8749, %v2480_v20  }
  0x48   : > { %7285 = vmatmul.mubr.msk.f32.gmra.mrb[2].mxu0 %vm964_vm2, %v944_v16  ;;  %2525 = vperm.xlu1 %8750, %v2481_v21   ;;  %v1361_v21 = vld [vmem:[%s8871_s29 + $0x10] sm:$0xff] }
  0x49   : > { %7287 = vmatprep.mubr.msk.f32.mxu0 %vm8829_vm0, %v8830_v1  ;;  %7299 = vmatpush3.msra.mxu1 %v1083_v48 }
  0x4b   : > { %2530 = vperm.xlu0 %8749, %v2482_v22   ;;  %v1362_v22 = vld [vmem:[%s8871_s29 + $0x18] sm:$0xff] }
  0x4c   : > { %7288 = vmatmul.mubr.msk.f32.gmra.mrb[4].mxu0 %vm964_vm2, %v945_v19  ;;  %3688 = vperm.xlu1 %8750, %v3677_v23   ;;  %v1360_v19 = vld [vmem:[%s8871_s29 + $0x8] sm:$0xff]  ;;  %v8251_v23 = vpack.c.bf16 %v1362_v22, %v1361_v21 }
  0x4d   : > { %7315 = vmatprep.mubr.msk.f32.mxu0 %vm964_vm2, %v1209_v17  ;;  %v8247_v20 = vpack.c.bf16 %v1360_v19, %v1359_v18  ;;  %v6441_v17 = vld [vmem:[%s8871_s29 + $0x78] sm:$0xff]  ;;  %v6442_v18 = vld [vmem:[%s8871_s29 + $0x80] sm:$0xff] }
  0x4e   : > { %v8325_v21 = vpack.c.bf16 %v6442_v18, %v6441_v17 }
  0x4f   : > { %3693 = vperm.xlu0 %8749, %v3678_v24   ;;  %8248 = vmatprep.subr.bf16.mxu1 %v8247_v20  ;;  %v6328_v24 = vld [vmem:[%s8861_s21] ss:$0 sm:$0xff] }
  0x50   : > { %3698 = vperm.xlu1 %8750, %v3679_v25  }
  0x53   : > { %3703 = vperm.xlu0 %8749, %v3680_v26  }
  0x54   : > { %3708 = vperm.xlu1 %8750, %v3681_v27  }
  0x57   : > { %3713 = vperm.xlu0 %8749, %v3682_v28  }
  0x58   : > { %3718 = vperm.xlu1 %8750, %v3683_v29  }
  0x5b   : > { %3723 = vperm.xlu0 %8749, %v3684_v30  }
  0x5c   : > { %3728 = vperm.xlu1 %8750, %v3685_v31  }
  0x5f   : > { %3839 = vperm.xlu0 %8749, %v3835_v32  }
  0x60   : > { %3844 = vperm.xlu1 %8750, %v3836_v33  }
  0x63   : > { %5262 = vperm.xlu0 %8749, %v5252_v34  }
  0x64   : > { %5267 = vperm.xlu1 %8750, %v5253_v35  }
  0x67   : > { %5272 = vperm.xlu0 %8749, %v5254_v36  }
  0x68   : > { %5277 = vperm.xlu1 %8750, %v5255_v37  }
  0x6b   : > { %5282 = vperm.xlu0 %8749, %v5256_v38  }
  0x6c   : > { %5287 = vperm.xlu1 %8750, %v5257_v39  }
  0x6f   : > { %5292 = vperm.xlu0 %8749, %v5258_v40  }
  0x70   : > { %5297 = vperm.xlu1 %8750, %v5259_v41  }
  0xb2   : > { %v952_v49 = vpop.permute.xlu0 %951  ;;  %v962_v60 = vpop.permute.xlu1 %961 }
  0xb6   : > { %v957_v54 = vpop.permute.xlu0 %956 }
 0x117   : > { %v1044_v50 = vpop.f32.mrb[0].mxu0 }
 0x118   : > { %v1045_v51 = vadd.f32 %v1044_v50, %v952_v49  ;;  %v7283_v52 = vpop.f32.mrb[1].mxu0 }
 0x119   : > { %v6362_v52 = vld [vmem:[%s8871_s29 + $0x28] sm:$0xff] }
 0x11a   : > { %v6325_v53 = vmul.f32 -0.999995, %v1045_v51 }
 0x11b   : > { %v1049_v55 = vpop.f32.mrb[2].mxu0 }
 0x11c   : > { %v1064_v56 = vmul.f32 1.442695, %v6325_v53  ;;  %v1050_v57 = vadd.f32 %v1049_v55, %v957_v54  ;;  %v7286_v58 = vpop.f32.mrb[3].mxu0  ;;  %v6363_v53 = vld [vmem:[%s8871_s29 + $0x30] sm:$0xff]  ;;  %v6364_v55 = vld [vmem:[%s8871_s29 + $0x38] sm:$0xff] }
 0x11e   : > { %8751 = vpow2.f32 %v1064_v56  ;;  %v6326_v59 = vmul.f32 -0.999995, %v1050_v57  ;;  %v6365_v56 = vld [vmem:[%s8871_s29 + $0x40] sm:$0xff]  ;;  %v1211_v57 = vld [vmem:[%s8866_s25 + $0x10] sm:$0xff] }
 0x11f   : > { %v1054_v61 = vpop.f32.mrb[4].mxu0  ;;  %v8259_v58 = vpack.c.bf16 %v6365_v56, %v6364_v55  ;;  %v6353_v56 = vld [vmem:[%s8876_s3 + $0x58] sm:$0xff] }
 0x120   : > { %v1066_v62 = vmul.f32 1.442695, %v6326_v59  ;;  %v1055_v63 = vadd.f32 %v1054_v61, %v962_v60  ;;  %v7289_v2 = vpop.f32.mrb[5].mxu0  ;;  %v1213_v59 = vld [vmem:[%s8866_s25 + $0x20] sm:$0xff]  ;;  %v1214_v60 = vld [vmem:[%s8866_s25 + $0x28] sm:$0xff]  ;;  %v1215_v61 = vld [vmem:[%s8866_s25 + $0x30] sm:$0xff] }
 0x121   : > { %v6366_v2 = vld [vmem:[%s8871_s29 + $0x48] sm:$0xff] }
 0x122   : > { %8753 = vpow2.f32 %v1066_v62  ;;  %v6327_v3 = vmul.f32 -0.999995, %v1055_v63  ;;  %v1216_v62 = vld [vmem:[%s8866_s25 + $0x38] sm:$0x1]  ;;  %v1363_v63 = vld [vmem:[%s8871_s29 + $0x20] sm:$0xff] }
 0x124   : > { %v1068_v4 = vmul.f32 1.442695, %v6327_v3  ;;  %v6407_v3 = vld [vmem:[%s8871_s29 + $0x50] sm:$0xff] }
 0x126   : > { %8755 = vpow2.f32 %v1068_v4  ;;  %v6408_v4 = vld [vmem:[%s8871_s29 + $0x58] sm:$0xff] }
 0x128   : > { %v8752_v5 = vpop.eup %8751 }
 0x129   : > { %v1070_v6 = vadd.f32 1.0, %v8752_v5  ;;  %v8299_v5 = vpack.c.bf16 %v6408_v4, %v6407_v3  ;;  %v6358_v3 = vld [vmem:[%s8876_s3 + $0x80] sm:$0xff] }
 0x12b   : > { %8757 = vrcp.f32 %v1070_v6  ;;  %v6409_v6 = vld [vmem:[%s8871_s29 + $0x60] sm:$0xff] }
 0x12c   : > { %v8754_v9 = vpop.eup %8753 }
 0x12d   : > { %v1071_v10 = vadd.f32 1.0, %v8754_v9  ;;  %v6410_v9 = vld [vmem:[%s8871_s29 + $0x68] sm:$0xff] }
 0x12f   : > { %8759 = vrcp.f32 %v1071_v10 }
 0x130   : > { %v8756_v11 = vpop.eup %8755 }
 0x131   : > { %v1072_v13 = vadd.f32 1.0, %v8756_v11 }
 0x133   : > { %8761 = vrcp.f32 %v1072_v13  ;;  %v8303_v13 = vpack.c.bf16 %v6410_v9, %v6409_v6  ;;  %v6359_v6 = vld [vmem:[%s8876_s3 + $0x88] sm:$0xff] }
 0x135   : > { %v8758_v14 = vpop.eup %8757 }
 0x136   : > { %7301 = vmatmul.mubr.msk.f32.vlgmr.msra.gmra.mrb[0].mxu1 %vm1091_vm3, %v8758_v14 }
 0x137   : > { %7303 = vmatprep.mubr.msk.f32.mxu1 %vm8829_vm0, %v8830_v1  ;;  %8250 = vmatpush3.bf16.msra.mxu1 %v8247_v20 }
 0x138   : > { %8252 = vmatprep.subr.bf16.mxu1 %v8251_v23 }
 0x139   : > { %v8760_v15 = vpop.eup %8759 }
 0x13a   : > { %7304 = vmatmul.mubr.msk.f32.gmra.mrb[2].mxu1 %vm1091_vm3, %v8760_v15 }
 0x13b   : > { %7306 = vmatprep.mubr.msk.f32.mxu1 %vm8829_vm0, %v8830_v1  ;;  %8254 = vmatpush3.bf16.msra.mxu1 %v8251_v23 }
 0x13c   : > { %7335 = vmatprep.subr.mxu1 %v1363_v63 }
 0x13d   : > { %v8762_v16 = vpop.eup %8761 }
 0x13e   : > { %7307 = vmatmul.mubr.msk.f32.gmra.mrb[4].mxu1 %vm1091_vm3, %v8762_v16  ;;  %v6411_v16 = vld [vmem:[%s8871_s29 + $0x70] sm:$0xff] }
 0x13f   : > { %7336 = vmatpush3.msra.mxu1 %v1363_v63  ;;  %v6357_v63 = vld [vmem:[%s8876_s3 + $0x78] sm:$0xff] }
 0x209   : > { %v1167_v25 = vpop.f32.mrb[0].mxu1 }
 0x20a   : > { %v1168_v26 = vadd.f32 %v6328_v24, %v1167_v25  ;;  %v7302_v27 = vpop.f32.mrb[1].mxu1  ;;  %v6444_v25 = vld [vmem:[%s8871_s29 + $0x90] sm:$0xff] }
 0x20b   : > { %v6445_v27 = vld [vmem:[%s8871_s29 + $0x98] sm:$0xff] }
 0x20c   : > { %v6332_v28 = vmul.f32 -0.999995, %v1168_v26 }
 0x20d   : > { %v1172_v29 = vpop.f32.mrb[2].mxu1 }
 0x20e   : > { %v1187_v30 = vmul.f32 1.442695, %v6332_v28  ;;  %v1173_v31 = vadd.f32 %v6328_v24, %v1172_v29  ;;  %v7305_v32 = vpop.f32.mrb[3].mxu1  ;;  %v6352_v28 = vld [vmem:[%s8876_s3 + $0x50] sm:$0xff] }
 0x210   : > { %8763 = vpow2.f32 %v1187_v30  ;;  %v6333_v33 = vmul.f32 -0.999995, %v1173_v31 }
 0x211   : > { %v1177_v34 = vpop.f32.mrb[4].mxu1 }
 0x212   : > { %v1189_v35 = vmul.f32 1.442695, %v6333_v33  ;;  %v1178_v36 = vadd.f32 %v6328_v24, %v1177_v34  ;;  %v7308_v37 = vpop.f32.mrb[5].mxu1  ;;  %v6443_v24 = vld [vmem:[%s8871_s29 + $0x88] sm:$0xff] }
 0x213   : > { %v8329_v26 = vpack.c.bf16 %v6444_v25, %v6443_v24  ;;  %v1352_v24 = vld [vmem:[%s8876_s3 + $0x18] sm:$0xff] }
 0x214   : > { %8765 = vpow2.f32 %v1189_v35  ;;  %v6334_v38 = vmul.f32 -0.999995, %v1178_v36 }
 0x216   : > { %v1191_v39 = vmul.f32 1.442695, %v6334_v38 }
 0x218   : > { %8767 = vpow2.f32 %v1191_v39 }
 0x21a   : > { %v8764_v40 = vpop.eup %8763 }
 0x21b   : > { %v1193_v41 = vadd.f32 1.0, %v8764_v40 }
 0x21d   : > { %8769 = vrcp.f32 %v1193_v41 }
 0x21e   : > { %v8766_v42 = vpop.eup %8765 }
 0x21f   : > { %v1194_v43 = vadd.f32 1.0, %v8766_v42 }
 0x221   : > { %8771 = vrcp.f32 %v1194_v43 }
 0x222   : > { %v8768_v44 = vpop.eup %8767 }
 0x223   : > { %v1195_v45 = vadd.f32 1.0, %v8768_v44 }
 0x225   : > { %8773 = vrcp.f32 %v1195_v45 }
 0x227   : > { %v8770_v46 = vpop.eup %8769 }
 0x228   : > { %1202 = vst.msk [vmem:[%s924_s15] sm:$0xff] %vm1091_vm3, %v8770_v46  ;;  %v1206_v48 = vmul.f32 %v8770_v46, %v9012_v7  ;;  %v8255_v7 = vpack.c.bf16 %v6363_v53, %v6362_v52 }
 0x22b   : > { %v8772_v47 = vpop.eup %8771 }
 0x22c   : > { %1203 = vst.msk [vmem:[%s924_s15 + $0x8] sm:$0xff] %vm1091_vm3, %v8772_v47  ;;  %v1207_v49 = vmul.f32 %v8772_v47, %v9014_v8  ;;  %v1210_v8 = vld [vmem:[%s8866_s25 + $0x8] sm:$0xff] }
 0x22e   : > { %v8243_v50 = vpack.c.bf16 %v1207_v49, %v1206_v48 }
 0x22f   : > { %v8774_v51 = vpop.eup %8773 }
 0x230   : > { %1205 = vst.msk [vmem:[%s924_s15 + $0x10] sm:$0x1f] %vm1204_vm4, %v8774_v51  ;;  %8244 = vmatprep.subr.bf16.mxu0 %v8243_v50  ;;  %v1208_v54 = vmul.f32 %v8774_v51, %v9021_v12  ;;  %v1212_v12 = vld [vmem:[%s8866_s25 + $0x18] sm:$0xff]  ;;  %s9699_s15 = scalar_lea.vmem %s8976_s6, %s8706_s0  ;;  %s10026_s0 = sld [smem:[#allocation11_spill]]  ;;  %vm6124_vm4 = vcmask 7168  }
 0x231   : > { %8246 = vmatpush3.bf16.msra.mxu0 %v8243_v50 }
 0x232   : > { %7313 = vmatprep.subr.msk.mxu0 %vm974_vm1, %v1208_v54 }
 0x235   : > { %7314 = vmatpush3.msk.msra.mxu0 %vm974_vm1, %v1208_v54  ;;  %vm3847_vm1 = vcmask 72704  }
 0x236   : > { %7316 = vmatmul.mubr.msk.f32.vlgmr.msra.gmra.mrb[6].mxu0 %vm964_vm2, %v1210_v8  ;;  %8256 = vmatprep.subr.bf16.mxu0 %v8255_v7  ;;  %v6354_v8 = vld [vmem:[%s8876_s3 + $0x60] sm:$0xff] }
 0x237   : > { %7318 = vmatprep.mubr.msk.f32.mxu0 %vm964_vm2, %v1211_v57  ;;  %8258 = vmatpush3.bf16.msra.mxu0 %v8255_v7 }
 0x238   : > { %8260 = vmatprep.subr.bf16.mxu0 %v8259_v58 }
 0x23a   : > { %7319 = vmatmul.mubr.msk.f32.gmra.mrb[8].mxu0 %vm964_vm2, %v1212_v12  ;;  %v6355_v12 = vld [vmem:[%s8876_s3 + $0x68] sm:$0xff] }
 0x23b   : > { %7321 = vmatprep.mubr.msk.f32.mxu0 %vm964_vm2, %v1213_v59  ;;  %8262 = vmatpush3.bf16.msra.mxu0 %v8259_v58 }
 0x23c   : > { %7357 = vmatprep.subr.mxu0 %v6366_v2 }
 0x23e   : > { %7322 = vmatmul.mubr.msk.f32.gmra.mrb[10].mxu0 %vm964_vm2, %v1214_v60  ;;  %v6356_v60 = vld [vmem:[%s8876_s3 + $0x70] sm:$0xff] }
 0x23f   : > { %7324 = vmatprep.mubr.msk.f32.mxu0 %vm964_vm2, %v1215_v61  ;;  %7358 = vmatpush3.msra.mxu0 %v6366_v2 }
 0x240   : > { %8300 = vmatprep.subr.bf16.mxu0 %v8299_v5 }
 0x242   : > { %7325 = vmatmul.mubr.msk.f32.gmra.mrb[12].mxu0 %vm964_vm2, %v1216_v62  ;;  %vm5319_vm2 = vcmask 31744  }
 0x309   : > { %v7317_v10 = vpop.f32.mrb[6].mxu0 }
 0x30a   : > { %v1310_v11 = vpop.f32.mrb[7].mxu0 }
 0x30b   : > { %7337 = vmatprep.mubr.msk.f32.mxu1 %vm1091_vm3, %v1310_v11  ;;  %7359 = vmatprep.mubr.msk.f32.mxu0 %vm1091_vm3, %v1310_v11 }
 0x30c   : > { %7338 = vmatmul.mubr.msk.f32.vlgmr.msra.gmra.mrb[6].mxu1 %vm1091_vm3, %v7317_v10  ;;  %7360 = vmatmul.mubr.msk.f32.vlgmr.msra.gmra.mrb[14].mxu0 %vm1091_vm3, %v7317_v10 }
 0x30d   : > { %v7320_v14 = vpop.f32.mrb[8].mxu0  ;;  %8302 = vmatpush3.bf16.msra.mxu0 %v8299_v5 }
 0x30e   : > { %v1320_v15 = vpop.f32.mrb[9].mxu0  ;;  %8304 = vmatprep.subr.bf16.mxu0 %v8303_v13 }
 0x30f   : > { %7340 = vmatprep.mubr.msk.f32.mxu1 %vm1091_vm3, %v1320_v15  ;;  %7362 = vmatprep.mubr.msk.f32.mxu0 %vm1091_vm3, %v1320_v15 }
 0x310   : > { %7341 = vmatmul.mubr.msk.f32.gmra.mrb[8].mxu1 %vm1091_vm3, %v7320_v14  ;;  %7363 = vmatmul.mubr.msk.f32.gmra.mrb[16].mxu0 %vm1091_vm3, %v7320_v14 }
 0x311   : > { %v7323_v19 = vpop.f32.mrb[10].mxu0  ;;  %8306 = vmatpush3.bf16.msra.mxu0 %v8303_v13 }
 0x312   : > { %v1330_v20 = vpop.f32.mrb[11].mxu0  ;;  %7441 = vmatprep.subr.mxu0 %v6411_v16 }
 0x313   : > { %7343 = vmatprep.mubr.msk.f32.mxu1 %vm1091_vm3, %v1330_v20  ;;  %7365 = vmatprep.mubr.msk.f32.mxu0 %vm1091_vm3, %v1330_v20 }
 0x314   : > { %7344 = vmatmul.mubr.msk.f32.gmra.mrb[10].mxu1 %vm1091_vm3, %v7323_v19  ;;  %7366 = vmatmul.mubr.msk.f32.gmra.mrb[18].mxu0 %vm1091_vm3, %v7323_v19 }
 0x315   : > { %v7326_v22 = vpop.f32.mrb[12].mxu0  ;;  %7442 = vmatpush3.msra.mxu0 %v6411_v16  ;;  %v1349_v16 = vld [vmem:[%s8876_s3] sm:$0xff] }
 0x316   : > { %v1340_v23 = vpop.f32.mrb[13].mxu0  ;;  %8326 = vmatprep.subr.bf16.mxu0 %v8325_v21 }
 0x317   : > { %7346 = vmatprep.mubr.msk.f32.mxu1 %vm1091_vm3, %v1340_v23  ;;  %7368 = vmatprep.mubr.msk.f32.mxu0 %vm1091_vm3, %v1340_v23 }
 0x318   : > { %7347 = vmatmul.mubr.msk.f32.gmra.mrb[12].mxu1 %vm1091_vm3, %v7326_v22  ;;  %7369 = vmatmul.mubr.msk.f32.gmra.mrb[20].mxu0 %vm1091_vm3, %v7326_v22 }
 0x319   : > { %7443 = vmatprep.mubr.msk.f32.mxu0 %vm1091_vm3, %v1310_v11  ;;  %7387 = vmatprep.mubr.msk.f32.mxu1 %vm1615_vm5, %v6352_v28 }
 0x31c   : > { %7444 = vmatmul.mubr.msk.f32.vlgmr.msra.gmra.mrb[22].mxu0 %vm1091_vm3, %v7317_v10 }
 0x31d   : > { %7446 = vmatprep.mubr.msk.f32.mxu0 %vm1091_vm3, %v1320_v15  ;;  %8328 = vmatpush3.bf16.msra.mxu0 %v8325_v21  ;;  %v1351_v21 = vld [vmem:[%s8876_s3 + $0x10] sm:$0xff] }
 0x31e   : > { %8330 = vmatprep.subr.bf16.mxu0 %v8329_v26 }
 0x320   : > { %7447 = vmatmul.mubr.msk.f32.gmra.mrb[24].mxu0 %vm1091_vm3, %v7320_v14 }
 0x321   : > { %7449 = vmatprep.mubr.msk.f32.mxu0 %vm1091_vm3, %v1330_v20  ;;  %8332 = vmatpush3.bf16.msra.mxu0 %v8329_v26  ;;  %v1353_v26 = vld [vmem:[%s8876_s3 + $0x20] sm:$0xff] }
 0x322   : > { %7494 = vmatprep.subr.mxu0 %v6445_v27 }
 0x324   : > { %7450 = vmatmul.mubr.msk.f32.gmra.mrb[26].mxu0 %vm1091_vm3, %v7323_v19 }
 0x325   : > { %7452 = vmatprep.mubr.msk.f32.mxu0 %vm1091_vm3, %v1340_v23  ;;  %7495 = vmatpush3.msra.mxu0 %v6445_v27 }
 0x328   : > { %7453 = vmatmul.mubr.msk.f32.gmra.mrb[28].mxu0 %vm1091_vm3, %v7326_v22 }
 0x329   : > { %7496 = vmatprep.mubr.msk.f32.mxu0 %vm1091_vm3, %v1310_v11 }
 0x32c   : > { %7497 = vmatmul.mubr.msk.f32.vlgmr.msra.gmra.mrb[30].mxu0 %vm1091_vm3, %v7317_v10  ;;  %v6360_v10 = vld [vmem:[%s8876_s3 + $0x90] sm:$0xff] }
 0x32d   : > { %7499 = vmatprep.mubr.msk.f32.mxu0 %vm1091_vm3, %v1320_v15 }
 0x330   : > { %7500 = vmatmul.mubr.msk.f32.gmra.mrb[32].mxu0 %vm1091_vm3, %v7320_v14  ;;  %v6361_v14 = vld [vmem:[%s8876_s3 + $0x98] sm:$0xf] }
 0x331   : > { %7502 = vmatprep.mubr.msk.f32.mxu0 %vm1091_vm3, %v1330_v20 }
 0x334   : > { %7503 = vmatmul.mubr.msk.f32.gmra.mrb[34].mxu0 %vm1091_vm3, %v7323_v19  ;;  %v1350_v19 = vld [vmem:[%s8876_s3 + $0x8] sm:$0xff] }
 0x335   : > { %7505 = vmatprep.mubr.msk.f32.mxu0 %vm1091_vm3, %v1340_v23 }
 0x338   : > { %7506 = vmatmul.mubr.msk.f32.gmra.mrb[36].mxu0 %vm1091_vm3, %v7326_v22  ;;  %vm5565_vm3 = vcmask 523264  }
 0x3df   : > { %v7339_v29 = vpop.f32.mrb[6].mxu1  ;;  %v7361_v30 = vpop.f32.mrb[14].mxu0 }
 0x3e0   : > { %v1454_v31 = vpop.f32.mrb[7].mxu1  ;;  %v1576_v32 = vpop.f32.mrb[15].mxu0 }
 0x3e1   : > { %v8281_v33 = vpack.c.bf16 %v7339_v29, %v1454_v31  ;;  %v8263_v34 = vpack.c.bf16 %v7361_v30, %v1576_v32  ;;  %v1354_v29 = vld [vmem:[%s8876_s3 + $0x28] sm:$0xff]  ;;  %v1355_v31 = vld [vmem:[%s8876_s3 + $0x30] sm:$0xff]  ;;  %v1356_v32 = vld [vmem:[%s8876_s3 + $0x38] sm:$0xff] }
 0x3e3   : > { %v7342_v35 = vpop.f32.mrb[8].mxu1  ;;  %v7364_v36 = vpop.f32.mrb[16].mxu0  ;;  %8264 = vmatprep.subr.bf16.mxu1 %v8263_v34 }
 0x3e4   : > { %v1464_v37 = vpop.f32.mrb[9].mxu1  ;;  %v1586_v38 = vpop.f32.mrb[17].mxu0  ;;  %8266 = vmatpush3.bf16.msra.mxu1 %v8263_v34  ;;  %v1358_v34 = vld [vmem:[%s8876_s3 + $0x48] sm:$0xf] }
 0x3e5   : > { %v8285_v39 = vpack.c.bf16 %v7342_v35, %v1464_v37  ;;  %v8267_v40 = vpack.c.bf16 %v7364_v36, %v1586_v38  ;;  %v6397_v35 = vld [vmem:[%s8876_s3 + $0xa0] sm:$0xff]  ;;  %v6398_v36 = vld [vmem:[%s8876_s3 + $0xa8] sm:$0xff]  ;;  %v6399_v37 = vld [vmem:[%s8876_s3 + $0xb0] sm:$0xff] }
 0x3e6   : > { %v6400_v38 = vld [vmem:[%s8876_s3 + $0xb8] sm:$0xff] }
 0x3e7   : > { %v7345_v41 = vpop.f32.mrb[10].mxu1  ;;  %v7367_v42 = vpop.f32.mrb[18].mxu0  ;;  %8268 = vmatprep.subr.bf16.mxu1 %v8267_v40 }
 0x3e8   : > { %v1474_v43 = vpop.f32.mrb[11].mxu1  ;;  %v1596_v44 = vpop.f32.mrb[19].mxu0  ;;  %8270 = vmatpush3.bf16.msra.mxu1 %v8267_v40  ;;  %v6402_v40 = vld [vmem:[%s8876_s3 + $0xc8] sm:$0xff] }
 0x3e9   : > { %v8289_v45 = vpack.c.bf16 %v7345_v41, %v1474_v43  ;;  %v8271_v46 = vpack.c.bf16 %v7367_v42, %v1596_v44  ;;  %v6403_v41 = vld [vmem:[%s8876_s3 + $0xd0] sm:$0xff]  ;;  %v6404_v42 = vld [vmem:[%s8876_s3 + $0xd8] sm:$0xff]  ;;  %v6405_v43 = vld [vmem:[%s8876_s3 + $0xe0] sm:$0xff] }
 0x3ea   : > { %v6406_v44 = vld [vmem:[%s8876_s3 + $0xe8] sm:$0xf] }
 0x3eb   : > { %v7348_v47 = vpop.f32.mrb[12].mxu1  ;;  %v7370_v48 = vpop.f32.mrb[20].mxu0  ;;  %8272 = vmatprep.subr.bf16.mxu1 %v8271_v46 }
 0x3ec   : > { %v1484_v49 = vpop.f32.mrb[13].mxu1  ;;  %v1606_v50 = vpop.f32.mrb[21].mxu0  ;;  %8274 = vmatpush3.bf16.msra.mxu1 %v8271_v46  ;;  %v6432_v46 = vld [vmem:[%s8876_s3 + $0xf8] sm:$0xff] }
 0x3ed   : > { %v8293_v52 = vpack.c.bf16 %v7348_v47, %v1484_v49  ;;  %v8275_v53 = vpack.c.bf16 %v7370_v48, %v1606_v50  ;;  %v6433_v47 = vld [vmem:[%s8876_s3 + $0x100] sm:$0xff]  ;;  %v6434_v48 = vld [vmem:[%s8876_s3 + $0x108] sm:$0xff]  ;;  %v6435_v49 = vld [vmem:[%s8876_s3 + $0x110] sm:$0xff] }
 0x3ee   : > { %v6436_v50 = vld [vmem:[%s8876_s3 + $0x118] sm:$0xff] }
 0x3ef   : > { %8277 = vmatprep.subr.msk.bf16.mxu1 %vm9157_vm8, %v8275_v53  ;;  %v7445_v54 = vpop.f32.mrb[22].mxu0 }
 0x3f0   : > { %8280 = vmatpush3.bf16.msk.msra.mxu1 %vm9157_vm8, %v8275_v53  ;;  %v1996_v55 = vpop.f32.mrb[23].mxu0  ;;  %v6438_v53 = vld [vmem:[%s8876_s3 + $0x128] sm:$0xff] }
 0x3f1   : > { %v8307_v7 = vpack.c.bf16 %v7445_v54, %v1996_v55  ;;  %8282 = vmatprep.subr.bf16.mxu1 %v8281_v33  ;;  %v6439_v54 = vld [vmem:[%s8876_s3 + $0x130] sm:$0xff]  ;;  %v6440_v55 = vld [vmem:[%s8876_s3 + $0x138] sm:$0xf] }
 0x3f3   : > { %7388 = vmatmul.mubr.msk.f32.vlgmr.msra.gmra.mrb[14].mxu1 %vm1615_vm5, %v6353_v56  ;;  %v7448_v57 = vpop.f32.mrb[24].mxu0  ;;  %v2553_v56 = vld [vmem:[%s8886_s14] sm:$0xff] }
 0x3f4   : > { %8284 = vmatpush3.bf16.msra.mxu1 %v8281_v33  ;;  %v2006_v58 = vpop.f32.mrb[25].mxu0  ;;  %7390 = vmatprep.mubr.msk.f32.mxu1 %vm1615_vm5, %v6354_v8  ;;  %v1357_v33 = vld [vmem:[%s8876_s3 + $0x40] sm:$0xff] }
 0x3f5   : > { %v8311_v59 = vpack.c.bf16 %v7448_v57, %v2006_v58  ;;  %8286 = vmatprep.subr.bf16.mxu1 %v8285_v39  ;;  %7559 = vmatprep.mubr.msk.f32.mxu0 %vm2567_vm9, %v2553_v56  ;;  %v6505_v8 = vld [vmem:[%s8891_s19 + $0x20] sm:$0xff]  ;;  %v2491_v58 = vpop.permute.xlu0 %2490  ;;  %v2562_v56 = vld [vmem:[%s8886_s14 + $0x48] sm:$0xff] }
 0x3f7   : > { %7391 = vmatmul.mubr.msk.f32.gmra.mrb[16].mxu1 %vm1615_vm5, %v6355_v12  ;;  %v7451_v61 = vpop.f32.mrb[26].mxu0  ;;  %v2486_v12 = vpop.permute.xlu1 %2485 }
 0x3f8   : > { %8288 = vmatpush3.bf16.msra.mxu1 %v8285_v39  ;;  %v2016_v62 = vpop.f32.mrb[27].mxu0  ;;  %7393 = vmatprep.mubr.msk.f32.mxu1 %vm1615_vm5, %v6356_v60  ;;  %v6401_v39 = vld [vmem:[%s8876_s3 + $0xc0] sm:$0xff] }
 0x3f9   : > { %v8315_v2 = vpack.c.bf16 %v7451_v61, %v2016_v62  ;;  %8290 = vmatprep.subr.bf16.mxu1 %v8289_v45 }
 0x3fb   : > { %7394 = vmatmul.mubr.msk.f32.gmra.mrb[18].mxu1 %vm1615_vm5, %v6357_v63  ;;  %v7454_v4 = vpop.f32.mrb[28].mxu0  ;;  %v2496_v60 = vpop.permute.xlu1 %2495 }
 0x3fc   : > { %8292 = vmatpush3.bf16.msra.mxu1 %v8289_v45  ;;  %v2026_v5 = vpop.f32.mrb[29].mxu0  ;;  %7396 = vmatprep.mubr.msk.f32.mxu1 %vm1615_vm5, %v6358_v3  ;;  %v6431_v45 = vld [vmem:[%s8876_s3 + $0xf0] sm:$0xff] }
 0x3fd   : > { %v8319_v9 = vpack.c.bf16 %v7454_v4, %v2026_v5  ;;  %8295 = vmatprep.subr.msk.bf16.mxu1 %vm9157_vm8, %v8293_v52 }
 0x3ff   : > { %7397 = vmatmul.mubr.msk.f32.gmra.mrb[20].mxu1 %vm1615_vm5, %v6359_v6  ;;  %v7498_v11 = vpop.f32.mrb[30].mxu0 }
 0x400   : > { %8298 = vmatpush3.bf16.msk.msra.mxu1 %vm9157_vm8, %v8293_v52  ;;  %v2276_v13 = vpop.f32.mrb[31].mxu0  ;;  %7399 = vmatprep.mubr.msk.f32.mxu1 %vm1615_vm5, %v6360_v10  ;;  %v6437_v52 = vld [vmem:[%s8876_s3 + $0x120] sm:$0xff] }
 0x401   : > { %v8333_v15 = vpack.c.bf16 %v7498_v11, %v2276_v13  ;;  %8308 = vmatprep.subr.bf16.mxu1 %v8307_v7 }
 0x403   : > { %7400 = vmatmul.mubr.msk.f32.gmra.mrb[22].mxu1 %vm1615_vm5, %v6361_v14  ;;  %v7501_v17 = vpop.f32.mrb[32].mxu0 }
 0x404   : > { %v2286_v18 = vpop.f32.mrb[33].mxu0  ;;  %7418 = vmatprep.mubr.msk.f32.mxu1 %vm1615_vm5, %v1349_v16 }
 0x405   : > { %v8337_v20 = vpack.c.bf16 %v7501_v17, %v2286_v18 }
 0x407   : > { %7419 = vmatmul.mubr.msk.f32.vlgmr.msra.gmra.mrb[14].mxu1 %vm1615_vm5, %v1350_v19  ;;  %v7504_v22 = vpop.f32.mrb[34].mxu0 }
 0x408   : > { %8310 = vmatpush3.bf16.msra.mxu1 %v8307_v7  ;;  %v2296_v23 = vpop.f32.mrb[35].mxu0  ;;  %7421 = vmatprep.mubr.msk.f32.mxu1 %vm1615_vm5, %v1351_v21  ;;  %v6504_v7 = vld [vmem:[%s8891_s19 + $0x18] sm:$0xff] }
 0x409   : > { %8312 = vmatprep.subr.bf16.mxu1 %v8311_v59  ;;  %v8341_v25 = vpack.c.bf16 %v7504_v22, %v2296_v23  ;;  %v8377_v57 = vpack.c.bf16 %v6505_v8, %v6504_v7  ;;  %v2563_v7 = vld [vmem:[%s8886_s14 + $0x50] sm:$0xff]  ;;  %v2564_v8 = vld [vmem:[%s8886_s14 + $0x58] sm:$0xff] }
 0x40b   : > { %7422 = vmatmul.mubr.msk.f32.gmra.mrb[16].mxu1 %vm1615_vm5, %v1352_v24  ;;  %v7507_v27 = vpop.f32.mrb[36].mxu0 }
 0x40c   : > { %8314 = vmatpush3.bf16.msra.mxu1 %v8311_v59  ;;  %v2306_v28 = vpop.f32.mrb[37].mxu0  ;;  %7424 = vmatprep.mubr.msk.f32.mxu1 %vm1615_vm5, %v1353_v26  ;;  %v2501_v59 = vpop.permute.xlu0 %2500 }
 0x40d   : > { %8316 = vmatprep.subr.bf16.mxu1 %v8315_v2  ;;  %v8345_v30 = vpack.c.bf16 %v7507_v27, %v2306_v28 }
 0x40f   : > { %7425 = vmatmul.mubr.msk.f32.gmra.mrb[18].mxu1 %vm1615_vm5, %v1354_v29 }
 0x410   : > { %8318 = vmatpush3.bf16.msra.mxu1 %v8315_v2  ;;  %7427 = vmatprep.mubr.msk.f32.mxu1 %vm1615_vm5, %v1355_v31  ;;  %v2511_v4 = vpop.permute.xlu0 %2510 }
 0x411   : > { %8321 = vmatprep.subr.msk.bf16.mxu1 %vm9157_vm8, %v8319_v9 }
 0x413   : > { %7428 = vmatmul.mubr.msk.f32.gmra.mrb[20].mxu1 %vm1615_vm5, %v1356_v32 }
 0x414   : > { %8324 = vmatpush3.bf16.msk.msra.mxu1 %vm9157_vm8, %v8319_v9  ;;  %7430 = vmatprep.mubr.msk.f32.mxu1 %vm1615_vm5, %v1357_v33  ;;  %v2506_v9 = vpop.permute.xlu1 %2505 }
 0x415   : > { %8334 = vmatprep.subr.bf16.mxu1 %v8333_v15 }
 0x417   : > { %7431 = vmatmul.mubr.msk.f32.gmra.mrb[22].mxu1 %vm1615_vm5, %v1358_v34 }
 0x418   : > { %7471 = vmatprep.mubr.msk.f32.mxu1 %vm1615_vm5, %v6397_v35  ;;  %v2516_v23 = vpop.permute.xlu1 %2515 }
 0x41b   : > { %7472 = vmatmul.mubr.msk.f32.vlgmr.msra.gmra.mrb[14].mxu1 %vm1615_vm5, %v6398_v36 }
 0x41c   : > { %8336 = vmatpush3.bf16.msra.mxu1 %v8333_v15  ;;  %7474 = vmatprep.mubr.msk.f32.mxu1 %vm1615_vm5, %v6399_v37  ;;  %v2526_v35 = vpop.permute.xlu1 %2525 }
 0x41d   : > { %8338 = vmatprep.subr.bf16.mxu1 %v8337_v20 }
 0x41f   : > { %7475 = vmatmul.mubr.msk.f32.gmra.mrb[16].mxu1 %vm1615_vm5, %v6400_v38 }
 0x420   : > { %8340 = vmatpush3.bf16.msra.mxu1 %v8337_v20  ;;  %7477 = vmatprep.mubr.msk.f32.mxu1 %vm1615_vm5, %v6401_v39  ;;  %v2521_v20 = vpop.permute.xlu0 %2520 }
 0x421   : > { %8342 = vmatprep.subr.bf16.mxu1 %v8341_v25 }
 0x423   : > { %7478 = vmatmul.mubr.msk.f32.gmra.mrb[18].mxu1 %vm1615_vm5, %v6402_v40 }
 0x424   : > { %8344 = vmatpush3.bf16.msra.mxu1 %v8341_v25  ;;  %7480 = vmatprep.mubr.msk.f32.mxu1 %vm1615_vm5, %v6403_v41  ;;  %v2531_v32 = vpop.permute.xlu0 %2530  ;;  %v2758_v41 = vld [vmem:[%s8891_s19] sm:$0xff] }
 0x425   : > { %8347 = vmatprep.subr.msk.bf16.mxu1 %vm9157_vm8, %v8345_v30 }
 0x427   : > { %7481 = vmatmul.mubr.msk.f32.gmra.mrb[20].mxu1 %vm1615_vm5, %v6404_v42  ;;  %v2759_v42 = vld [vmem:[%s8891_s19 + $0x8] sm:$0xff] }
 0x428   : > { %8350 = vmatpush3.bf16.msk.msra.mxu1 %vm9157_vm8, %v8345_v30  ;;  %7483 = vmatprep.mubr.msk.f32.mxu1 %vm1615_vm5, %v6405_v43 }
 0x429   : > { %8378 = vmatprep.subr.bf16.mxu1 %v8377_v57 }
 0x42b   : > { %7484 = vmatmul.mubr.msk.f32.gmra.mrb[22].mxu1 %vm1615_vm5, %v6406_v44  ;;  %v6545_v44 = vld [vmem:[%s10017_s16 + $0xa8] sm:$0xff] }
 0x42c   : > { %7524 = vmatprep.mubr.msk.f32.mxu1 %vm1615_vm5, %v6431_v45 }
 0x42f   : > { %7525 = vmatmul.mubr.msk.f32.vlgmr.msra.gmra.mrb[14].mxu1 %vm1615_vm5, %v6432_v46  ;;  %v8373_v46 = vpack.c.bf16 %v2759_v42, %v2758_v41 }
 0x430   : > { %7527 = vmatprep.mubr.msk.f32.mxu1 %vm1615_vm5, %v6433_v47  ;;  %8380 = vmatpush3.bf16.msra.mxu1 %v8377_v57  ;;  %v2554_v47 = vld [vmem:[%s8886_s14 + $0x8] sm:$0xff]  ;;  %v2565_v57 = vld [vmem:[%s8886_s14 + $0x60] sm:$0xff] }
 0x433   : > { %7528 = vmatmul.mubr.msk.f32.gmra.mrb[16].mxu1 %vm1615_vm5, %v6434_v48  ;;  %v2555_v48 = vld [vmem:[%s8886_s14 + $0x10] sm:$0xff] }
 0x434   : > { %7530 = vmatprep.mubr.msk.f32.mxu1 %vm1615_vm5, %v6435_v49  ;;  %v2556_v49 = vld [vmem:[%s8886_s14 + $0x18] sm:$0xff] }
 0x437   : > { %7531 = vmatmul.mubr.msk.f32.gmra.mrb[18].mxu1 %vm1615_vm5, %v6436_v50  ;;  %v2557_v50 = vld [vmem:[%s8886_s14 + $0x20] sm:$0xff] }
 0x438   : > { %7533 = vmatprep.mubr.msk.f32.mxu1 %vm1615_vm5, %v6437_v52  ;;  %v2558_v52 = vld [vmem:[%s8886_s14 + $0x28] sm:$0xff] }
 0x43b   : > { %7534 = vmatmul.mubr.msk.f32.gmra.mrb[20].mxu1 %vm1615_vm5, %v6438_v53  ;;  %v2559_v53 = vld [vmem:[%s8886_s14 + $0x30] sm:$0xff] }
 0x43c   : > { %7536 = vmatprep.mubr.msk.f32.mxu1 %vm1615_vm5, %v6439_v54  ;;  %v2560_v54 = vld [vmem:[%s8886_s14 + $0x38] sm:$0xff] }
 0x43f   : > { %7537 = vmatmul.mubr.msk.f32.gmra.mrb[22].mxu1 %vm1615_vm5, %v6440_v55  ;;  %v2561_v55 = vld [vmem:[%s8886_s14 + $0x40] sm:$0xff] }
 0x502   : > { %v7526_v61 = vpop.f32.mrb[14].mxu1 }
 0x503   : > { %v2534_v62 = vadd.f32 %v7526_v61, %v2491_v58  ;;  %v2414_v63 = vpop.f32.mrb[15].mxu1  ;;  %v2566_v58 = vld [vmem:[%s8886_s14 + $0x68] sm:$0xf] }
 0x504   : > { %v2533_v2 = vadd.f32 %v2486_v12, %v2414_v63  ;;  %v2760_v12 = vld [vmem:[%s8891_s19 + $0x10] sm:$0x7] }
 0x505   : > { %v2544_v3 = vmax.f32 %v2534_v62, 0.0 }
 0x506   : > { %v2543_v5 = vmax.f32 %v2533_v2, 0.0  ;;  %v7529_v6 = vpop.f32.mrb[16].mxu1 }
 0x507   : > { %v2536_v10 = vadd.f32 %v7529_v6, %v2501_v59  ;;  %v2424_v11 = vpop.f32.mrb[17].mxu1  ;;  %v6506_v59 = vld [vmem:[%s8891_s19 + $0x28] sm:$0x7] }
 0x508   : > { %v8351_v13 = vpack.c.bf16 %v2544_v3, %v2543_v5  ;;  %v2535_v14 = vadd.f32 %v2496_v60, %v2424_v11  ;;  %7611 = vmatprep.subr.msk.mxu1 %vm2804_vm12, %v6506_v59 }
 0x509   : > { %v2546_v15 = vmax.f32 %v2536_v10, 0.0  ;;  %7612 = vmatpush3.msk.msra.mxu1 %vm2804_vm12, %v6506_v59  ;;  %v6495_v59 = vld [vmem:[%s10017_s16 + $0x48] sm:$0xff] }
 0x50a   : > { %v2545_v16 = vmax.f32 %v2535_v14, 0.0  ;;  %v7532_v17 = vpop.f32.mrb[18].mxu1  ;;  %8352 = vmatprep.subr.bf16.mxu0 %v8351_v13  ;;  %8403 = vmatprep.subr.bf16.mxu1 %v8828_v0 }
 0x50b   : > { %v2538_v18 = vadd.f32 %v7532_v17, %v2511_v4  ;;  %v2434_v19 = vpop.f32.mrb[19].mxu1  ;;  %8354 = vmatpush3.bf16.msra.mxu0 %v8351_v13 }
 0x50c   : > { %v8355_v21 = vpack.c.bf16 %v2546_v15, %v2545_v16  ;;  %v2537_v22 = vadd.f32 %v2506_v9, %v2434_v19 }
 0x50d   : > { %v2548_v24 = vmax.f32 %v2538_v18, 0.0 }
 0x50e   : > { %v2547_v25 = vmax.f32 %v2537_v22, 0.0  ;;  %v7535_v26 = vpop.f32.mrb[20].mxu1  ;;  %8356 = vmatprep.subr.bf16.mxu0 %v8355_v21 }
 0x50f   : > { %v2540_v27 = vadd.f32 %v7535_v26, %v2521_v20  ;;  %v2444_v28 = vpop.f32.mrb[21].mxu1  ;;  %8358 = vmatpush3.bf16.msra.mxu0 %v8355_v21 }
 0x510   : > { %v8359_v29 = vpack.c.bf16 %v2548_v24, %v2547_v25  ;;  %v2539_v30 = vadd.f32 %v2516_v23, %v2444_v28 }
 0x511   : > { %v2550_v31 = vmax.f32 %v2540_v27, 0.0 }
 0x512   : > { %v2549_v33 = vmax.f32 %v2539_v30, 0.0  ;;  %v7538_v34 = vpop.f32.mrb[22].mxu1  ;;  %8360 = vmatprep.subr.bf16.mxu0 %v8359_v29 }
 0x513   : > { %v2542_v36 = vadd.f32 %v7538_v34, %v2531_v32  ;;  %v2454_v37 = vpop.f32.mrb[23].mxu1  ;;  %8362 = vmatpush3.bf16.msra.mxu0 %v8359_v29 }
 0x514   : > { %v8363_v38 = vpack.c.bf16 %v2550_v31, %v2549_v33  ;;  %v2541_v39 = vadd.f32 %v2526_v35, %v2454_v37 }
 0x515   : > { %v2552_v40 = vmax.f32 %v2542_v36, 0.0 }
 0x516   : > { %v2551_v43 = vmax.f32 %v2541_v39, 0.0  ;;  %8364 = vmatprep.subr.bf16.mxu0 %v8363_v38 }
 0x517   : > { %8366 = vmatpush3.bf16.msra.mxu0 %v8363_v38 }
 0x518   : > { %v8367_v45 = vpack.c.bf16 %v2552_v40, %v2551_v43 }
 0x51a   : > { %8369 = vmatprep.subr.msk.bf16.mxu0 %vm9263_vm11, %v8367_v45 }
 0x51b   : > { %8372 = vmatpush3.bf16.msk.msra.mxu0 %vm9263_vm11, %v8367_v45 }
 0x51c   : > { %8374 = vmatprep.subr.bf16.mxu0 %v8373_v46 }
 0x51e   : > { %7560 = vmatmul.mubr.msk.f32.vlgmr.msra.gmra.mrb[38].mxu0 %vm2567_vm9, %v2554_v47 }
 0x51f   : > { %7562 = vmatprep.mubr.msk.f32.mxu0 %vm2567_vm9, %v2555_v48  ;;  %8376 = vmatpush3.bf16.msra.mxu0 %v8373_v46 }
 0x520   : > { %7584 = vmatprep.subr.msk.mxu0 %vm2804_vm12, %v2760_v12 }
 0x522   : > { %7563 = vmatmul.mubr.msk.f32.gmra.mrb[40].mxu0 %vm2567_vm9, %v2556_v49 }
 0x523   : > { %7565 = vmatprep.mubr.msk.f32.mxu0 %vm2567_vm9, %v2557_v50  ;;  %7585 = vmatpush3.msk.msra.mxu0 %vm2804_vm12, %v2760_v12 }
 0x524   : > { %8381 = vmatprep.subr.bf16.mxu0 %v8828_v0 }
 0x526   : > { %7566 = vmatmul.mubr.msk.f32.gmra.mrb[42].mxu0 %vm2567_vm9, %v2558_v52 }
 0x527   : > { %7568 = vmatprep.mubr.msk.f32.mxu0 %vm2567_vm9, %v2559_v53  ;;  %v6551_v53 = vld [vmem:[%s8891_s19 + $0x30] sm:$0xff] }
 0x52a   : > { %7569 = vmatmul.mubr.msk.f32.gmra.mrb[44].mxu0 %vm2567_vm9, %v2560_v54  ;;  %v6552_v54 = vld [vmem:[%s8891_s19 + $0x38] sm:$0xff] }
 0x52b   : > { %7571 = vmatprep.mubr.msk.f32.mxu0 %vm2567_vm9, %v2561_v55 }
 0x52e   : > { %7572 = vmatmul.mubr.msk.f32.gmra.mrb[46].mxu0 %vm2567_vm9, %v2562_v56 }
 0x52f   : > { %7574 = vmatprep.mubr.msk.f32.mxu0 %vm2567_vm9, %v2563_v7 }
 0x532   : > { %7575 = vmatmul.mubr.msk.f32.gmra.mrb[48].mxu0 %vm2567_vm9, %v2564_v8 }
 0x533   : > { %7577 = vmatprep.mubr.msk.f32.mxu0 %vm2567_vm9, %v2565_v57  ;;  %v8425_v57 = vpack.c.bf16 %v6552_v54, %v6551_v53 }
 0x536   : > { %7578 = vmatmul.mubr.msk.f32.gmra.mrb[50].mxu0 %vm2567_vm9, %v2566_v58 }
 0x5f1   : > { %v9305_v60 = vpop.f32.mrb[38].mxu0 }
 0x5f2   : > { %v9307_v61 = vpop.f32.mrb[39].mxu0 }
 0x5f3   : > { %7586 = vmatprep.mubr.msk.f32.mxu0 %vm2761_vm13, %v9307_v61  ;;  %7613 = vmatprep.mubr.msk.f32.mxu1 %vm2761_vm13, %v9307_v61 }
 0x5f4   : > { %7587 = vmatmul.mubr.msk.f32.vlgmr.msra.gmra.mrb[52].mxu0 %vm2761_vm13, %v9305_v60  ;;  %7614 = vmatmul.mubr.msk.f32.vlgmr.msra.gmra.mrb[24].mxu1 %vm2761_vm13, %v9305_v60 }
 0x5f5   : > { %v9317_v62 = vpop.f32.mrb[40].mxu0 }
 0x5f6   : > { %v9319_v63 = vpop.f32.mrb[41].mxu0 }
 0x5f7   : > { %7589 = vmatprep.mubr.msk.f32.mxu0 %vm2761_vm13, %v9319_v63  ;;  %7616 = vmatprep.mubr.msk.f32.mxu1 %vm2761_vm13, %v9319_v63 }
 0x5f8   : > { %7590 = vmatmul.mubr.msk.f32.gmra.mrb[54].mxu0 %vm2761_vm13, %v9317_v62  ;;  %7617 = vmatmul.mubr.msk.f32.gmra.mrb[26].mxu1 %vm2761_vm13, %v9317_v62 }
 0x5f9   : > { %v9329_v2 = vpop.f32.mrb[42].mxu0 }
 0x5fa   : > { %v9331_v3 = vpop.f32.mrb[43].mxu0 }
 0x5fb   : > { %7592 = vmatprep.mubr.msk.f32.mxu0 %vm2761_vm13, %v9331_v3  ;;  %7619 = vmatprep.mubr.msk.f32.mxu1 %vm2761_vm13, %v9331_v3 }
 0x5fc   : > { %7593 = vmatmul.mubr.msk.f32.gmra.mrb[56].mxu0 %vm2761_vm13, %v9329_v2  ;;  %7620 = vmatmul.mubr.msk.f32.gmra.mrb[28].mxu1 %vm2761_vm13, %v9329_v2 }
 0x5fd   : > { %v9341_v4 = vpop.f32.mrb[44].mxu0 }
 0x5fe   : > { %v9343_v5 = vpop.f32.mrb[45].mxu0 }
 0x5ff   : > { %7595 = vmatprep.mubr.msk.f32.mxu0 %vm2761_vm13, %v9343_v5  ;;  %7622 = vmatprep.mubr.msk.f32.mxu1 %vm2761_vm13, %v9343_v5 }
 0x600   : > { %7596 = vmatmul.mubr.msk.f32.gmra.mrb[58].mxu0 %vm2761_vm13, %v9341_v4  ;;  %7623 = vmatmul.mubr.msk.f32.gmra.mrb[30].mxu1 %vm2761_vm13, %v9341_v4 }
 0x601   : > { %v9353_v6 = vpop.f32.mrb[46].mxu0 }
 0x602   : > { %v9355_v9 = vpop.f32.mrb[47].mxu0 }
 0x603   : > { %7598 = vmatprep.mubr.msk.f32.mxu0 %vm2761_vm13, %v9355_v9  ;;  %7625 = vmatprep.mubr.msk.f32.mxu1 %vm2761_vm13, %v9355_v9 }
 0x604   : > { %7599 = vmatmul.mubr.msk.f32.gmra.mrb[60].mxu0 %vm2761_vm13, %v9353_v6  ;;  %7626 = vmatmul.mubr.msk.f32.gmra.mrb[32].mxu1 %vm2761_vm13, %v9353_v6 }
 0x605   : > { %v9365_v10 = vpop.f32.mrb[48].mxu0 }
 0x606   : > { %v9367_v11 = vpop.f32.mrb[49].mxu0 }
 0x607   : > { %7601 = vmatprep.mubr.msk.f32.mxu0 %vm2761_vm13, %v9367_v11  ;;  %7628 = vmatprep.mubr.msk.f32.mxu1 %vm2761_vm13, %v9367_v11 }
 0x608   : > { %7602 = vmatmul.mubr.msk.f32.gmra.mrb[62].mxu0 %vm2761_vm13, %v9365_v10  ;;  %7629 = vmatmul.mubr.msk.f32.gmra.mrb[34].mxu1 %vm2761_vm13, %v9365_v10 }
 0x609   : > { %v9377_v13 = vpop.f32.mrb[50].mxu0 }
 0x60a   : > { %v9379_v14 = vpop.f32.mrb[51].mxu0 }
 0x60b   : > { %7604 = vmatprep.mubr.msk.f32.mxu0 %vm2761_vm13, %v9379_v14  ;;  %7631 = vmatprep.mubr.msk.f32.mxu1 %vm2761_vm13, %v9379_v14 }
 0x60c   : > { %7605 = vmatmul.mubr.msk.f32.gmra.mrb[64].mxu0 %vm2761_vm13, %v9377_v13  ;;  %7632 = vmatmul.mubr.msk.f32.gmra.mrb[36].mxu1 %vm2761_vm13, %v9377_v13 }
 0x60d   : > { %7662 = vmatprep.mubr.msk.f32.mxu0 %vm8829_vm0, %v8830_v1  ;;  %7717 = vmatprep.mubr.msk.f32.mxu1 %vm8829_vm0, %v8830_v1 }
 0x6c7   : > { %v7588_v15 = vpop.f32.mrb[52].mxu0  ;;  %v7615_v16 = vpop.f32.mrb[24].mxu1 }
 0x6c8   : > { %v2874_v17 = vpop.f32.mrb[53].mxu0  ;;  %v3026_v18 = vpop.f32.mrb[25].mxu1 }
 0x6c9   : > { %v8404_v19 = vpack.c.bf16 %v7588_v15, %v2874_v17  ;;  %v8382_v20 = vpack.c.bf16 %v7615_v16, %v3026_v18  ;;  %v2749_v15 = vld [vmem:[%s10017_s16] sm:$0xff]  ;;  %v6496_v17 = vld [vmem:[%s10017_s16 + $0x50] sm:$0xff]  ;;  %v2750_v18 = vld [vmem:[%s10017_s16 + $0x8] sm:$0xff] }
 0x6ca   : > { %v6553_v16 = vld [vmem:[%s8891_s19 + $0x40] sm:$0x7] }
 0x6cb   : > { %v7591_v21 = vpop.f32.mrb[54].mxu0  ;;  %v7618_v22 = vpop.f32.mrb[26].mxu1  ;;  %8383 = vmatpush3.bf16.msra.mxu0 %v8382_v20  ;;  %8405 = vmatpush3.bf16.msra.mxu1 %v8404_v19  ;;  %v6497_v19 = vld [vmem:[%s10017_s16 + $0x58] sm:$0xff]  ;;  %v2751_v20 = vld [vmem:[%s10017_s16 + $0x10] sm:$0xff] }
 0x6cc   : > { %v2884_v23 = vpop.f32.mrb[55].mxu0  ;;  %v3036_v24 = vpop.f32.mrb[27].mxu1  ;;  %8384 = vmatprep.subr.bf16.mxu0 %v8828_v0  ;;  %8406 = vmatprep.subr.bf16.mxu1 %v8828_v0 }
 0x6cd   : > { %v8407_v25 = vpack.c.bf16 %v7591_v21, %v2884_v23  ;;  %v8385_v26 = vpack.c.bf16 %v7618_v22, %v3036_v24  ;;  %v6498_v21 = vld [vmem:[%s10017_s16 + $0x60] sm:$0xff]  ;;  %v2752_v22 = vld [vmem:[%s10017_s16 + $0x18] sm:$0xff]  ;;  %v6499_v23 = vld [vmem:[%s10017_s16 + $0x68] sm:$0xff] }
 0x6ce   : > { %v2753_v24 = vld [vmem:[%s10017_s16 + $0x20] sm:$0xff] }
 0x6cf   : > { %v7594_v27 = vpop.f32.mrb[56].mxu0  ;;  %v7621_v28 = vpop.f32.mrb[28].mxu1  ;;  %8386 = vmatpush3.bf16.msra.mxu0 %v8385_v26  ;;  %8408 = vmatpush3.bf16.msra.mxu1 %v8407_v25  ;;  %v6500_v25 = vld [vmem:[%s10017_s16 + $0x70] sm:$0xff]  ;;  %v2754_v26 = vld [vmem:[%s10017_s16 + $0x28] sm:$0xff] }
 0x6d0   : > { %v2894_v29 = vpop.f32.mrb[57].mxu0  ;;  %v3046_v30 = vpop.f32.mrb[29].mxu1  ;;  %8387 = vmatprep.subr.bf16.mxu0 %v8828_v0  ;;  %8409 = vmatprep.subr.bf16.mxu1 %v8828_v0 }
 0x6d1   : > { %v8410_v31 = vpack.c.bf16 %v7594_v27, %v2894_v29  ;;  %v8388_v32 = vpack.c.bf16 %v7621_v28, %v3046_v30  ;;  %v6501_v27 = vld [vmem:[%s10017_s16 + $0x78] sm:$0xff]  ;;  %v2755_v28 = vld [vmem:[%s10017_s16 + $0x30] sm:$0xff]  ;;  %v6502_v29 = vld [vmem:[%s10017_s16 + $0x80] sm:$0xff] }
 0x6d2   : > { %v2756_v30 = vld [vmem:[%s10017_s16 + $0x38] sm:$0xff] }
 0x6d3   : > { %v7597_v33 = vpop.f32.mrb[58].mxu0  ;;  %v7624_v34 = vpop.f32.mrb[30].mxu1  ;;  %8389 = vmatpush3.bf16.msra.mxu0 %v8388_v32  ;;  %8411 = vmatpush3.bf16.msra.mxu1 %v8410_v31  ;;  %v6503_v31 = vld [vmem:[%s10017_s16 + $0x88] sm:$0xff]  ;;  %v2757_v32 = vld [vmem:[%s10017_s16 + $0x40] sm:$0xff] }
 0x6d4   : > { %v2904_v35 = vpop.f32.mrb[59].mxu0  ;;  %v3056_v36 = vpop.f32.mrb[31].mxu1  ;;  %8390 = vmatprep.subr.bf16.mxu0 %v8828_v0  ;;  %8412 = vmatprep.subr.bf16.mxu1 %v8828_v0 }
 0x6d5   : > { %v8413_v37 = vpack.c.bf16 %v7597_v33, %v2904_v35  ;;  %v8391_v38 = vpack.c.bf16 %v7624_v34, %v3056_v36 }
 0x6d7   : > { %v7600_v39 = vpop.f32.mrb[60].mxu0  ;;  %v7627_v40 = vpop.f32.mrb[32].mxu1  ;;  %8392 = vmatpush3.bf16.msra.mxu0 %v8391_v38  ;;  %8414 = vmatpush3.bf16.msra.mxu1 %v8413_v37 }
 0x6d8   : > { %v2914_v41 = vpop.f32.mrb[61].mxu0  ;;  %v3066_v42 = vpop.f32.mrb[33].mxu1  ;;  %8393 = vmatprep.subr.bf16.mxu0 %v8828_v0  ;;  %8415 = vmatprep.subr.bf16.mxu1 %v8828_v0 }
 0x6d9   : > { %v8416_v43 = vpack.c.bf16 %v7600_v39, %v2914_v41  ;;  %v8394_v45 = vpack.c.bf16 %v7627_v40, %v3066_v42 }
 0x6db   : > { %v7603_v46 = vpop.f32.mrb[62].mxu0  ;;  %v7630_v47 = vpop.f32.mrb[34].mxu1  ;;  %8395 = vmatpush3.bf16.msra.mxu0 %v8394_v45  ;;  %8417 = vmatpush3.bf16.msra.mxu1 %v8416_v43 }
 0x6dc   : > { %v2924_v48 = vpop.f32.mrb[63].mxu0  ;;  %v3076_v49 = vpop.f32.mrb[35].mxu1  ;;  %8396 = vmatprep.subr.bf16.mxu0 %v8828_v0  ;;  %8418 = vmatprep.subr.bf16.mxu1 %v8828_v0 }
 0x6dd   : > { %v8419_v50 = vpack.c.bf16 %v7603_v46, %v2924_v48  ;;  %v8397_v52 = vpack.c.bf16 %v7630_v47, %v3076_v49 }
 0x6df   : > { %v7606_v55 = vpop.f32.mrb[64].mxu0  ;;  %v7633_v56 = vpop.f32.mrb[36].mxu1  ;;  %8398 = vmatpush3.bf16.msra.mxu0 %v8397_v52  ;;  %8420 = vmatpush3.bf16.msra.mxu1 %v8419_v50 }
 0x6e0   : > { %v2934_v7 = vpop.f32.mrb[65].mxu0  ;;  %v3086_v8 = vpop.f32.mrb[37].mxu1  ;;  %8399 = vmatprep.subr.bf16.mxu0 %v8828_v0  ;;  %8421 = vmatprep.subr.bf16.mxu1 %v8828_v0 }
 0x6e1   : > { %v8422_v58 = vpack.c.bf16 %v7606_v55, %v2934_v7  ;;  %v8400_v12 = vpack.c.bf16 %v7633_v56, %v3086_v8 }
 0x6e3   : > { %8402 = vmatpush3.bf16.msk.msra.mxu0 %vm9263_vm11, %v8400_v12  ;;  %8424 = vmatpush3.bf16.msk.msra.mxu1 %vm9263_vm11, %v8422_v58 }
 0x6e4   : > { %8426 = vmatprep.subr.bf16.mxu0 %v8425_v57  ;;  %8429 = vmatprep.subr.bf16.mxu1 %v8828_v0 }
 0x6e6   : > { %7663 = vmatmul.mubr.msk.f32.vlgmr.msra.gmra.mrb[66].mxu0 %vm3095_vm14, %v6495_v59  ;;  %7718 = vmatmul.mubr.msk.f32.vlgmr.msra.gmra.mrb[38].mxu1 %vm3095_vm14, %v2749_v15 }
 0x6e7   : > { %7665 = vmatprep.mubr.msk.f32.mxu0 %vm8829_vm0, %v8830_v1  ;;  %7720 = vmatprep.mubr.msk.f32.mxu1 %vm8829_vm0, %v8830_v1 }
 0x6e8   : > { %8428 = vmatpush3.bf16.msra.mxu0 %v8425_v57 }
 0x6e9   : > { %7748 = vmatprep.subr.msk.mxu0 %vm2804_vm12, %v6553_v16 }
 0x6ea   : > { %7666 = vmatmul.mubr.msk.f32.gmra.mrb[68].mxu0 %vm3095_vm14, %v6496_v17  ;;  %7721 = vmatmul.mubr.msk.f32.gmra.mrb[40].mxu1 %vm3095_vm14, %v2750_v18 }
 0x6eb   : > { %7668 = vmatprep.mubr.msk.f32.mxu0 %vm8829_vm0, %v8830_v1  ;;  %7723 = vmatprep.mubr.msk.f32.mxu1 %vm8829_vm0, %v8830_v1 }
 0x6ec   : > { %7749 = vmatpush3.msk.msra.mxu0 %vm2804_vm12, %v6553_v16 }
 0x6ee   : > { %7669 = vmatmul.mubr.msk.f32.gmra.mrb[70].mxu0 %vm3095_vm14, %v6497_v19  ;;  %7724 = vmatmul.mubr.msk.f32.gmra.mrb[42].mxu1 %vm3095_vm14, %v2751_v20 }
 0x6ef   : > { %7671 = vmatprep.mubr.msk.f32.mxu0 %vm8829_vm0, %v8830_v1  ;;  %7726 = vmatprep.mubr.msk.f32.mxu1 %vm8829_vm0, %v8830_v1 }
 0x6f2   : > { %7672 = vmatmul.mubr.msk.f32.gmra.mrb[72].mxu0 %vm3095_vm14, %v6498_v21  ;;  %7727 = vmatmul.mubr.msk.f32.gmra.mrb[44].mxu1 %vm3095_vm14, %v2752_v22 }
 0x6f3   : > { %7674 = vmatprep.mubr.msk.f32.mxu0 %vm8829_vm0, %v8830_v1  ;;  %7729 = vmatprep.mubr.msk.f32.mxu1 %vm8829_vm0, %v8830_v1 }
 0x6f6   : > { %7675 = vmatmul.mubr.msk.f32.gmra.mrb[74].mxu0 %vm3095_vm14, %v6499_v23  ;;  %7730 = vmatmul.mubr.msk.f32.gmra.mrb[46].mxu1 %vm3095_vm14, %v2753_v24 }
 0x6f7   : > { %7677 = vmatprep.mubr.msk.f32.mxu0 %vm8829_vm0, %v8830_v1  ;;  %7732 = vmatprep.mubr.msk.f32.mxu1 %vm8829_vm0, %v8830_v1 }
 0x6fa   : > { %7678 = vmatmul.mubr.msk.f32.gmra.mrb[76].mxu0 %vm3095_vm14, %v6500_v25  ;;  %7733 = vmatmul.mubr.msk.f32.gmra.mrb[48].mxu1 %vm3095_vm14, %v2754_v26 }
 0x6fb   : > { %7680 = vmatprep.mubr.msk.f32.mxu0 %vm8829_vm0, %v8830_v1  ;;  %7735 = vmatprep.mubr.msk.f32.mxu1 %vm8829_vm0, %v8830_v1 }
 0x6fe   : > { %7681 = vmatmul.mubr.msk.f32.gmra.mrb[78].mxu0 %vm3095_vm14, %v6501_v27  ;;  %7736 = vmatmul.mubr.msk.f32.gmra.mrb[50].mxu1 %vm3095_vm14, %v2755_v28 }
 0x6ff   : > { %7683 = vmatprep.mubr.msk.f32.mxu0 %vm8829_vm0, %v8830_v1  ;;  %7738 = vmatprep.mubr.msk.f32.mxu1 %vm8829_vm0, %v8830_v1 }
 0x702   : > { %7684 = vmatmul.mubr.msk.f32.gmra.mrb[80].mxu0 %vm3095_vm14, %v6502_v29  ;;  %7739 = vmatmul.mubr.msk.f32.gmra.mrb[52].mxu1 %vm3095_vm14, %v2756_v30 }
 0x703   : > { %7686 = vmatprep.mubr.msk.f32.mxu0 %vm8829_vm0, %v8830_v1  ;;  %7741 = vmatprep.mubr.msk.f32.mxu1 %vm8829_vm0, %v8830_v1 }
 0x706   : > { %7687 = vmatmul.mubr.msk.f32.gmra.mrb[82].mxu0 %vm3095_vm14, %v6503_v31  ;;  %7742 = vmatmul.mubr.msk.f32.gmra.mrb[54].mxu1 %vm3095_vm14, %v2757_v32 }
 0x707   : > { %7750 = vmatprep.mubr.msk.f32.mxu0 %vm2761_vm13, %v9307_v61  ;;  %7799 = vmatprep.mubr.msk.f32.mxu1 %vm8829_vm0, %v8830_v1 }
 0x70a   : > { %7751 = vmatmul.mubr.msk.f32.vlgmr.msra.gmra.mrb[84].mxu0 %vm2761_vm13, %v9305_v60 }
 0x70b   : > { %7753 = vmatprep.mubr.msk.f32.mxu0 %vm2761_vm13, %v9319_v63 }
 0x70e   : > { %7754 = vmatmul.mubr.msk.f32.gmra.mrb[86].mxu0 %vm2761_vm13, %v9317_v62 }
 0x70f   : > { %7756 = vmatprep.mubr.msk.f32.mxu0 %vm2761_vm13, %v9331_v3 }
 0x712   : > { %7757 = vmatmul.mubr.msk.f32.gmra.mrb[88].mxu0 %vm2761_vm13, %v9329_v2 }
 0x713   : > { %7759 = vmatprep.mubr.msk.f32.mxu0 %vm2761_vm13, %v9343_v5 }
 0x716   : > { %7760 = vmatmul.mubr.msk.f32.gmra.mrb[90].mxu0 %vm2761_vm13, %v9341_v4 }
 0x717   : > { %7762 = vmatprep.mubr.msk.f32.mxu0 %vm2761_vm13, %v9355_v9 }
 0x71a   : > { %7763 = vmatmul.mubr.msk.f32.gmra.mrb[92].mxu0 %vm2761_vm13, %v9353_v6 }
 0x71b   : > { %7765 = vmatprep.mubr.msk.f32.mxu0 %vm2761_vm13, %v9367_v11 }
 0x71e   : > { %7766 = vmatmul.mubr.msk.f32.gmra.mrb[94].mxu0 %vm2761_vm13, %v9365_v10 }
 0x71f   : > { %7768 = vmatprep.mubr.msk.f32.mxu0 %vm2761_vm13, %v9379_v14 }
 0x722   : > { %7769 = vmatmul.mubr.msk.f32.gmra.mrb[96].mxu0 %vm2761_vm13, %v9377_v13 }
 0x7b9   : > { %v3192_v60 = vpop.f32.mrb[66].mxu0  ;;  %v3332_v61 = vpop.f32.mrb[38].mxu1 }
 0x7ba   : > { %v9513_v62 = vadd.f32 %v3332_v61, %v3192_v60  ;;  %v7664_v63 = vpop.f32.mrb[67].mxu0  ;;  %v7719_v2 = vpop.f32.mrb[39].mxu1 }
 0x7bd   : > { %v3197_v3 = vpop.f32.mrb[68].mxu0  ;;  %v3337_v4 = vpop.f32.mrb[40].mxu1 }
 0x7be   : > { %v9515_v5 = vadd.f32 %v3337_v4, %v3197_v3  ;;  %v7667_v6 = vpop.f32.mrb[69].mxu0  ;;  %v7722_v9 = vpop.f32.mrb[41].mxu1 }
 0x7bf   : > { %v6542_v6 = vld [vmem:[%s10017_s16 + $0x90] sm:$0xff]  ;;  %v6543_v9 = vld [vmem:[%s10017_s16 + $0x98] sm:$0xff] }
 0x7c1   : > { %v3202_v11 = vpop.f32.mrb[70].mxu0  ;;  %v3342_v10 = vpop.f32.mrb[42].mxu1 }
 0x7c2   : > { %v9517_v33 = vadd.f32 %v3342_v10, %v3202_v11  ;;  %v7670_v14 = vpop.f32.mrb[71].mxu0  ;;  %v7725_v34 = vpop.f32.mrb[43].mxu1  ;;  %v6544_v11 = vld [vmem:[%s10017_s16 + $0xa0] sm:$0xff]  ;;  %v6546_v10 = vld [vmem:[%s10017_s16 + $0xb0] sm:$0xff] }
 0x7c3   : > { %v6547_v14 = vld [vmem:[%s10017_s16 + $0xb8] sm:$0xff]  ;;  %v6548_v34 = vld [vmem:[%s10017_s16 + $0xc0] sm:$0xff] }
 0x7c5   : > { %v3207_v35 = vpop.f32.mrb[72].mxu0  ;;  %v3347_v13 = vpop.f32.mrb[44].mxu1 }
 0x7c6   : > { %v9519_v36 = vadd.f32 %v3347_v13, %v3207_v35  ;;  %v7673_v37 = vpop.f32.mrb[73].mxu0  ;;  %v7728_v38 = vpop.f32.mrb[45].mxu1  ;;  %v6549_v35 = vld [vmem:[%s10017_s16 + $0xc8] sm:$0xff]  ;;  %v6550_v13 = vld [vmem:[%s10017_s16 + $0xd0] sm:$0xff] }
 0x7c7   : > { %v3749_v37 = vld [vmem:[%s10018_s18] sm:$0xff] }
 0x7c8   : > { %7844 = vmatprep.mubr.msk.f32.mxu0 %vm3751_vm15, %v3749_v37 }
 0x7c9   : > { %v3212_v39 = vpop.f32.mrb[74].mxu0  ;;  %v3352_v40 = vpop.f32.mrb[46].mxu1 }
 0x7ca   : > { %v9521_v41 = vadd.f32 %v3352_v40, %v3212_v39  ;;  %v7676_v42 = vpop.f32.mrb[75].mxu0  ;;  %v7731_v43 = vpop.f32.mrb[47].mxu1 }
 0x7cb   : > { %v3689_v42 = vpop.permute.xlu1 %3688 }
 0x7cd   : > { %v3217_v45 = vpop.f32.mrb[76].mxu0  ;;  %v3357_v46 = vpop.f32.mrb[48].mxu1 }
 0x7ce   : > { %v9523_v47 = vadd.f32 %v3357_v46, %v3217_v45  ;;  %v7679_v48 = vpop.f32.mrb[77].mxu0  ;;  %v7734_v49 = vpop.f32.mrb[49].mxu1 }
 0x7cf   : > { %v3694_v49 = vpop.permute.xlu0 %3693 }
 0x7d1   : > { %v3222_v50 = vpop.f32.mrb[78].mxu0  ;;  %v3362_v52 = vpop.f32.mrb[50].mxu1 }
 0x7d2   : > { %v9525_v53 = vadd.f32 %v3362_v52, %v3222_v50  ;;  %v7682_v54 = vpop.f32.mrb[79].mxu0  ;;  %v7737_v55 = vpop.f32.mrb[51].mxu1 }
 0x7d5   : > { %v3227_v56 = vpop.f32.mrb[80].mxu0  ;;  %v3367_v7 = vpop.f32.mrb[52].mxu1 }
 0x7d6   : > { %v9527_v8 = vadd.f32 %v3367_v7, %v3227_v56  ;;  %v7685_v57 = vpop.f32.mrb[81].mxu0  ;;  %v7740_v58 = vpop.f32.mrb[53].mxu1 }
 0x7d7   : > { %v3699_v57 = vpop.permute.xlu1 %3698 }
 0x7d9   : > { %v3232_v12 = vpop.f32.mrb[82].mxu0  ;;  %v3372_v59 = vpop.f32.mrb[54].mxu1 }
 0x7da   : > { %v9529_v15 = vadd.f32 %v3372_v59, %v3232_v12  ;;  %v7688_v16 = vpop.f32.mrb[83].mxu0  ;;  %v7743_v17 = vpop.f32.mrb[55].mxu1 }
 0x7db   : > { %v3704_v16 = vpop.permute.xlu0 %3703 }
 0x7dd   : > { %v7752_v18 = vpop.f32.mrb[84].mxu0 }
 0x7de   : > { %v3459_v19 = vpop.f32.mrb[85].mxu0 }
 0x7df   : > { %v8430_v20 = vpack.c.bf16 %v7752_v18, %v3459_v19 }
 0x7e1   : > { %v7755_v21 = vpop.f32.mrb[86].mxu0  ;;  %8431 = vmatpush3.bf16.msra.mxu1 %v8430_v20 }
 0x7e2   : > { %v3469_v22 = vpop.f32.mrb[87].mxu0  ;;  %8432 = vmatprep.subr.bf16.mxu1 %v8828_v0 }
 0x7e3   : > { %v8433_v23 = vpack.c.bf16 %v7755_v21, %v3469_v22 }
 0x7e5   : > { %v7758_v24 = vpop.f32.mrb[88].mxu0  ;;  %8434 = vmatpush3.bf16.msra.mxu1 %v8433_v23 }
 0x7e6   : > { %v3479_v25 = vpop.f32.mrb[89].mxu0  ;;  %8435 = vmatprep.subr.bf16.mxu1 %v8828_v0 }
 0x7e7   : > { %v8436_v26 = vpack.c.bf16 %v7758_v24, %v3479_v25 }
 0x7e9   : > { %v7761_v27 = vpop.f32.mrb[90].mxu0  ;;  %8437 = vmatpush3.bf16.msra.mxu1 %v8436_v26 }
 0x7ea   : > { %v3489_v28 = vpop.f32.mrb[91].mxu0  ;;  %8438 = vmatprep.subr.bf16.mxu1 %v8828_v0 }
 0x7eb   : > { %v8439_v29 = vpack.c.bf16 %v7761_v27, %v3489_v28  ;;  %v3714_v27 = vpop.permute.xlu0 %3713 }
 0x7ed   : > { %v7764_v30 = vpop.f32.mrb[92].mxu0  ;;  %8440 = vmatpush3.bf16.msra.mxu1 %v8439_v29 }
 0x7ee   : > { %v3499_v31 = vpop.f32.mrb[93].mxu0  ;;  %8441 = vmatprep.subr.bf16.mxu1 %v8828_v0 }
 0x7ef   : > { %v8442_v32 = vpack.c.bf16 %v7764_v30, %v3499_v31 }
 0x7f1   : > { %v7767_v60 = vpop.f32.mrb[94].mxu0  ;;  %8443 = vmatpush3.bf16.msra.mxu1 %v8442_v32 }
 0x7f2   : > { %v3509_v61 = vpop.f32.mrb[95].mxu0  ;;  %8444 = vmatprep.subr.bf16.mxu1 %v8828_v0 }
 0x7f3   : > { %v8445_v63 = vpack.c.bf16 %v7767_v60, %v3509_v61 }
 0x7f5   : > { %v7770_v2 = vpop.f32.mrb[96].mxu0  ;;  %8446 = vmatpush3.bf16.msra.mxu1 %v8445_v63 }
 0x7f6   : > { %v3519_v3 = vpop.f32.mrb[97].mxu0  ;;  %8447 = vmatprep.subr.bf16.mxu1 %v8828_v0 }
 0x7f7   : > { %v8448_v4 = vpack.c.bf16 %v7770_v2, %v3519_v3 }
 0x7f9   : > { %8450 = vmatpush3.bf16.msk.msra.mxu1 %vm9263_vm11, %v8448_v4  ;;  %v3724_v4 = vpop.permute.xlu0 %3723 }
 0x7fc   : > { %7800 = vmatmul.mubr.msk.f32.vlgmr.msra.gmra.mrb[56].mxu1 %vm3095_vm14, %v6542_v6 }
 0x7fd   : > { %7802 = vmatprep.mubr.msk.f32.mxu1 %vm8829_vm0, %v8830_v1 }
 0x800   : > { %7803 = vmatmul.mubr.msk.f32.gmra.mrb[58].mxu1 %vm3095_vm14, %v6543_v9 }
 0x801   : > { %7805 = vmatprep.mubr.msk.f32.mxu1 %vm8829_vm0, %v8830_v1 }
 0x804   : > { %7806 = vmatmul.mubr.msk.f32.gmra.mrb[60].mxu1 %vm3095_vm14, %v6544_v11 }
 0x805   : > { %7808 = vmatprep.mubr.msk.f32.mxu1 %vm8829_vm0, %v8830_v1 }
 0x808   : > { %7809 = vmatmul.mubr.msk.f32.gmra.mrb[62].mxu1 %vm3095_vm14, %v6545_v44 }
 0x809   : > { %7811 = vmatprep.mubr.msk.f32.mxu1 %vm8829_vm0, %v8830_v1 }
 0x80c   : > { %7812 = vmatmul.mubr.msk.f32.gmra.mrb[64].mxu1 %vm3095_vm14, %v6546_v10 }
 0x80d   : > { %7814 = vmatprep.mubr.msk.f32.mxu1 %vm8829_vm0, %v8830_v1 }
 0x810   : > { %7815 = vmatmul.mubr.msk.f32.gmra.mrb[66].mxu1 %vm3095_vm14, %v6547_v14 }
 0x811   : > { %7817 = vmatprep.mubr.msk.f32.mxu1 %vm8829_vm0, %v8830_v1 }
 0x814   : > { %7818 = vmatmul.mubr.msk.f32.gmra.mrb[68].mxu1 %vm3095_vm14, %v6548_v34 }
 0x815   : > { %7820 = vmatprep.mubr.msk.f32.mxu1 %vm8829_vm0, %v8830_v1 }
 0x818   : > { %7821 = vmatmul.mubr.msk.f32.gmra.mrb[70].mxu1 %vm3095_vm14, %v6549_v35 }
 0x819   : > { %7823 = vmatprep.mubr.msk.f32.mxu1 %vm8829_vm0, %v8830_v1 }
 0x81c   : > { %7824 = vmatmul.mubr.msk.f32.gmra.mrb[72].mxu1 %vm3095_vm14, %v6550_v13  ;;  %v3750_v13 = vld [vmem:[%s10018_s18 + $0x8] sm:$0x1] }
 0x8cf   : > { %v3624_v38 = vpop.f32.mrb[56].mxu1 }
 0x8d0   : > { %v3668_v39 = vadd.f32 %v3624_v38, %v9513_v62  ;;  %v7801_v40 = vpop.f32.mrb[57].mxu1 }
 0x8d1   : > { %v3834_v40 = vld [vmem:[%s10019_s22 + $0x8] sm:$0x1] }
 0x8d2   : > { %v9576_v45 = vadd.f32 %v3689_v42, %v3668_v39  ;;  %v3946_v42 = vld [vmem:[%s10020_s23] sm:$0xff] }
 0x8d3   : > { %v3629_v43 = vpop.f32.mrb[58].mxu1 }
 0x8d4   : > { %v3669_v46 = vadd.f32 %v3629_v43, %v9515_v5  ;;  %v7804_v48 = vpop.f32.mrb[59].mxu1  ;;  %v3740_v54 = vmax.f32 %v9576_v45, 0.0  ;;  %v3947_v43 = vld [vmem:[%s10020_s23 + $0x8] sm:$0x1] }
 0x8d6   : > { %v9579_v50 = vadd.f32 %v3694_v49, %v3669_v46  ;;  %v8473_v46 = vpack.c.bf16 %v3947_v43, %v3946_v42  ;;  %v6635_v42 = vld [vmem:[%s10024_s2 + $0x10] sm:$0xff]  ;;  %v6636_v43 = vld [vmem:[%s10024_s2 + $0x18] sm:$0x1] }
 0x8d7   : > { %v3634_v52 = vpop.f32.mrb[60].mxu1 }
 0x8d8   : > { %v3741_v55 = vmax.f32 %v9579_v50, 0.0  ;;  %v3670_v56 = vadd.f32 %v3634_v52, %v9517_v33  ;;  %v7807_v7 = vpop.f32.mrb[61].mxu1  ;;  %v3840_v52 = vpop.permute.xlu0 %3839 }
 0x8da   : > { %v8451_v62 = vpack.c.bf16 %v3741_v55, %v3740_v54  ;;  %v9588_v5 = vadd.f32 %v3699_v57, %v3670_v56 }
 0x8db   : > { %v3639_v58 = vpop.f32.mrb[62].mxu1 }
 0x8dc   : > { %v3671_v12 = vadd.f32 %v3639_v58, %v9519_v36  ;;  %v7810_v59 = vpop.f32.mrb[63].mxu1  ;;  %8452 = vmatprep.subr.bf16.mxu0 %v8451_v62  ;;  %v3742_v33 = vmax.f32 %v9588_v5, 0.0  ;;  %v3709_v36 = vpop.permute.xlu1 %3708 }
 0x8dd   : > { %8454 = vmatpush3.bf16.msra.mxu0 %v8451_v62 }
 0x8de   : > { %v9591_v17 = vadd.f32 %v3704_v16, %v3671_v12 }
 0x8df   : > { %v3644_v18 = vpop.f32.mrb[64].mxu1 }
 0x8e0   : > { %v3743_v19 = vmax.f32 %v9591_v17, 0.0  ;;  %v3672_v20 = vadd.f32 %v3644_v18, %v9521_v41  ;;  %v7813_v21 = vpop.f32.mrb[65].mxu1 }
 0x8e2   : > { %v8455_v22 = vpack.c.bf16 %v3743_v19, %v3742_v33  ;;  %v9600_v24 = vadd.f32 %v3709_v36, %v3672_v20  ;;  %v6586_v36 = vld [vmem:[%s10021_s26] ss:$0 sm:$0xff]  ;;  %s10025_s26 = sld [smem:[#allocation10_spill]] }
 0x8e3   : > { %v3649_v23 = vpop.f32.mrb[66].mxu1 }
 0x8e4   : > { %v3673_v25 = vadd.f32 %v3649_v23, %v9523_v47  ;;  %v7816_v26 = vpop.f32.mrb[67].mxu1  ;;  %8456 = vmatprep.subr.bf16.mxu0 %v8455_v22  ;;  %v3744_v41 = vmax.f32 %v9600_v24, 0.0  ;;  %v3719_v47 = vpop.permute.xlu1 %3718 }
 0x8e5   : > { %8458 = vmatpush3.bf16.msra.mxu0 %v8455_v22 }
 0x8e6   : > { %v9603_v28 = vadd.f32 %v3714_v27, %v3673_v25 }
 0x8e7   : > { %v3654_v29 = vpop.f32.mrb[68].mxu1 }
 0x8e8   : > { %v3745_v30 = vmax.f32 %v9603_v28, 0.0  ;;  %v3674_v31 = vadd.f32 %v3654_v29, %v9525_v53  ;;  %v7819_v32 = vpop.f32.mrb[69].mxu1  ;;  %v3729_v14 = vpop.permute.xlu1 %3728 }
 0x8ea   : > { %v8459_v60 = vpack.c.bf16 %v3745_v30, %v3744_v41  ;;  %v9612_v63 = vadd.f32 %v3719_v47, %v3674_v31 }
 0x8eb   : > { %v3659_v61 = vpop.f32.mrb[70].mxu1 }
 0x8ec   : > { %v3675_v2 = vadd.f32 %v3659_v61, %v9527_v8  ;;  %v7822_v3 = vpop.f32.mrb[71].mxu1  ;;  %8460 = vmatprep.subr.bf16.mxu0 %v8459_v60  ;;  %v3746_v9 = vmax.f32 %v9612_v63, 0.0  ;;  %v3845_v48 = vpop.permute.xlu1 %3844 }
 0x8ed   : > { %8462 = vmatpush3.bf16.msra.mxu0 %v8459_v60 }
 0x8ee   : > { %v9615_v6 = vadd.f32 %v3724_v4, %v3675_v2 }
 0x8ef   : > { %v3664_v53 = vpop.f32.mrb[72].mxu1 }
 0x8f0   : > { %v3747_v11 = vmax.f32 %v9615_v6, 0.0  ;;  %v3676_v44 = vadd.f32 %v3664_v53, %v9529_v15  ;;  %v7825_v10 = vpop.f32.mrb[73].mxu1  ;;  %v3833_v15 = vld [vmem:[%s10019_s22] sm:$0xff]  ;;  %v4230_v6 = vld [vmem:[%s10023_s1 + $0x8] sm:$0xff] }
 0x8f1   : > { %v4053_v10 = vld [vmem:[%s10022_s28] sm:$0xff] }
 0x8f2   : > { %v3739_v34 = vadd.f32 %v3729_v14, %v3676_v44  ;;  %v8463_v8 = vpack.c.bf16 %v3747_v11, %v3746_v9  ;;  %v4054_v14 = vld [vmem:[%s10022_s28 + $0x8] sm:$0xff] }
 0x8f4   : > { %v9624_v35 = vmax.f32 %v3739_v34, 0.0  ;;  %8464 = vmatprep.subr.bf16.mxu0 %v8463_v8  ;;  %v4055_v34 = vld [vmem:[%s10022_s28 + $0x10] sm:$0xff] }
 0x8f5   : > { %8466 = vmatpush3.bf16.msra.mxu0 %v8463_v8  ;;  %v4056_v8 = vld [vmem:[%s10022_s28 + $0x18] sm:$0xff] }
 0x8f6   : > { %7842 = vmatprep.subr.mxu0 %v9624_v35 }
 0x8f9   : > { %7843 = vmatpush3.msra.mxu0 %v9624_v35 }
 0x8fa   : > { %7845 = vmatmul.mubr.msk.f32.vlgmr.msra.gmra.mrb[98].mxu0 %vm3751_vm15, %v3750_v13  ;;  %v4057_v13 = vld [vmem:[%s10022_s28 + $0x20] sm:$0xff] }
 0x8fb   : > { %7851 = vmatprep.mubr.msk.f32.mxu0 %vm3847_vm1, %v3833_v15  ;;  %v4058_v15 = vld [vmem:[%s10022_s28 + $0x28] sm:$0xff] }
 0x9cd   : > { %v7846_v37 = vpop.f32.mrb[98].mxu0 }
 0x9ce   : > { %v3824_v38 = vpop.f32.mrb[99].mxu0 }
 0x9cf   : > { %v8467_v39 = vpack.c.bf16 %v7846_v37, %v3824_v38  ;;  %v4059_v37 = vld [vmem:[%s10022_s28 + $0x30] sm:$0xff]  ;;  %v4060_v38 = vld [vmem:[%s10022_s28 + $0x38] sm:$0xff] }
 0x9d1   : > { %8469 = vmatprep.subr.msk.bf16.mxu0 %vm9157_vm8, %v8467_v39 }
 0x9d2   : > { %8472 = vmatpush3.bf16.msk.msra.mxu0 %vm9157_vm8, %v8467_v39  ;;  %v4061_v39 = vld [vmem:[%s10022_s28 + $0x40] sm:$0xff] }
 0x9d3   : > { %8475 = vmatprep.subr.msk.bf16.mxu0 %vm9157_vm8, %v8473_v46 }
 0x9d5   : > { %7852 = vmatmul.mubr.msk.f32.vlgmr.msra.gmra.mrb[100].mxu0 %vm3847_vm1, %v3834_v40  ;;  %v4229_v40 = vld [vmem:[%s10023_s1] sm:$0xff] }
 0x9d6   : > { %8478 = vmatpush3.bf16.msk.msra.mxu0 %vm9157_vm8, %v8473_v46  ;;  %7910 = vmatprep.mubr.msk.f32.mxu1 %vm3751_vm15, %v4229_v40  ;;  %v8505_v46 = vpack.c.bf16 %v6636_v43, %v6635_v42  ;;  %v6627_v40 = vld [vmem:[%s10025_s26 + $0x40] sm:$0xff] }
 0x9d7   : > { %8479 = vmatprep.subr.bf16.mxu0 %v8828_v0  ;;  %v5318_v42 = vld [vmem:[%s10026_s0] sm:$0xf] }
 0xaa8   : > { %v7853_v49 = vpop.f32.mrb[100].mxu0 }
 0xaa9   : > { %v3929_v56 = vadd.f32 %v7853_v49, %v3845_v48  ;;  %v3923_v7 = vpop.f32.mrb[101].mxu0 }
 0xaaa   : > { %v3924_v62 = vadd.f32 %v3923_v7, %v3840_v52 }
 0xaab   : > { %v6585_v57 = vmul.f32 -0.999995, %v3929_v56 }
 0xaac   : > { %v6584_v58 = vmul.f32 -0.999995, %v3924_v62 }
 0xaad   : > { %v3938_v12 = vmul.f32 1.442695, %v6585_v57 }
 0xaae   : > { %v3936_v59 = vmul.f32 1.442695, %v6584_v58 }
 0xaaf   : > { %8775 = vpow2.f32 %v3938_v12 }
 0xab0   : > { %8777 = vpow2.f32 %v3936_v59 }
 0xab9   : > { %v8776_v16 = vpop.eup %8775 }
 0xaba   : > { %v8778_v18 = vpop.eup %8777  ;;  %v3941_v20 = vadd.f32 1.0, %v8776_v16 }
 0xabb   : > { %v3940_v21 = vadd.f32 1.0, %v8778_v18 }
 0xabd   : > { %8779 = vrcp.f32 %v3940_v21 }
 0xabe   : > { %8781 = vrcp.f32 %v3941_v20 }
 0xac7   : > { %v8780_v0 = vpop.eup %8779 }
 0xac8   : > { %v8782_v22 = vpop.eup %8781  ;;  %7858 = vmatprep.mubr.msk.f32.mxu0 %vm3847_vm1, %v8780_v0 }
 0xac9   : > { %7859 = vmatmul.mubr.msk.f32.vlgmr.msra.gmra.mrb[102].mxu0 %vm3847_vm1, %v8782_v22 }
 0xaca   : > { %7865 = vmatprep.mubr.msk.f32.mxu0 %vm8829_vm0, %v8830_v1 }
 0xb9c   : > { %v7860_v23 = vpop.f32.mrb[102].mxu0 }
 0xb9d   : > { %v4036_v25 = vadd.f32 %v7860_v23, %v6586_v36  ;;  %v4030_v26 = vpop.f32.mrb[103].mxu0  ;;  %v4234_v23 = vld [vmem:[%s10023_s1 + $0x28] sm:$0xff] }
 0xb9e   : > { %v4031_v27 = vadd.f32 %v6586_v36, %v4030_v26  ;;  %v4233_v36 = vld [vmem:[%s10023_s1 + $0x20] sm:$0xff]  ;;  %v4236_v26 = vld [vmem:[%s10023_s1 + $0x38] sm:$0xff] }
 0xb9f   : > { %v6591_v29 = vmul.f32 -0.999995, %v4036_v25  ;;  %v4235_v25 = vld [vmem:[%s10023_s1 + $0x30] sm:$0xff] }
 0xba0   : > { %v6590_v31 = vmul.f32 -0.999995, %v4031_v27  ;;  %v4237_v27 = vld [vmem:[%s10023_s1 + $0x40] sm:$0xff] }
 0xba1   : > { %v4045_v32 = vmul.f32 1.442695, %v6591_v29  ;;  %v4238_v29 = vld [vmem:[%s10023_s1 + $0x48] sm:$0xff] }
 0xba2   : > { %v4043_v60 = vmul.f32 1.442695, %v6590_v31  ;;  %v4239_v31 = vld [vmem:[%s10023_s1 + $0x50] sm:$0xff] }
 0xba3   : > { %8783 = vpow2.f32 %v4045_v32  ;;  %v4240_v32 = vld [vmem:[%s10023_s1 + $0x58] sm:$0xff] }
 0xba4   : > { %8785 = vpow2.f32 %v4043_v60  ;;  %v4410_v60 = vld [vmem:[%s10024_s2] sm:$0xff] }
 0xbad   : > { %v8784_v47 = vpop.eup %8783 }
 0xbae   : > { %v8786_v61 = vpop.eup %8785  ;;  %v4048_v2 = vadd.f32 1.0, %v8784_v47  ;;  %v4411_v47 = vld [vmem:[%s10024_s2 + $0x8] sm:$0x1] }
 0xbaf   : > { %v4047_v3 = vadd.f32 1.0, %v8786_v61  ;;  %v8499_v61 = vpack.c.bf16 %v4411_v47, %v4410_v60  ;;  %v6631_v47 = vld [vmem:[%s10025_s26 + $0x60] sm:$0xff] }
 0xbb0   : > { %8787 = vrcp.f32 %v4048_v2  ;;  %v6674_v2 = vld [vmem:[%s10024_s2 + $0x20] sm:$0xff] }
 0xbb1   : > { %8789 = vrcp.f32 %v4047_v3  ;;  %v6675_v3 = vld [vmem:[%s10024_s2 + $0x28] sm:$0x1] }
 0xbba   : > { %v8788_v4 = vpop.eup %8787 }
 0xbbb   : > { %v8790_v53 = vpop.eup %8789 }
 0xbbc   : > { %v8480_v44 = vpack.c.bf16 %v8788_v4, %v8790_v53  ;;  %v8559_v4 = vpack.c.bf16 %v6675_v3, %v6674_v2  ;;  %v6632_v3 = vld [vmem:[%s10025_s26 + $0x68] sm:$0xff] }
 0xbbe   : > { %8482 = vmatpush3.bf16.msk.msra.mxu0 %vm9157_vm8, %v8480_v44 }
 0xbbf   : > { %8507 = vmatprep.subr.msk.bf16.mxu0 %vm9157_vm8, %v8505_v46 }
 0xbc1   : > { %7866 = vmatmul.mubr.msk.f32.vlgmr.msra.gmra.mrb[104].mxu0 %vm3847_vm1, %v4053_v10 }
 0xbc2   : > { %7868 = vmatprep.mubr.msk.f32.mxu0 %vm8829_vm0, %v8830_v1  ;;  %8510 = vmatpush3.bf16.msk.msra.mxu0 %vm9157_vm8, %v8505_v46 }
 0xbc3   : > { %8561 = vmatprep.subr.msk.bf16.mxu0 %vm9157_vm8, %v8559_v4 }
 0xbc5   : > { %7869 = vmatmul.mubr.msk.f32.gmra.mrb[106].mxu0 %vm3847_vm1, %v4054_v14 }
 0xbc6   : > { %7871 = vmatprep.mubr.msk.f32.mxu0 %vm8829_vm0, %v8830_v1 }
 0xbc9   : > { %7872 = vmatmul.mubr.msk.f32.gmra.mrb[108].mxu0 %vm3847_vm1, %v4055_v34 }
 0xbca   : > { %7874 = vmatprep.mubr.msk.f32.mxu0 %vm8829_vm0, %v8830_v1 }
 0xbcd   : > { %7875 = vmatmul.mubr.msk.f32.gmra.mrb[110].mxu0 %vm3847_vm1, %v4056_v8 }
 0xbce   : > { %7877 = vmatprep.mubr.msk.f32.mxu0 %vm8829_vm0, %v8830_v1 }
 0xbd1   : > { %7878 = vmatmul.mubr.msk.f32.gmra.mrb[112].mxu0 %vm3847_vm1, %v4057_v13 }
 0xbd2   : > { %7880 = vmatprep.mubr.msk.f32.mxu0 %vm8829_vm0, %v8830_v1 }
 0xbd5   : > { %7881 = vmatmul.mubr.msk.f32.gmra.mrb[114].mxu0 %vm3847_vm1, %v4058_v15 }
 0xbd6   : > { %7883 = vmatprep.mubr.msk.f32.mxu0 %vm8829_vm0, %v8830_v1 }
 0xbd9   : > { %7884 = vmatmul.mubr.msk.f32.gmra.mrb[116].mxu0 %vm3847_vm1, %v4059_v37 }
 0xbda   : > { %7886 = vmatprep.mubr.msk.f32.mxu0 %vm8829_vm0, %v8830_v1 }
 0xbdd   : > { %7887 = vmatmul.mubr.msk.f32.gmra.mrb[118].mxu0 %vm3847_vm1, %v4060_v38 }
 0xbde   : > { %7889 = vmatprep.mubr.msk.f32.mxu0 %vm8829_vm0, %v8830_v1  ;;  %vm4716_vm0 = vcmask 785408  }
 0xbe1   : > { %7890 = vmatmul.mubr.msk.f32.gmra.mrb[120].mxu0 %vm3847_vm1, %v4061_v39 }
 0xc94   : > { %v4158_v1 = vpop.f32.mrb[104].mxu0 }
 0xc95   : > { %v4202_v48 = vmul.f32 %v4158_v1, %v3740_v54  ;;  %4220 = vst.msk [vmem:[%s9696_s11] sm:$0xff] %vm3847_vm1, %v4158_v1  ;;  %v7867_v49 = vpop.f32.mrb[105].mxu0 }
 0xc97   : > { %4211 = vst.msk [vmem:[%s9699_s15] sm:$0xff] %vm3847_vm1, %v4202_v48 }
 0xc98   : > { %v4163_v52 = vpop.f32.mrb[106].mxu0 }
 0xc99   : > { %v4203_v56 = vmul.f32 %v4163_v52, %v3741_v55  ;;  %4221 = vst.msk [vmem:[%s9696_s11 + $0x8] sm:$0xff] %vm3847_vm1, %v4163_v52  ;;  %v7870_v7 = vpop.f32.mrb[107].mxu0 }
 0xc9b   : > { %4212 = vst.msk [vmem:[%s9699_s15 + $0x8] sm:$0xff] %vm3847_vm1, %v4203_v56  ;;  %v8483_v62 = vpack.c.bf16 %v4203_v56, %v4202_v48 }
 0xc9c   : > { %v4168_v45 = vpop.f32.mrb[108].mxu0 }
 0xc9d   : > { %v4204_v54 = vmul.f32 %v4168_v45, %v3742_v33  ;;  %4222 = vst.msk [vmem:[%s9696_s11 + $0x10] sm:$0xff] %vm3847_vm1, %v4168_v45  ;;  %v7873_v57 = vpop.f32.mrb[109].mxu0  ;;  %8484 = vmatprep.subr.bf16.mxu1 %v8483_v62 }
 0xc9e   : > { %8486 = vmatpush3.bf16.msra.mxu1 %v8483_v62 }
 0xc9f   : > { %4213 = vst.msk [vmem:[%s9699_s15 + $0x10] sm:$0xff] %vm3847_vm1, %v4204_v54 }
 0xca0   : > { %v4173_v50 = vpop.f32.mrb[110].mxu0 }
 0xca1   : > { %v4205_v55 = vmul.f32 %v4173_v50, %v3743_v19  ;;  %4223 = vst.msk [vmem:[%s9696_s11 + $0x18] sm:$0xff] %vm3847_vm1, %v4173_v50  ;;  %v7876_v58 = vpop.f32.mrb[111].mxu0 }
 0xca3   : > { %4214 = vst.msk [vmem:[%s9699_s15 + $0x18] sm:$0xff] %vm3847_vm1, %v4205_v55  ;;  %v8487_v5 = vpack.c.bf16 %v4205_v55, %v4204_v54 }
 0xca4   : > { %v4178_v33 = vpop.f32.mrb[112].mxu0 }
 0xca5   : > { %v4206_v12 = vmul.f32 %v4178_v33, %v3744_v41  ;;  %4224 = vst.msk [vmem:[%s9696_s11 + $0x20] sm:$0xff] %vm3847_vm1, %v4178_v33  ;;  %v7879_v59 = vpop.f32.mrb[113].mxu0  ;;  %8488 = vmatprep.subr.bf16.mxu1 %v8487_v5 }
 0xca6   : > { %8490 = vmatpush3.bf16.msra.mxu1 %v8487_v5 }
 0xca7   : > { %4215 = vst.msk [vmem:[%s9699_s15 + $0x20] sm:$0xff] %vm3847_vm1, %v4206_v12 }
 0xca8   : > { %v4183_v17 = vpop.f32.mrb[114].mxu0 }
 0xca9   : > { %v4207_v19 = vmul.f32 %v4183_v17, %v3745_v30  ;;  %4225 = vst.msk [vmem:[%s9696_s11 + $0x28] sm:$0xff] %vm3847_vm1, %v4183_v17  ;;  %v7882_v16 = vpop.f32.mrb[115].mxu0 }
 0xcab   : > { %4216 = vst.msk [vmem:[%s9699_s15 + $0x28] sm:$0xff] %vm3847_vm1, %v4207_v19  ;;  %v8491_v24 = vpack.c.bf16 %v4207_v19, %v4206_v12 }
 0xcac   : > { %v4188_v41 = vpop.f32.mrb[116].mxu0 }
 0xcad   : > { %v4208_v18 = vmul.f32 %v4188_v41, %v3746_v9  ;;  %4226 = vst.msk [vmem:[%s9696_s11 + $0x30] sm:$0xff] %vm3847_vm1, %v4188_v41  ;;  %v7885_v20 = vpop.f32.mrb[117].mxu0  ;;  %8492 = vmatprep.subr.bf16.mxu1 %v8491_v24 }
 0xcae   : > { %8494 = vmatpush3.bf16.msra.mxu1 %v8491_v24 }
 0xcaf   : > { %4217 = vst.msk [vmem:[%s9699_s15 + $0x30] sm:$0xff] %vm3847_vm1, %v4208_v18 }
 0xcb0   : > { %v4193_v28 = vpop.f32.mrb[118].mxu0 }
 0xcb1   : > { %v4209_v30 = vmul.f32 %v4193_v28, %v3747_v11  ;;  %4227 = vst.msk [vmem:[%s9696_s11 + $0x38] sm:$0xff] %vm3847_vm1, %v4193_v28  ;;  %v7888_v21 = vpop.f32.mrb[119].mxu0  ;;  %v4231_v11 = vld [vmem:[%s10023_s1 + $0x10] sm:$0xff] }
 0xcb3   : > { %4218 = vst.msk [vmem:[%s9699_s15 + $0x38] sm:$0xff] %vm3847_vm1, %v4209_v30  ;;  %v8495_v63 = vpack.c.bf16 %v4209_v30, %v4208_v18 }
 0xcb4   : > { %v4198_v9 = vpop.f32.mrb[120].mxu0 }
 0xcb5   : > { %v4210_v0 = vmul.f32 %v4198_v9, %v9624_v35  ;;  %4228 = vst.msk [vmem:[%s9696_s11 + $0x40] sm:$0xff] %vm3847_vm1, %v4198_v9  ;;  %8496 = vmatprep.subr.bf16.mxu1 %v8495_v63  ;;  %v7891_v22 = vpop.f32.mrb[121].mxu0  ;;  %v4232_v35 = vld [vmem:[%s10023_s1 + $0x18] sm:$0xff]  ;;  %s10027_s11 = sld [smem:[#allocation12_spill]] }
 0xcb6   : > { %8498 = vmatpush3.bf16.msra.mxu1 %v8495_v63 }
 0xcb7   : > { %4219 = vst.msk [vmem:[%s9699_s15 + $0x40] sm:$0xff] %vm3847_vm1, %v4210_v0  ;;  %7908 = vmatprep.subr.mxu1 %v4210_v0  ;;  %s10028_s15 = sld [smem:[#allocation13_spill]] }
 0xcba   : > { %7909 = vmatpush3.msra.mxu1 %v4210_v0 }
 0xcbb   : > { %7911 = vmatmul.mubr.msk.f32.vlgmr.msra.gmra.mrb[74].mxu1 %vm3751_vm15, %v4230_v6  ;;  %8501 = vmatprep.subr.msk.bf16.mxu1 %vm9157_vm8, %v8499_v61 }
 0xcbc   : > { %7913 = vmatprep.mubr.msk.f32.mxu1 %vm3751_vm15, %v4231_v11  ;;  %8504 = vmatpush3.bf16.msk.msra.mxu1 %vm9157_vm8, %v8499_v61 }
 0xcbf   : > { %7914 = vmatmul.mubr.msk.f32.gmra.mrb[76].mxu1 %vm3751_vm15, %v4232_v35 }
 0xcc0   : > { %7916 = vmatprep.mubr.msk.f32.mxu1 %vm3751_vm15, %v4233_v36 }
 0xcc3   : > { %7917 = vmatmul.mubr.msk.f32.gmra.mrb[78].mxu1 %vm3751_vm15, %v4234_v23 }
 0xcc4   : > { %7919 = vmatprep.mubr.msk.f32.mxu1 %vm3751_vm15, %v4235_v25  ;;  %v6628_v25 = vld [vmem:[%s10025_s26 + $0x48] sm:$0xff] }
 0xcc7   : > { %7920 = vmatmul.mubr.msk.f32.gmra.mrb[80].mxu1 %vm3751_vm15, %v4236_v26 }
 0xcc8   : > { %7922 = vmatprep.mubr.msk.f32.mxu1 %vm3751_vm15, %v4237_v27  ;;  %v6629_v27 = vld [vmem:[%s10025_s26 + $0x50] sm:$0xff] }
 0xccb   : > { %7923 = vmatmul.mubr.msk.f32.gmra.mrb[82].mxu1 %vm3751_vm15, %v4238_v29 }
 0xccc   : > { %7925 = vmatprep.mubr.msk.f32.mxu1 %vm3751_vm15, %v4239_v31 }
 0xccf   : > { %7926 = vmatmul.mubr.msk.f32.gmra.mrb[84].mxu1 %vm3751_vm15, %v4240_v32  ;;  %v6630_v32 = vld [vmem:[%s10025_s26 + $0x58] sm:$0xff] }
 0xd8e   : > { %v7912_v53 = vpop.f32.mrb[74].mxu1 }
 0xd8f   : > { %v4343_v44 = vpop.f32.mrb[75].mxu1 }
 0xd90   : > { %7954 = vmatprep.mubr.msk.f32.mxu0 %vm3847_vm1, %v4343_v44  ;;  %7932 = vmatprep.mubr.msk.f32.mxu1 %vm3847_vm1, %v4343_v44 }
 0xd91   : > { %7955 = vmatmul.mubr.msk.f32.vlgmr.msra.gmra.mrb[122].mxu0 %vm3847_vm1, %v7912_v53  ;;  %7933 = vmatmul.mubr.msk.f32.vlgmr.msra.gmra.mrb[86].mxu1 %vm3847_vm1, %v7912_v53 }
 0xd92   : > { %v7915_v10 = vpop.f32.mrb[76].mxu1  ;;  %8564 = vmatpush3.bf16.msk.msra.mxu0 %vm9157_vm8, %v8559_v4 }
 0xd93   : > { %v4353_v14 = vpop.f32.mrb[77].mxu1  ;;  %8102 = vmatprep.subr.msk.mxu0 %vm2610_vm10, %v5318_v42 }
 0xd94   : > { %7957 = vmatprep.mubr.msk.f32.mxu0 %vm3847_vm1, %v4353_v14  ;;  %7935 = vmatprep.mubr.msk.f32.mxu1 %vm3847_vm1, %v4353_v14 }
 0xd95   : > { %7958 = vmatmul.mubr.msk.f32.gmra.mrb[124].mxu0 %vm3847_vm1, %v7915_v10  ;;  %7936 = vmatmul.mubr.msk.f32.gmra.mrb[88].mxu1 %vm3847_vm1, %v7915_v10 }
 0xd96   : > { %v7918_v34 = vpop.f32.mrb[78].mxu1 }
 0xd97   : > { %v4363_v8 = vpop.f32.mrb[79].mxu1 }
 0xd98   : > { %7960 = vmatprep.mubr.msk.f32.mxu0 %vm3847_vm1, %v4363_v8  ;;  %7938 = vmatprep.mubr.msk.f32.mxu1 %vm3847_vm1, %v4363_v8 }
 0xd99   : > { %7961 = vmatmul.mubr.msk.f32.gmra.mrb[126].mxu0 %vm3847_vm1, %v7918_v34  ;;  %7939 = vmatmul.mubr.msk.f32.gmra.mrb[90].mxu1 %vm3847_vm1, %v7918_v34 }
 0xd9a   : > { %v7921_v51 = vpop.f32.mrb[80].mxu1 }
 0xd9b   : > { %v4373_v13 = vpop.f32.mrb[81].mxu1 }
 0xd9c   : > { %7963 = vmatprep.mubr.msk.f32.mxu0 %vm3847_vm1, %v4373_v13  ;;  %7941 = vmatprep.mubr.msk.f32.mxu1 %vm3847_vm1, %v4373_v13 }
 0xd9d   : > { %7964 = vmatmul.mubr.msk.f32.gmra.mrb[128].mxu0 %vm3847_vm1, %v7921_v51  ;;  %7942 = vmatmul.mubr.msk.f32.gmra.mrb[92].mxu1 %vm3847_vm1, %v7921_v51 }
 0xd9e   : > { %v7924_v15 = vpop.f32.mrb[82].mxu1 }
 0xd9f   : > { %v4383_v37 = vpop.f32.mrb[83].mxu1 }
 0xda0   : > { %7966 = vmatprep.mubr.msk.f32.mxu0 %vm3847_vm1, %v4383_v37  ;;  %7944 = vmatprep.mubr.msk.f32.mxu1 %vm3847_vm1, %v4383_v37 }
 0xda1   : > { %7967 = vmatmul.mubr.msk.f32.gmra.mrb[130].mxu0 %vm3847_vm1, %v7924_v15  ;;  %7945 = vmatmul.mubr.msk.f32.gmra.mrb[94].mxu1 %vm3847_vm1, %v7924_v15 }
 0xda2   : > { %v7927_v38 = vpop.f32.mrb[84].mxu1 }
 0xda3   : > { %v4393_v39 = vpop.f32.mrb[85].mxu1 }
 0xda4   : > { %7969 = vmatprep.mubr.msk.f32.mxu0 %vm3847_vm1, %v4393_v39  ;;  %7947 = vmatprep.mubr.msk.f32.mxu1 %vm3847_vm1, %v4393_v39 }
 0xda5   : > { %7970 = vmatmul.mubr.msk.f32.gmra.mrb[132].mxu0 %vm3847_vm1, %v7927_v38  ;;  %7948 = vmatmul.mubr.msk.f32.gmra.mrb[96].mxu1 %vm3847_vm1, %v7927_v38 }
 0xda6   : > { %8048 = vmatprep.mubr.msk.f32.mxu0 %vm3847_vm1, %v4343_v44  ;;  %7996 = vmatprep.mubr.msk.f32.mxu1 %vm4716_vm0, %v6627_v40  ;;  %v4403_v40 = vld [vmem:[%s10025_s26 + $0x8] sm:$0xff] }
 0xda9   : > { %8049 = vmatmul.mubr.msk.f32.vlgmr.msra.gmra.mrb[134].mxu0 %vm3847_vm1, %v7912_v53  ;;  %v6633_v53 = vld [vmem:[%s10025_s26 + $0x70] sm:$0xff] }
 0xdaa   : > { %8051 = vmatprep.mubr.msk.f32.mxu0 %vm3847_vm1, %v4353_v14  ;;  %8103 = vmatpush3.msk.msra.mxu0 %vm2610_vm10, %v5318_v42  ;;  %v6634_v14 = vld [vmem:[%s10025_s26 + $0x78] sm:$0xff]  ;;  %v4404_v42 = vld [vmem:[%s10025_s26 + $0x10] sm:$0xff] }
 0xdad   : > { %8052 = vmatmul.mubr.msk.f32.gmra.mrb[136].mxu0 %vm3847_vm1, %v7915_v10 }
 0xdae   : > { %8054 = vmatprep.mubr.msk.f32.mxu0 %vm3847_vm1, %v4363_v8  ;;  %v4402_v8 = vld [vmem:[%s10025_s26] sm:$0xff] }
 0xdb1   : > { %8055 = vmatmul.mubr.msk.f32.gmra.mrb[138].mxu0 %vm3847_vm1, %v7918_v34 }
 0xdb2   : > { %8057 = vmatprep.mubr.msk.f32.mxu0 %vm3847_vm1, %v4373_v13 }
 0xdb5   : > { %8058 = vmatmul.mubr.msk.f32.gmra.mrb[140].mxu0 %vm3847_vm1, %v7921_v51 }
 0xdb6   : > { %8060 = vmatprep.mubr.msk.f32.mxu0 %vm3847_vm1, %v4383_v37 }
 0xdb9   : > { %8061 = vmatmul.mubr.msk.f32.gmra.mrb[142].mxu0 %vm3847_vm1, %v7924_v15 }
 0xdba   : > { %8063 = vmatprep.mubr.msk.f32.mxu0 %vm3847_vm1, %v4393_v39 }
 0xdbd   : > { %8064 = vmatmul.mubr.msk.f32.gmra.mrb[144].mxu0 %vm3847_vm1, %v7927_v38 }
 0xe64   : > { %v7956_v43 = vpop.f32.mrb[122].mxu0  ;;  %v7934_v46 = vpop.f32.mrb[86].mxu1 }
 0xe65   : > { %v4657_v1 = vpop.f32.mrb[123].mxu0  ;;  %v4517_v48 = vpop.f32.mrb[87].mxu1 }
 0xe66   : > { %v8511_v49 = vpack.c.bf16 %v7956_v43, %v4657_v1  ;;  %v8535_v52 = vpack.c.bf16 %v7934_v46, %v4517_v48  ;;  %v4405_v43 = vld [vmem:[%s10025_s26 + $0x18] sm:$0xff]  ;;  %v4406_v46 = vld [vmem:[%s10025_s26 + $0x20] sm:$0xff]  ;;  %v4407_v1 = vld [vmem:[%s10025_s26 + $0x28] sm:$0xff] }
 0xe67   : > { %v4408_v48 = vld [vmem:[%s10025_s26 + $0x30] sm:$0xff] }
 0xe68   : > { %v7959_v56 = vpop.f32.mrb[124].mxu0  ;;  %8512 = vmatprep.subr.bf16.mxu1 %v8511_v49  ;;  %v7937_v7 = vpop.f32.mrb[88].mxu1 }
 0xe69   : > { %v4667_v62 = vpop.f32.mrb[125].mxu0  ;;  %8514 = vmatpush3.bf16.msra.mxu1 %v8511_v49  ;;  %v4527_v45 = vpop.f32.mrb[89].mxu1  ;;  %v4409_v49 = vld [vmem:[%s10025_s26 + $0x38] sm:$0xff] }
 0xe6a   : > { %v8515_v54 = vpack.c.bf16 %v7959_v56, %v4667_v62  ;;  %v8539_v57 = vpack.c.bf16 %v7937_v7, %v4527_v45  ;;  %v6667_v56 = vld [vmem:[%s10025_s26 + $0x88] sm:$0xff]  ;;  %v6668_v7 = vld [vmem:[%s10025_s26 + $0x90] sm:$0xff]  ;;  %v6669_v62 = vld [vmem:[%s10025_s26 + $0x98] sm:$0xff] }
 0xe6b   : > { %v6670_v45 = vld [vmem:[%s10025_s26 + $0xa0] sm:$0xff] }
 0xe6c   : > { %v7962_v50 = vpop.f32.mrb[126].mxu0  ;;  %8516 = vmatprep.subr.bf16.mxu1 %v8515_v54  ;;  %v7940_v55 = vpop.f32.mrb[90].mxu1 }
 0xe6d   : > { %v4677_v58 = vpop.f32.mrb[127].mxu0  ;;  %8518 = vmatpush3.bf16.msra.mxu1 %v8515_v54  ;;  %v4537_v5 = vpop.f32.mrb[91].mxu1  ;;  %v6671_v54 = vld [vmem:[%s10025_s26 + $0xa8] sm:$0xff] }
 0xe6e   : > { %v8519_v33 = vpack.c.bf16 %v7962_v50, %v4677_v58  ;;  %v8543_v12 = vpack.c.bf16 %v7940_v55, %v4537_v5  ;;  %v6673_v50 = vld [vmem:[%s10025_s26 + $0xb8] sm:$0xff]  ;;  %v6708_v55 = vld [vmem:[%s10026_s0 + $0x4] sm:$0xf]  ;;  %v5268_v58 = vpop.permute.xlu1 %5267  ;;  %v5263_v5 = vpop.permute.xlu0 %5262 }
 0xe6f   : > { %8116 = vmatprep.subr.msk.mxu0 %vm2610_vm10, %v6708_v55 }
 0xe70   : > { %v7965_v59 = vpop.f32.mrb[128].mxu0  ;;  %8520 = vmatprep.subr.bf16.mxu1 %v8519_v33  ;;  %v7943_v17 = vpop.f32.mrb[92].mxu1 }
 0xe71   : > { %v4687_v19 = vpop.f32.mrb[129].mxu0  ;;  %8522 = vmatpush3.bf16.msra.mxu1 %v8519_v33  ;;  %v4547_v16 = vpop.f32.mrb[93].mxu1 }
 0xe72   : > { %v8523_v24 = vpack.c.bf16 %v7965_v59, %v4687_v19  ;;  %v8547_v41 = vpack.c.bf16 %v7943_v17, %v4547_v16  ;;  %v5278_v33 = vpop.permute.xlu1 %5277  ;;  %v5273_v59 = vpop.permute.xlu0 %5272 }
 0xe74   : > { %v7968_v18 = vpop.f32.mrb[130].mxu0  ;;  %8524 = vmatprep.subr.bf16.mxu1 %v8523_v24  ;;  %v7946_v20 = vpop.f32.mrb[94].mxu1 }
 0xe75   : > { %v4697_v28 = vpop.f32.mrb[131].mxu0  ;;  %8526 = vmatpush3.bf16.msra.mxu1 %v8523_v24  ;;  %v4557_v30 = vpop.f32.mrb[95].mxu1 }
 0xe76   : > { %v8527_v21 = vpack.c.bf16 %v7968_v18, %v4697_v28  ;;  %v8551_v63 = vpack.c.bf16 %v7946_v20, %v4557_v30  ;;  %v5288_v30 = vpop.permute.xlu1 %5287 }
 0xe78   : > { %v7971_v9 = vpop.f32.mrb[132].mxu0  ;;  %8528 = vmatprep.subr.bf16.mxu1 %v8527_v21  ;;  %v7949_v0 = vpop.f32.mrb[96].mxu1 }
 0xe79   : > { %v4707_v22 = vpop.f32.mrb[133].mxu0  ;;  %8530 = vmatpush3.bf16.msra.mxu1 %v8527_v21  ;;  %v4567_v6 = vpop.f32.mrb[97].mxu1 }
 0xe7a   : > { %v8531_v11 = vpack.c.bf16 %v7971_v9, %v4707_v22  ;;  %v8555_v35 = vpack.c.bf16 %v7949_v0, %v4567_v6 }
 0xe7c   : > { %8532 = vmatprep.subr.bf16.mxu1 %v8531_v11  ;;  %v8050_v36 = vpop.f32.mrb[134].mxu0 }
 0xe7d   : > { %8534 = vmatpush3.bf16.msra.mxu1 %v8531_v11  ;;  %v5056_v23 = vpop.f32.mrb[135].mxu0 }
 0xe7e   : > { %v8565_v26 = vpack.c.bf16 %v8050_v36, %v5056_v23  ;;  %8536 = vmatprep.subr.bf16.mxu1 %v8535_v52  ;;  %v5298_v36 = vpop.permute.xlu1 %5297 }
 0xe80   : > { %v8053_v29 = vpop.f32.mrb[136].mxu0  ;;  %7997 = vmatmul.mubr.msk.f32.vlgmr.msra.gmra.mrb[98].mxu1 %vm4716_vm0, %v6628_v25 }
 0xe81   : > { %8538 = vmatpush3.bf16.msra.mxu1 %v8535_v52  ;;  %v5066_v31 = vpop.f32.mrb[137].mxu0  ;;  %7999 = vmatprep.mubr.msk.f32.mxu1 %vm4716_vm0, %v6629_v27  ;;  %v6666_v52 = vld [vmem:[%s10025_s26 + $0x80] sm:$0xff] }
 0xe82   : > { %v8569_v60 = vpack.c.bf16 %v8053_v29, %v5066_v31  ;;  %8540 = vmatprep.subr.bf16.mxu1 %v8539_v57 }
 0xe84   : > { %v8056_v61 = vpop.f32.mrb[138].mxu0  ;;  %8000 = vmatmul.mubr.msk.f32.gmra.mrb[100].mxu1 %vm4716_vm0, %v6630_v32 }
 0xe85   : > { %8542 = vmatpush3.bf16.msra.mxu1 %v8539_v57  ;;  %v5076_v2 = vpop.f32.mrb[139].mxu0  ;;  %8002 = vmatprep.mubr.msk.f32.mxu1 %vm4716_vm0, %v6631_v47  ;;  %v6672_v57 = vld [vmem:[%s10025_s26 + $0xb0] sm:$0xff] }
 0xe86   : > { %v8573_v4 = vpack.c.bf16 %v8056_v61, %v5076_v2  ;;  %8544 = vmatprep.subr.bf16.mxu1 %v8543_v12  ;;  %v6706_v61 = vld [vmem:[%s10027_s11 + $0x10] sm:$0xff] }
 0xe88   : > { %v8059_v44 = vpop.f32.mrb[140].mxu0  ;;  %8003 = vmatmul.mubr.msk.f32.gmra.mrb[102].mxu1 %vm4716_vm0, %v6632_v3 }
 0xe89   : > { %8546 = vmatpush3.bf16.msra.mxu1 %v8543_v12  ;;  %v5086_v10 = vpop.f32.mrb[141].mxu0  ;;  %8005 = vmatprep.mubr.msk.f32.mxu1 %vm4716_vm0, %v6633_v53 }
 0xe8a   : > { %v8577_v34 = vpack.c.bf16 %v8059_v44, %v5086_v10  ;;  %8548 = vmatprep.subr.bf16.mxu1 %v8547_v41 }
 0xe8c   : > { %v8062_v51 = vpop.f32.mrb[142].mxu0  ;;  %8006 = vmatmul.mubr.msk.f32.gmra.mrb[104].mxu1 %vm4716_vm0, %v6634_v14 }
 0xe8d   : > { %8550 = vmatpush3.bf16.msra.mxu1 %v8547_v41  ;;  %v5096_v13 = vpop.f32.mrb[143].mxu0  ;;  %8032 = vmatprep.mubr.msk.f32.mxu1 %vm4716_vm0, %v4402_v8 }
 0xe8e   : > { %v8581_v15 = vpack.c.bf16 %v8062_v51, %v5096_v13  ;;  %8552 = vmatprep.subr.bf16.mxu1 %v8551_v63 }
 0xe90   : > { %v8065_v37 = vpop.f32.mrb[144].mxu0 }
 0xe91   : > { %8554 = vmatpush3.bf16.msra.mxu1 %v8551_v63  ;;  %v5106_v38 = vpop.f32.mrb[145].mxu0  ;;  %v5283_v63 = vpop.permute.xlu0 %5282 }
 0xe92   : > { %v8585_v39 = vpack.c.bf16 %v8065_v37, %v5106_v38  ;;  %8556 = vmatprep.subr.bf16.mxu1 %v8555_v35 }
 0xe95   : > { %8558 = vmatpush3.bf16.msra.mxu1 %v8555_v35 }
 0xe96   : > { %8566 = vmatprep.subr.bf16.mxu1 %v8565_v26 }
 0xe98   : > { %8033 = vmatmul.mubr.msk.f32.vlgmr.msra.gmra.mrb[98].mxu1 %vm4716_vm0, %v4403_v40 }
 0xe99   : > { %8568 = vmatpush3.bf16.msra.mxu1 %v8565_v26  ;;  %8035 = vmatprep.mubr.msk.f32.mxu1 %vm4716_vm0, %v4404_v42  ;;  %v5293_v26 = vpop.permute.xlu0 %5292 }
 0xe9a   : > { %8570 = vmatprep.subr.bf16.mxu1 %v8569_v60 }
 0xe9c   : > { %8036 = vmatmul.mubr.msk.f32.gmra.mrb[100].mxu1 %vm4716_vm0, %v4405_v43 }
 0xe9d   : > { %8572 = vmatpush3.bf16.msra.mxu1 %v8569_v60  ;;  %8038 = vmatprep.mubr.msk.f32.mxu1 %vm4716_vm0, %v4406_v46 }
 0xe9e   : > { %8574 = vmatprep.subr.bf16.mxu1 %v8573_v4 }
 0xea0   : > { %8039 = vmatmul.mubr.msk.f32.gmra.mrb[102].mxu1 %vm4716_vm0, %v4407_v1 }
 0xea1   : > { %8576 = vmatpush3.bf16.msra.mxu1 %v8573_v4  ;;  %8041 = vmatprep.mubr.msk.f32.mxu1 %vm4716_vm0, %v4408_v48 }
 0xea2   : > { %8578 = vmatprep.subr.bf16.mxu1 %v8577_v34 }
 0xea4   : > { %8042 = vmatmul.mubr.msk.f32.gmra.mrb[104].mxu1 %vm4716_vm0, %v4409_v49 }
 0xea5   : > { %8580 = vmatpush3.bf16.msra.mxu1 %v8577_v34  ;;  %8090 = vmatprep.mubr.msk.f32.mxu1 %vm4716_vm0, %v6666_v52 }
 0xea6   : > { %8582 = vmatprep.subr.bf16.mxu1 %v8581_v15 }
 0xea9   : > { %8584 = vmatpush3.bf16.msra.mxu1 %v8581_v15 }
 0xeaa   : > { %8586 = vmatprep.subr.bf16.mxu1 %v8585_v39 }
 0xead   : > { %8588 = vmatpush3.bf16.msra.mxu1 %v8585_v39 }
 0xeb0   : > { %8091 = vmatmul.mubr.msk.f32.vlgmr.msra.gmra.mrb[98].mxu1 %vm4716_vm0, %v6667_v56 }
 0xeb1   : > { %8093 = vmatprep.mubr.msk.f32.mxu1 %vm4716_vm0, %v6668_v7  ;;  %v6724_v7 = vld [vmem:[%s10026_s0 + $0x8] sm:$0xf] }
 0xeb4   : > { %8094 = vmatmul.mubr.msk.f32.gmra.mrb[100].mxu1 %vm4716_vm0, %v6669_v62  ;;  %v6707_v62 = vld [vmem:[%s10027_s11 + $0x18] sm:$0xff] }
 0xeb5   : > { %8096 = vmatprep.mubr.msk.f32.mxu1 %vm4716_vm0, %v6670_v45  ;;  %v6738_v45 = vld [vmem:[%s10026_s0 + $0xc] sm:$0xf]  ;;  %s6752_s0 = sshll.u32 %s10030_s10, 4 }
 0xeb6   : > { %s939_s1 = scalar_lea.vmem %s8986_s4, %s6752_s0 }
 0xeb8   : > { %8097 = vmatmul.mubr.msk.f32.gmra.mrb[102].mxu1 %vm4716_vm0, %v6671_v54  ;;  %v5316_v54 = vld [vmem:[%s10027_s11] sm:$0xff] }
 0xeb9   : > { %8099 = vmatprep.mubr.msk.f32.mxu1 %vm4716_vm0, %v6672_v57  ;;  %v5317_v57 = vld [vmem:[%s10027_s11 + $0x8] sm:$0xff] }
 0xebc   : > { %8100 = vmatmul.mubr.msk.f32.gmra.mrb[104].mxu1 %vm4716_vm0, %v6673_v50  ;;  %v6722_v50 = vld [vmem:[%s10027_s11 + $0x20] sm:$0xff] }
 0xebd   : > { %8165 = vmatprep.mubr.msk.f32.mxu1 %vm5565_vm3, %v5316_v54 }
 0xf83   : > { %v8092_v12 = vpop.f32.mrb[98].mxu1 }
 0xf84   : > { %v5301_v17 = vadd.f32 %v8092_v12, %v5268_v58  ;;  %v5205_v19 = vpop.f32.mrb[99].mxu1 }
 0xf85   : > { %v5300_v16 = vadd.f32 %v5263_v5, %v5205_v19 }
 0xf86   : > { %v9879_v18 = vmax.f32 %v5301_v17, 0.0 }
 0xf87   : > { %v9877_v24 = vmax.f32 %v5300_v16, 0.0  ;;  %v8095_v41 = vpop.f32.mrb[100].mxu1 }
 0xf88   : > { %v5303_v20 = vadd.f32 %v8095_v41, %v5278_v33  ;;  %v5215_v28 = vpop.f32.mrb[101].mxu1 }
 0xf89   : > { %v5302_v21 = vadd.f32 %v5273_v59, %v5215_v28  ;;  %8104 = vmatprep.mubr.msk.f32.mxu0 %vm5319_vm2, %v9877_v24 }
 0xf8a   : > { %8105 = vmatmul.mubr.msk.f32.vlgmr.msra.gmra.mrb[146].mxu0 %vm5319_vm2, %v9879_v18  ;;  %v9888_v22 = vmax.f32 %v5303_v20, 0.0 }
 0xf8b   : > { %v9885_v9 = vmax.f32 %v5302_v21, 0.0  ;;  %v8098_v0 = vpop.f32.mrb[102].mxu1  ;;  %8117 = vmatpush3.msk.msra.mxu0 %vm2610_vm10, %v6708_v55 }
 0xf8c   : > { %v5305_v6 = vadd.f32 %v8098_v0, %v5288_v30  ;;  %v5225_v11 = vpop.f32.mrb[103].mxu1  ;;  %v6736_v0 = vld [vmem:[%s10027_s11 + $0x30] sm:$0xff] }
 0xf8d   : > { %v5304_v35 = vadd.f32 %v5283_v63, %v5225_v11  ;;  %8107 = vmatprep.mubr.msk.f32.mxu0 %vm5319_vm2, %v9885_v9  ;;  %v6723_v63 = vld [vmem:[%s10027_s11 + $0x28] sm:$0xff] }
 0xf8e   : > { %8108 = vmatmul.mubr.msk.f32.gmra.mrb[148].mxu0 %vm5319_vm2, %v9888_v22  ;;  %v9896_v27 = vmax.f32 %v5305_v6, 0.0 }
 0xf8f   : > { %v9894_v23 = vmax.f32 %v5304_v35, 0.0  ;;  %v8101_v25 = vpop.f32.mrb[104].mxu1 }
 0xf90   : > { %v5307_v29 = vadd.f32 %v8101_v25, %v5298_v36  ;;  %v5235_v31 = vpop.f32.mrb[105].mxu1 }
 0xf91   : > { %v5306_v32 = vadd.f32 %v5293_v26, %v5235_v31  ;;  %8110 = vmatprep.mubr.msk.f32.mxu0 %vm5319_vm2, %v9894_v23 }
 0xf92   : > { %8111 = vmatmul.mubr.msk.f32.gmra.mrb[150].mxu0 %vm5319_vm2, %v9896_v27  ;;  %v9904_v47 = vmax.f32 %v5307_v29, 0.0  ;;  %v6737_v29 = vld [vmem:[%s10027_s11 + $0x38] sm:$0xff] }
 0xf93   : > { %v9902_v60 = vmax.f32 %v5306_v32, 0.0  ;;  %v6121_v32 = vld [vmem:[%s10028_s15 + $0x8] sm:$0xff] }
 0xf95   : > { %8113 = vmatprep.mubr.msk.f32.mxu0 %vm5319_vm2, %v9902_v60 }
 0xf96   : > { %8114 = vmatmul.mubr.msk.f32.gmra.mrb[152].mxu0 %vm5319_vm2, %v9904_v47 }
 0xf97   : > { %8118 = vmatprep.mubr.msk.f32.mxu0 %vm5319_vm2, %v9877_v24 }
 0xf9a   : > { %8119 = vmatmul.mubr.msk.f32.vlgmr.msra.gmra.mrb[154].mxu0 %vm5319_vm2, %v9879_v18 }
 0xf9b   : > { %8121 = vmatprep.mubr.msk.f32.mxu0 %vm5319_vm2, %v9885_v9 }
 0xf9e   : > { %8122 = vmatmul.mubr.msk.f32.gmra.mrb[156].mxu0 %vm5319_vm2, %v9888_v22 }
 0xf9f   : > { %8124 = vmatprep.mubr.msk.f32.mxu0 %vm5319_vm2, %v9894_v23 }
 0xfa2   : > { %8125 = vmatmul.mubr.msk.f32.gmra.mrb[158].mxu0 %vm5319_vm2, %v9896_v27 }
 0xfa3   : > { %8127 = vmatprep.mubr.msk.f32.mxu0 %vm5319_vm2, %v9902_v60 }
 0xfa6   : > { %8128 = vmatmul.mubr.msk.f32.gmra.mrb[160].mxu0 %vm5319_vm2, %v9904_v47 }
 0xfa7   : > { %8146 = vmatprep.mubr.msk.f32.mxu0 %vm5565_vm3, %v6706_v61  ;;  %v6120_v61 = vld [vmem:[%s10028_s15] sm:$0xff] }
0x105d   : > { %v8106_v2 = vpop.f32.mrb[146].mxu0 }
0x105e   : > { %v5413_v3 = vpop.f32.mrb[147].mxu0 }
0x105f   : > { %v8605_v4 = vpack.c.bf16 %v8106_v2, %v5413_v3 }
0x1061   : > { %v8109_v53 = vpop.f32.mrb[148].mxu0  ;;  %8606 = vmatprep.subr.bf16.mxu1 %v8605_v4 }
0x1062   : > { %v5423_v44 = vpop.f32.mrb[149].mxu0  ;;  %8608 = vmatpush3.bf16.msra.mxu1 %v8605_v4 }
0x1063   : > { %v8609_v10 = vpack.c.bf16 %v8109_v53, %v5423_v44 }
0x1065   : > { %v8112_v14 = vpop.f32.mrb[150].mxu0  ;;  %8610 = vmatprep.subr.bf16.mxu1 %v8609_v10 }
0x1066   : > { %v5433_v34 = vpop.f32.mrb[151].mxu0  ;;  %8612 = vmatpush3.bf16.msra.mxu1 %v8609_v10 }
0x1067   : > { %v8613_v8 = vpack.c.bf16 %v8112_v14, %v5433_v34 }
0x1069   : > { %v8115_v51 = vpop.f32.mrb[152].mxu0  ;;  %8614 = vmatprep.subr.bf16.mxu1 %v8613_v8 }
0x106a   : > { %v5443_v13 = vpop.f32.mrb[153].mxu0  ;;  %8616 = vmatpush3.bf16.msra.mxu1 %v8613_v8 }
0x106b   : > { %v8617_v15 = vpack.c.bf16 %v8115_v51, %v5443_v13 }
0x106d   : > { %v8120_v37 = vpop.f32.mrb[154].mxu0  ;;  %8618 = vmatprep.subr.bf16.mxu1 %v8617_v15 }
0x106e   : > { %v5526_v38 = vpop.f32.mrb[155].mxu0  ;;  %8620 = vmatpush3.bf16.msra.mxu1 %v8617_v15 }
0x106f   : > { %v8589_v39 = vpack.c.bf16 %v8120_v37, %v5526_v38 }
0x1071   : > { %v8123_v40 = vpop.f32.mrb[156].mxu0  ;;  %8590 = vmatprep.subr.bf16.mxu0 %v8589_v39  ;;  %8166 = vmatmul.mubr.msk.f32.vlgmr.msra.gmra.mrb[106].mxu1 %vm5565_vm3, %v5317_v57 }
0x1072   : > { %v5536_v42 = vpop.f32.mrb[157].mxu0  ;;  %8592 = vmatpush3.bf16.msra.mxu0 %v8589_v39  ;;  %8198 = vmatprep.mubr.msk.f32.mxu1 %vm5565_vm3, %v6722_v50 }
0x1073   : > { %v8593_v43 = vpack.c.bf16 %v8123_v40, %v5536_v42 }
0x1075   : > { %v8126_v46 = vpop.f32.mrb[158].mxu0  ;;  %8594 = vmatprep.subr.bf16.mxu0 %v8593_v43 }
0x1076   : > { %v5546_v1 = vpop.f32.mrb[159].mxu0  ;;  %8596 = vmatpush3.bf16.msra.mxu0 %v8593_v43 }
0x1077   : > { %v8597_v48 = vpack.c.bf16 %v8126_v46, %v5546_v1 }
0x1079   : > { %v8129_v49 = vpop.f32.mrb[160].mxu0  ;;  %8598 = vmatprep.subr.bf16.mxu0 %v8597_v48 }
0x107a   : > { %v5556_v52 = vpop.f32.mrb[161].mxu0  ;;  %8600 = vmatpush3.bf16.msra.mxu0 %v8597_v48 }
0x107b   : > { %v8601_v56 = vpack.c.bf16 %v8129_v49, %v5556_v52 }
0x107d   : > { %8602 = vmatprep.subr.bf16.mxu0 %v8601_v56 }
0x107e   : > { %8604 = vmatpush3.bf16.msra.mxu0 %v8601_v56 }
0x107f   : > { %8168 = vmatprep.subr.msk.mxu0 %vm2610_vm10, %v6724_v7 }
0x1081   : > { %8147 = vmatmul.mubr.msk.f32.vlgmr.msra.gmra.mrb[162].mxu0 %vm5565_vm3, %v6707_v62 }
0x1082   : > { %8170 = vmatprep.mubr.msk.f32.mxu0 %vm5319_vm2, %v9877_v24  ;;  %8169 = vmatpush3.msk.msra.mxu0 %vm2610_vm10, %v6724_v7 }
0x1083   : > { %8201 = vmatprep.subr.msk.mxu0 %vm2610_vm10, %v6738_v45 }
0x1085   : > { %8171 = vmatmul.mubr.msk.f32.vlgmr.msra.gmra.mrb[164].mxu0 %vm5319_vm2, %v9879_v18 }
0x1086   : > { %8173 = vmatprep.mubr.msk.f32.mxu0 %vm5319_vm2, %v9885_v9  ;;  %8202 = vmatpush3.msk.msra.mxu0 %vm2610_vm10, %v6738_v45 }
0x1089   : > { %8174 = vmatmul.mubr.msk.f32.gmra.mrb[166].mxu0 %vm5319_vm2, %v9888_v22 }
0x108a   : > { %8176 = vmatprep.mubr.msk.f32.mxu0 %vm5319_vm2, %v9894_v23 }
0x108d   : > { %8177 = vmatmul.mubr.msk.f32.gmra.mrb[168].mxu0 %vm5319_vm2, %v9896_v27 }
0x108e   : > { %8179 = vmatprep.mubr.msk.f32.mxu0 %vm5319_vm2, %v9902_v60 }
0x1091   : > { %8180 = vmatmul.mubr.msk.f32.gmra.mrb[170].mxu0 %vm5319_vm2, %v9904_v47 }
0x1092   : > { %8203 = vmatprep.mubr.msk.f32.mxu0 %vm5319_vm2, %v9877_v24 }
0x1095   : > { %8204 = vmatmul.mubr.msk.f32.vlgmr.msra.gmra.mrb[172].mxu0 %vm5319_vm2, %v9879_v18 }
0x1096   : > { %8206 = vmatprep.mubr.msk.f32.mxu0 %vm5319_vm2, %v9885_v9 }
0x1099   : > { %8207 = vmatmul.mubr.msk.f32.gmra.mrb[174].mxu0 %vm5319_vm2, %v9888_v22 }
0x109a   : > { %8209 = vmatprep.mubr.msk.f32.mxu0 %vm5319_vm2, %v9894_v23 }
0x109d   : > { %8210 = vmatmul.mubr.msk.f32.gmra.mrb[176].mxu0 %vm5319_vm2, %v9896_v27 }
0x109e   : > { %8212 = vmatprep.mubr.msk.f32.mxu0 %vm5319_vm2, %v9902_v60 }
0x10a1   : > { %8213 = vmatmul.mubr.msk.f32.gmra.mrb[178].mxu0 %vm5319_vm2, %v9904_v47 }
0x1154   : > { %v8148_v55 = vpop.f32.mrb[162].mxu0 }
0x1155   : > { %v5638_v58 = vpop.f32.mrb[163].mxu0 }
0x1158   : > { %v8172_v5 = vpop.f32.mrb[164].mxu0 }
0x1159   : > { %v5802_v33 = vpop.f32.mrb[165].mxu0 }
0x115a   : > { %v8621_v12 = vpack.c.bf16 %v8172_v5, %v5802_v33 }
0x115c   : > { %v8175_v59 = vpop.f32.mrb[166].mxu0  ;;  %8622 = vmatprep.subr.bf16.mxu1 %v8621_v12 }
0x115d   : > { %v5812_v17 = vpop.f32.mrb[167].mxu0  ;;  %8624 = vmatpush3.bf16.msra.mxu1 %v8621_v12 }
0x115e   : > { %v8625_v19 = vpack.c.bf16 %v8175_v59, %v5812_v17 }
0x1160   : > { %v8178_v16 = vpop.f32.mrb[168].mxu0  ;;  %8626 = vmatprep.subr.bf16.mxu1 %v8625_v19 }
0x1161   : > { %v5822_v24 = vpop.f32.mrb[169].mxu0  ;;  %8628 = vmatpush3.bf16.msra.mxu1 %v8625_v19 }
0x1162   : > { %v8629_v41 = vpack.c.bf16 %v8178_v16, %v5822_v24 }
0x1164   : > { %v8181_v18 = vpop.f32.mrb[170].mxu0  ;;  %8630 = vmatprep.subr.bf16.mxu1 %v8629_v41 }
0x1165   : > { %v5832_v20 = vpop.f32.mrb[171].mxu0  ;;  %8632 = vmatpush3.bf16.msra.mxu1 %v8629_v41 }
0x1166   : > { %v8633_v28 = vpack.c.bf16 %v8181_v18, %v5832_v20 }
0x1168   : > { %8634 = vmatprep.subr.bf16.mxu1 %v8633_v28  ;;  %v8205_v30 = vpop.f32.mrb[172].mxu0 }
0x1169   : > { %8636 = vmatpush3.bf16.msra.mxu1 %v8633_v28  ;;  %v5998_v21 = vpop.f32.mrb[173].mxu0 }
0x116a   : > { %v8637_v9 = vpack.c.bf16 %v8205_v30, %v5998_v21 }
0x116c   : > { %v8208_v22 = vpop.f32.mrb[174].mxu0  ;;  %8638 = vmatprep.subr.bf16.mxu1 %v8637_v9  ;;  %8199 = vmatmul.mubr.msk.f32.vlgmr.msra.gmra.mrb[106].mxu1 %vm5565_vm3, %v6723_v63 }
0x116d   : > { %v6008_v6 = vpop.f32.mrb[175].mxu0  ;;  %8640 = vmatpush3.bf16.msra.mxu1 %v8637_v9  ;;  %8231 = vmatprep.mubr.msk.f32.mxu1 %vm5565_vm3, %v6736_v0 }
0x116e   : > { %v8641_v11 = vpack.c.bf16 %v8208_v22, %v6008_v6 }
0x1170   : > { %v8211_v35 = vpop.f32.mrb[176].mxu0  ;;  %8642 = vmatprep.subr.bf16.mxu1 %v8641_v11 }
0x1171   : > { %v6018_v36 = vpop.f32.mrb[177].mxu0  ;;  %8644 = vmatpush3.bf16.msra.mxu1 %v8641_v11 }
0x1172   : > { %v8645_v23 = vpack.c.bf16 %v8211_v35, %v6018_v36 }
0x1174   : > { %v8214_v25 = vpop.f32.mrb[178].mxu0  ;;  %8646 = vmatprep.subr.bf16.mxu1 %v8645_v23 }
0x1175   : > { %v6028_v26 = vpop.f32.mrb[179].mxu0  ;;  %8648 = vmatpush3.bf16.msra.mxu1 %v8645_v23 }
0x1176   : > { %v8649_v27 = vpack.c.bf16 %v8214_v25, %v6028_v26 }
0x1178   : > { %8650 = vmatprep.subr.bf16.mxu1 %v8649_v27 }
0x1179   : > { %8652 = vmatpush3.bf16.msra.mxu1 %v8649_v27 }
0x117c   : > { %8232 = vmatmul.mubr.msk.f32.vlgmr.msra.gmra.mrb[106].mxu1 %vm5565_vm3, %v6737_v29 }
0x124f   : > { %v8233_v31 = vpop.f32.mrb[106].mxu1 }
0x1250   : > { %v8653_v60 = vadd.f32 %v8233_v31, %v8148_v55  ;;  %v6109_v47 = vpop.f32.mrb[107].mxu1 }
0x1251   : > { %v8654_v2 = vadd.f32 %v6109_v47, %v5638_v58 }
0x1252   : > { %v6123_v3 = vadd.f32 %v8653_v60, %v6121_v32 }
0x1253   : > { %v6122_v4 = vadd.f32 %v8654_v2, %v6120_v61 }
0x1254   : > { %6126 = vst.msk [vmem:[%s939_s1 + $0x8] sm:$0xff] %vm6124_vm4, %v6123_v3 }
0x1255   : > { %6125 = vst.msk [vmem:[%s939_s1] sm:$0xff] %vm6124_vm4, %v6122_v4 }
0x1256 PF: > { %s70_s7 = sadd.s32 1, %s8797_s7  }
0x1257   : > { %p67_p4 = scmp.ge.s32.totalorder %s70_s7, 4  }
0x1259   :  { %69 = sbr.rel (!%p67_p4) target bundleno = 44 (0x2c), region = 239 }

</bundles_post_ra>
